<compile_context>
chip_gen: v5e
topology: v5e:2x2
jax: 0.10.0
libtpu: 0.0.40
codegen_flags: <defaults>
</compile_context>

<pallas_src>
import functools

import jax
import jax.numpy as jnp
from jax import lax
from jax.experimental import pallas as pl
from jax.experimental.pallas import tpu as pltpu

LEAKY_SLOPE = 0.01   # nn.LeakyReLU() default
BN_EPS = 1e-5        # nn.BatchNorm2d default

# Slice table for the 3x3 stride-2 conv on the parity-split input
# [N, Ho+1, 2, Wo+1, 2*Cin]:  entry = (h_start, h_parity, w_start), order = kh-major,
# then the two column-pair slices (s=0 covers kw=0/1, s=1 covers kw=2).
_TAPS = ((0, 0, 0), (0, 0, 1), (0, 1, 0), (0, 1, 1), (1, 0, 0), (1, 0, 1))


def _vmem_limit_bytes():
    """Per-generation VMEM limit (v7x has 64 MiB physical; v5e/v6e have 128 MiB)."""
    try:
        cap = pltpu.get_tpu_info().vmem_capacity_bytes
    except Exception:  # interpret mode / older runtimes
        cap = 64 * 1024 * 1024
    return int(min(cap * 3 // 4, 96 * 1024 * 1024))


def _rup(x, m):
    return (x + m - 1) // m * m


def _conv_vmem_bytes(tb, ho, wo, cin, cout):
    """Lane/sublane-padding-aware VMEM estimate (bytes) for one conv grid step."""
    lane_in, lane_out = _rup(2 * cin, 128), _rup(cout, 128)
    tm = tb * ho * wo
    in_blk = tb * (ho + 1) * 2 * _rup(wo + 1, 16) * lane_in * 2      # bf16 input block
    out_blk = _rup(tm, 16) * lane_out * 2                            # bf16 output block
    wts = 6 * _rup(2 * cin, 16) * lane_out * 2                       # resident weights
    acc = _rup(tm, 8) * lane_out * 4                                 # f32 accumulator
    tmp = 2 * _rup(tm, 16) * lane_in * 2                             # live im2col slices
    return 2 * (in_blk + out_blk + wts) + acc + tmp                  # x2: double buffering


def _pick_batch_tile(n, ho, wo, cin, cout, budget):
    """Largest TB with TB | N and 8-aligned output rows (or TB == N) fitting the budget."""
    valid = [t for t in range(1, n + 1)
             if n % t == 0 and ((t * ho * wo) % 8 == 0 or t == n)]
    fits = [t for t in valid if _conv_vmem_bytes(t, ho, wo, cin, cout) <= budget]
    return max(fits) if fits else min(valid)


# ------------------------------ Pallas kernels ------------------------------

def _make_conv_kernel(tb, ho, wo, cin, cout, count):
    """Fused Conv(3x3, s=2, p=1) + BatchNorm(train) + LeakyReLU for one batch tile."""
    tm = tb * ho * wo
    inv_count = 1.0 / float(count)

    def kernel(x_ref, w_ref, gb_ref, o_ref, stats_ref, sc_ref):
        ph = pl.program_id(0)          # 0: conv + BN statistics, 1: conv + normalize + act
        it = pl.program_id(1)          # batch tile index
        nt = pl.num_programs(1)

        # Conv via in-kernel im2col: 6 unit-stride static slices -> MXU, f32 accumulation.
        # (Conv bias is a mathematical no-op under training-mode BN, so it is dropped.)
        acc = jnp.zeros((tm, cout), jnp.float32)
        for idx, (hs, hp, ws) in enumerate(_TAPS):
            xs = x_ref[:, hs:hs + ho, hp:hp + 1, ws:ws + wo, :]   # [tb, ho, 1, wo, 2*cin]
            acc = acc + jnp.dot(xs.reshape(tm, 2 * cin), w_ref[idx],
                                preferred_element_type=jnp.float32)

        # Phase 0: exact global BatchNorm batch statistics, accumulated in VMEM scratch.
        @pl.when((ph == 0) & (it == 0))
        def _():
            stats_ref[...] = jnp.zeros((2, cout), jnp.float32)

        @pl.when(ph == 0)
        def _():
            stats_ref[0:1, :] += jnp.sum(acc, axis=0, keepdims=True)
            stats_ref[1:2, :] += jnp.sum(acc * acc, axis=0, keepdims=True)

        @pl.when((ph == 0) & (it == nt - 1))
        def _():
            mean = stats_ref[0:1, :] * inv_count
            var = jnp.maximum(stats_ref[1:2, :] * inv_count - mean * mean, 0.0)
            scale = gb_ref[0:1, :] * lax.rsqrt(var + BN_EPS)      # gamma * rsqrt(var+eps)
            sc_ref[0:1, :] = scale
            sc_ref[1:2, :] = gb_ref[1:2, :] - mean * scale        # beta - mean*scale

        # Phase 1: folded BN affine + LeakyReLU; the only HBM write of the output.
        @pl.when(ph == 1)
        def _():
            z = acc * sc_ref[0:1, :] + sc_ref[1:2, :]
            o_ref[...] = jnp.where(z >= 0.0, z, LEAKY_SLOPE * z).astype(o_ref.dtype)

    return kernel


def _fc_heads_kernel(x_ref, w_ref, b_ref, o_ref):
    """Fused mu/log_var heads: x [tn, F] bf16, w [F, 2L] bf16, b [1, 2L] f32 -> f32."""
    o_ref[...] = (jnp.dot(x_ref[...], w_ref[...], preferred_element_type=jnp.float32)
                  + b_ref[...])


# ------------------------------ host-side wrappers ------------------------------

def conv_bn_lrelu(x_nhwc, wstack, gb):
    """One encoder block.  x_nhwc [N,H,W,Cin] bf16 (H, W even); wstack [6, 2*Cin, Cout]
    bf16; gb [2, Cout] f32 (gamma; beta).  Returns [N, H//2, W//2, Cout] bf16."""
    n, h, w, cin = x_nhwc.shape
    assert h % 2 == 0 and w % 2 == 0, "stride-2 blocks assume even spatial dims"
    ho, wo = h // 2, w // 2
    cout = wstack.shape[-1]

    # Pad once (cheap XLA op).  The reshape to the parity-split layout preserves memory
    # order, i.e. it is free -- no im2col patches array is ever materialized in HBM.
    xp = jnp.pad(x_nhwc, ((0, 0), (1, 1), (1, 1), (0, 0)))
    xr = xp.reshape(n, ho + 1, 2, wo + 1, 2 * cin)

    vmem_limit = _vmem_limit_bytes()
    tb = _pick_batch_tile(n, ho, wo, cin, cout, budget=int(vmem_limit * 0.6))
    nt = n // tb
    tm = tb * ho * wo

    kernel = _make_conv_kernel(tb, ho, wo, cin, cout, count=n * ho * wo)
    y = pl.pallas_call(
        kernel,
        grid=(2, nt),                                              # (phase, batch tile)
        in_specs=[
            pl.BlockSpec((tb, ho + 1, 2, wo + 1, 2 * cin),
                         lambda ph, i: (i, 0, 0, 0, 0)),            # streamed batch band
            pl.BlockSpec((6, 2 * cin, cout), lambda ph, i: (0, 0, 0)),   # resident weights
            pl.BlockSpec((2, cout), lambda ph, i: (0, 0)),               # resident gamma/beta
        ],
        # phase*i keeps the output block index constant during phase 0, so the output is
        # only flushed to HBM once phase 1 has written real data into each block.
        out_specs=pl.BlockSpec((tm, cout), lambda ph, i: (ph * i, 0)),
        out_shape=jax.ShapeDtypeStruct((n * ho * wo, cout), jnp.bfloat16),
        scratch_shapes=[pltpu.VMEM((2, cout), jnp.float32),    # [channel sum; sum of squares]
                        pltpu.VMEM((2, cout), jnp.float32)],   # [scale; shift]
        compiler_params=pltpu.CompilerParams(
            dimension_semantics=("arbitrary", "arbitrary"),    # scratch carried across grid
            vmem_limit_bytes=vmem_limit),
    )(xr, wstack, gb)
    return y.reshape(n, ho, wo, cout)


def _pick_fc_tile(n):
    if n <= 1024:
        return n
    for t in range(1024, 7, -8):
        if n % t == 0:
            return t
    return n


def fc_heads(feat, w_heads, b_heads):
    """feat [N, F] bf16, w_heads [F, 2L] bf16, b_heads [2L] f32 -> (mu, log_var) f32."""
    n, f = feat.shape
    two_l = w_heads.shape[1]
    tn = _pick_fc_tile(n)
    # TODO(synk): pad 2L toward 128 lanes for a lane-dense store if latent_dim grows.
    out = pl.pallas_call(
        _fc_heads_kernel,
        grid=(n // tn,),
        in_specs=[pl.BlockSpec((tn, f), lambda i: (i, 0)),
                  pl.BlockSpec((f, two_l), lambda i: (0, 0)),
                  pl.BlockSpec((1, two_l), lambda i: (0, 0))],
        out_specs=pl.BlockSpec((tn, two_l), lambda i: (i, 0)),
        out_shape=jax.ShapeDtypeStruct((n, two_l), jnp.float32),
        compiler_params=pltpu.CompilerParams(
            dimension_semantics=("parallel",),
            vmem_limit_bytes=_vmem_limit_bytes()),
    )(feat, w_heads, b_heads.reshape(1, two_l))
    latent = two_l // 2
    return out[:, :latent], out[:, latent:]


def init_params(key, in_channels, latent_dim, hidden_dims, spatial):
    """Matches the PyTorch module's parameter structure (random init); also keeps f32
    copies so the forward pass can be cross-checked against a pure-JAX reference."""
    params = {"conv": []}
    keys = jax.random.split(key, len(hidden_dims) + 2)
    cin = in_channels
    for i, h_dim in enumerate(hidden_dims):
        w = 0.05 * jax.random.normal(keys[i], (3, 3, cin, h_dim), dtype=jnp.float32)  # HWIO
        gamma = jnp.ones((h_dim,), jnp.float32)
        beta = jnp.zeros((h_dim,), jnp.float32)
        # Per-tap MXU weights for the parity-split in-kernel im2col:
        #   s=0 slice sees original columns (2w, 2w+1)   -> rows [w[kh,0]; w[kh,1]]
        #   s=1 slice sees original columns (2w+2, 2w+3) -> rows [w[kh,2]; 0]
        pieces = []
        for kh in range(3):
            pieces.append(jnp.concatenate([w[kh, 0], w[kh, 1]], axis=0))
            pieces.append(jnp.concatenate(
                [w[kh, 2], jnp.zeros((cin, h_dim), jnp.float32)], axis=0))
        params["conv"].append({
            # Conv2d bias is exactly cancelled by the training-mode BN mean subtraction,
            # so it is never applied (and initialized to zero here, as in the reference).
            "wstack": jnp.stack(pieces).astype(jnp.bfloat16),    # [6, 2*cin, h_dim]
            "gb": jnp.stack([gamma, beta]),                      # [2, h_dim] f32
            "w_hwio": w, "gamma": gamma, "beta": beta,           # f32 copies (reference)
        })
        cin = h_dim

    c_last = hidden_dims[-1]
    hf = wf = spatial // (2 ** len(hidden_dims))        # final spatial map (2x2 for the spec)
    feat = c_last * hf * wf                             # == hidden_dims[-1] * 4 in the spec
    w_mu = 0.05 * jax.random.normal(keys[-2], (feat, latent_dim), dtype=jnp.float32)
    w_var = 0.05 * jax.random.normal(keys[-1], (feat, latent_dim), dtype=jnp.float32)
    b_mu = jnp.zeros((latent_dim,), jnp.float32)
    b_var = jnp.zeros((latent_dim,), jnp.float32)

    # One-time permutation of the FC rows from PyTorch's NCHW-flatten order to our
    # NHWC-flatten order (zero runtime cost), plus fusion of both heads into one matmul.
    hh, ww, cc = jnp.meshgrid(jnp.arange(hf), jnp.arange(wf), jnp.arange(c_last),
                              indexing="ij")
    perm = (cc * (hf * wf) + hh * wf + ww).reshape(-1)           # NHWC position -> NCHW row
    params["w_heads_bf16"] = jnp.concatenate([w_mu, w_var], axis=1)[perm].astype(jnp.bfloat16)
    params["b_heads"] = jnp.concatenate([b_mu, b_var])
    params["w_mu"], params["w_var"] = w_mu, w_var                # f32 copies (reference)
    params["b_mu"], params["b_var"] = b_mu, b_var
    return params


def encoder_forward(params, x_nchw):
    """x_nchw: [N, C, H, W] f32 (PyTorch convention). Returns (mu, log_var) in f32."""
    x = jnp.transpose(x_nchw, (0, 2, 3, 1)).astype(jnp.bfloat16)   # NHWC, bf16 activations
    for layer in params["conv"]:
        x = conv_bn_lrelu(x, layer["wstack"], layer["gb"])
    n = x.shape[0]
    feat = x.reshape(n, -1)            # NHWC flatten; head rows were pre-permuted to match
    return fc_heads(feat, params["w_heads_bf16"], params["b_heads"])


def encoder_reference(params, x_nchw):
    """Pure-JAX f32 reference with PyTorch semantics (training-mode BN, NCHW flatten)."""
    x = jnp.transpose(x_nchw, (0, 2, 3, 1))
    for layer in params["conv"]:
        y = lax.conv_general_dilated(x, layer["w_hwio"], window_strides=(2, 2),
                                     padding=((1, 1), (1, 1)),
                                     dimension_numbers=("NHWC", "HWIO", "NHWC"))
        mean = jnp.mean(y, axis=(0, 1, 2))
        var = jnp.var(y, axis=(0, 1, 2))
        y = (y - mean) * lax.rsqrt(var + BN_EPS) * layer["gamma"] + layer["beta"]
        x = jnp.where(y >= 0.0, y, LEAKY_SLOPE * y)
    xf = jnp.transpose(x, (0, 3, 1, 2)).reshape(x.shape[0], -1)    # NCHW flatten (PyTorch)
    mu = xf @ params["w_mu"] + params["b_mu"]
    log_var = xf @ params["w_var"] + params["b_var"]
    return mu, log_var


if __name__ == "__main__":
    key = jax.random.PRNGKey(0)
    in_channels, latent_dim = 4, 8
    hidden_dims = [16, 32, 64]        # 3 stride-2 convs: 16 -> 8 -> 4 -> 2
    batch, spatial = 2, 16

    k_x, k_p = jax.random.split(key)
    x = jax.random.normal(k_x, (batch, in_channels, spatial, spatial), dtype=jnp.float32)
    params = init_params(k_p, in_channels, latent_dim, hidden_dims, spatial)

    fwd = jax.jit(functools.partial(encoder_forward, params))
    mu, log_var = fwd(x)
    jax.block_until_ready((mu, log_var))

    assert mu.shape == (batch, latent_dim) and log_var.shape == (batch, latent_dim)
    assert mu.dtype == jnp.float32 and log_var.dtype == jnp.float32
    assert bool(jnp.all(jnp.isfinite(mu))) and bool(jnp.all(jnp.isfinite(log_var)))

    # Cross-check against a pure-JAX f32 reference (bf16 activations/weights -> loose tol).
    mu_ref, lv_ref = encoder_reference(params, x)
    assert float(jnp.max(jnp.abs(mu - mu_ref))) < 0.2, "mu mismatch vs reference"
    assert float(jnp.max(jnp.abs(log_var - lv_ref))) < 0.2, "log_var mismatch vs reference"

    print("KERNEL_OK")
</pallas_src>

<mosaic_0001>
module attributes {stable_mosaic.version = 11 : i64} {
  func.func @kernel(%arg0: i32, %arg1: i32, %arg2: memref<2x9x2x9x8xbf16, #tpu.memory_space<vmem>>, %arg3: memref<6x8x16xbf16, #tpu.memory_space<vmem>>, %arg4: memref<2x16xf32, #tpu.memory_space<vmem>>, %arg5: memref<128x16xbf16, #tpu.memory_space<vmem>>, %arg6: memref<2x16xf32, #tpu.memory_space<vmem>>, %arg7: memref<2x16xf32, #tpu.memory_space<vmem>>) attributes {dimension_semantics = [#tpu.dimension_semantics<arbitrary>, #tpu.dimension_semantics<arbitrary>], iteration_bounds = array<i64: 2, 1>, scalar_prefetch = 0 : i64, scratch_operands = 2 : i64, tpu.core_type = #tpu.core_type<tc>, window_params = [{transform_indices = @transform_0, window_bounds = array<i64: 2, 9, 2, 9, 8>}, {pipeline_mode = #tpu.pipeline_mode<synchronous>, transform_indices = @transform_1, window_bounds = array<i64: 6, 8, 16>}, {pipeline_mode = #tpu.pipeline_mode<synchronous>, transform_indices = @transform_2, window_bounds = array<i64: 2, 16>}, {transform_indices = @transform_3, window_bounds = array<i64: 128, 16>}]} {
    %cst = arith.constant 0.000000e+00 : f32
    %0 = vector.broadcast %cst : f32 to vector<128x16xf32>
    %c0 = arith.constant 0 : index
    %c0_0 = arith.constant 0 : index
    %c0_1 = arith.constant 0 : index
    %c0_2 = arith.constant 0 : index
    %c0_3 = arith.constant 0 : index
    %1 = vector.load %arg2[%c0, %c0_0, %c0_1, %c0_2, %c0_3] : memref<2x9x2x9x8xbf16, #tpu.memory_space<vmem>>, vector<2x8x1x8x8xbf16>
    %2 = vector.shape_cast %1 : vector<2x8x1x8x8xbf16> to vector<128x8xbf16>
    %c0_4 = arith.constant 0 : index
    %c0_5 = arith.constant 0 : index
    %c0_6 = arith.constant 0 : index
    %3 = vector.load %arg3[%c0_4, %c0_5, %c0_6] : memref<6x8x16xbf16, #tpu.memory_space<vmem>>, vector<1x8x16xbf16>
    %4 = vector.shape_cast %3 : vector<1x8x16xbf16> to vector<8x16xbf16>
    %cst_7 = arith.constant dense<0.000000e+00> : vector<128x16xf32>
    %5 = tpu.matmul %2, %4, %cst_7 {dimension_numbers = #tpu.dot_dimension_numbers<[1], [0], [0], [1], [0, 0, 1, 1], [], []>} : vector<128x8xbf16>, vector<8x16xbf16>, vector<128x16xf32> -> vector<128x16xf32>
    %6 = arith.addf %0, %5 : vector<128x16xf32>
    %c0_8 = arith.constant 0 : index
    %c0_9 = arith.constant 0 : index
    %c0_10 = arith.constant 0 : index
    %c1 = arith.constant 1 : index
    %c0_11 = arith.constant 0 : index
    %7 = vector.load %arg2[%c0_8, %c0_9, %c0_10, %c1, %c0_11] : memref<2x9x2x9x8xbf16, #tpu.memory_space<vmem>>, vector<2x8x1x8x8xbf16>
    %8 = vector.shape_cast %7 : vector<2x8x1x8x8xbf16> to vector<128x8xbf16>
    %c1_12 = arith.constant 1 : index
    %c0_13 = arith.constant 0 : index
    %c0_14 = arith.constant 0 : index
    %9 = vector.load %arg3[%c1_12, %c0_13, %c0_14] : memref<6x8x16xbf16, #tpu.memory_space<vmem>>, vector<1x8x16xbf16>
    %10 = vector.shape_cast %9 : vector<1x8x16xbf16> to vector<8x16xbf16>
    %cst_15 = arith.constant dense<0.000000e+00> : vector<128x16xf32>
    %11 = tpu.matmul %8, %10, %cst_15 {dimension_numbers = #tpu.dot_dimension_numbers<[1], [0], [0], [1], [0, 0, 1, 1], [], []>} : vector<128x8xbf16>, vector<8x16xbf16>, vector<128x16xf32> -> vector<128x16xf32>
    %12 = arith.addf %6, %11 : vector<128x16xf32>
    %c0_16 = arith.constant 0 : index
    %c0_17 = arith.constant 0 : index
    %c1_18 = arith.constant 1 : index
    %c0_19 = arith.constant 0 : index
    %c0_20 = arith.constant 0 : index
    %13 = vector.load %arg2[%c0_16, %c0_17, %c1_18, %c0_19, %c0_20] : memref<2x9x2x9x8xbf16, #tpu.memory_space<vmem>>, vector<2x8x1x8x8xbf16>
    %14 = vector.shape_cast %13 : vector<2x8x1x8x8xbf16> to vector<128x8xbf16>
    %c2 = arith.constant 2 : index
    %c0_21 = arith.constant 0 : index
    %c0_22 = arith.constant 0 : index
    %15 = vector.load %arg3[%c2, %c0_21, %c0_22] : memref<6x8x16xbf16, #tpu.memory_space<vmem>>, vector<1x8x16xbf16>
    %16 = vector.shape_cast %15 : vector<1x8x16xbf16> to vector<8x16xbf16>
    %cst_23 = arith.constant dense<0.000000e+00> : vector<128x16xf32>
    %17 = tpu.matmul %14, %16, %cst_23 {dimension_numbers = #tpu.dot_dimension_numbers<[1], [0], [0], [1], [0, 0, 1, 1], [], []>} : vector<128x8xbf16>, vector<8x16xbf16>, vector<128x16xf32> -> vector<128x16xf32>
    %18 = arith.addf %12, %17 : vector<128x16xf32>
    %c0_24 = arith.constant 0 : index
    %c0_25 = arith.constant 0 : index
    %c1_26 = arith.constant 1 : index
    %c1_27 = arith.constant 1 : index
    %c0_28 = arith.constant 0 : index
    %19 = vector.load %arg2[%c0_24, %c0_25, %c1_26, %c1_27, %c0_28] : memref<2x9x2x9x8xbf16, #tpu.memory_space<vmem>>, vector<2x8x1x8x8xbf16>
    %20 = vector.shape_cast %19 : vector<2x8x1x8x8xbf16> to vector<128x8xbf16>
    %c3 = arith.constant 3 : index
    %c0_29 = arith.constant 0 : index
    %c0_30 = arith.constant 0 : index
    %21 = vector.load %arg3[%c3, %c0_29, %c0_30] : memref<6x8x16xbf16, #tpu.memory_space<vmem>>, vector<1x8x16xbf16>
    %22 = vector.shape_cast %21 : vector<1x8x16xbf16> to vector<8x16xbf16>
    %cst_31 = arith.constant dense<0.000000e+00> : vector<128x16xf32>
    %23 = tpu.matmul %20, %22, %cst_31 {dimension_numbers = #tpu.dot_dimension_numbers<[1], [0], [0], [1], [0, 0, 1, 1], [], []>} : vector<128x8xbf16>, vector<8x16xbf16>, vector<128x16xf32> -> vector<128x16xf32>
    %24 = arith.addf %18, %23 : vector<128x16xf32>
    %c0_32 = arith.constant 0 : index
    %c1_33 = arith.constant 1 : index
    %c0_34 = arith.constant 0 : index
    %c0_35 = arith.constant 0 : index
    %c0_36 = arith.constant 0 : index
    %25 = vector.load %arg2[%c0_32, %c1_33, %c0_34, %c0_35, %c0_36] : memref<2x9x2x9x8xbf16, #tpu.memory_space<vmem>>, vector<2x8x1x8x8xbf16>
    %26 = vector.shape_cast %25 : vector<2x8x1x8x8xbf16> to vector<128x8xbf16>
    %c4 = arith.constant 4 : index
    %c0_37 = arith.constant 0 : index
    %c0_38 = arith.constant 0 : index
    %27 = vector.load %arg3[%c4, %c0_37, %c0_38] : memref<6x8x16xbf16, #tpu.memory_space<vmem>>, vector<1x8x16xbf16>
    %28 = vector.shape_cast %27 : vector<1x8x16xbf16> to vector<8x16xbf16>
    %cst_39 = arith.constant dense<0.000000e+00> : vector<128x16xf32>
    %29 = tpu.matmul %26, %28, %cst_39 {dimension_numbers = #tpu.dot_dimension_numbers<[1], [0], [0], [1], [0, 0, 1, 1], [], []>} : vector<128x8xbf16>, vector<8x16xbf16>, vector<128x16xf32> -> vector<128x16xf32>
    %30 = arith.addf %24, %29 : vector<128x16xf32>
    %c0_40 = arith.constant 0 : index
    %c1_41 = arith.constant 1 : index
    %c0_42 = arith.constant 0 : index
    %c1_43 = arith.constant 1 : index
    %c0_44 = arith.constant 0 : index
    %31 = vector.load %arg2[%c0_40, %c1_41, %c0_42, %c1_43, %c0_44] : memref<2x9x2x9x8xbf16, #tpu.memory_space<vmem>>, vector<2x8x1x8x8xbf16>
    %32 = vector.shape_cast %31 : vector<2x8x1x8x8xbf16> to vector<128x8xbf16>
    %c5 = arith.constant 5 : index
    %c0_45 = arith.constant 0 : index
    %c0_46 = arith.constant 0 : index
    %33 = vector.load %arg3[%c5, %c0_45, %c0_46] : memref<6x8x16xbf16, #tpu.memory_space<vmem>>, vector<1x8x16xbf16>
    %34 = vector.shape_cast %33 : vector<1x8x16xbf16> to vector<8x16xbf16>
    %cst_47 = arith.constant dense<0.000000e+00> : vector<128x16xf32>
    %35 = tpu.matmul %32, %34, %cst_47 {dimension_numbers = #tpu.dot_dimension_numbers<[1], [0], [0], [1], [0, 0, 1, 1], [], []>} : vector<128x8xbf16>, vector<8x16xbf16>, vector<128x16xf32> -> vector<128x16xf32>
    %36 = arith.addf %30, %35 : vector<128x16xf32>
    %c0_i32 = arith.constant 0 : i32
    %37 = arith.cmpi eq, %arg0, %c0_i32 : i32
    %c0_i32_48 = arith.constant 0 : i32
    %38 = arith.cmpi eq, %arg1, %c0_i32_48 : i32
    %39 = arith.andi %37, %38 : i1
    %40 = arith.extui %39 : i1 to i32
    %c0_i32_49 = arith.constant 0 : i32
    %41 = arith.cmpi ne, %40, %c0_i32_49 : i32
    scf.if %41 {
      %cst_56 = arith.constant 0.000000e+00 : f32
      %53 = vector.broadcast %cst_56 : f32 to vector<2x16xf32>
      %c0_57 = arith.constant 0 : index
      %c0_58 = arith.constant 0 : index
      %54 = vector.load %arg6[%c0_57, %c0_58] : memref<2x16xf32, #tpu.memory_space<vmem>>, vector<2x16xf32>
      tpu.vector_store %arg6[%c0_57, %c0_58], %53 {strides = array<i32>} : memref<2x16xf32, #tpu.memory_space<vmem>>, vector<2x16xf32>,
    } else {
    }
    %c0_i32_50 = arith.constant 0 : i32
    %42 = arith.cmpi eq, %arg0, %c0_i32_50 : i32
    %43 = arith.extui %42 : i1 to i32
    %c0_i32_51 = arith.constant 0 : i32
    %44 = arith.cmpi ne, %43, %c0_i32_51 : i32
    scf.if %44 {
      %c0_56 = arith.constant 0 : index
      %c0_57 = arith.constant 0 : index
      %53 = vector.load %arg6[%c0_56, %c0_57] : memref<2x16xf32, #tpu.memory_space<vmem>>, vector<1x16xf32>
      %cst_58 = arith.constant dense<0.000000e+00> : vector<16xf32>
      %54 = vector.multi_reduction <add>, %36, %cst_58 [0] : vector<128x16xf32> to vector<16xf32>
      %55 = vector.shape_cast %54 : vector<16xf32> to vector<1x16xf32>
      %56 = arith.addf %53, %55 : vector<1x16xf32>
      %c0_59 = arith.constant 0 : index
      %c0_60 = arith.constant 0 : index
      %57 = vector.load %arg6[%c0_59, %c0_60] : memref<2x16xf32, #tpu.memory_space<vmem>>, vector<1x16xf32>
      tpu.vector_store %arg6[%c0_59, %c0_60], %56 {strides = array<i32>} : memref<2x16xf32, #tpu.memory_space<vmem>>, vector<1x16xf32>,
      %c1_61 = arith.constant 1 : index
      %c0_62 = arith.constant 0 : index
      %58 = vector.load %arg6[%c1_61, %c0_62] : memref<2x16xf32, #tpu.memory_space<vmem>>, vector<1x16xf32>
      %59 = arith.mulf %36, %36 : vector<128x16xf32>
      %cst_63 = arith.constant dense<0.000000e+00> : vector<16xf32>
      %60 = vector.multi_reduction <add>, %59, %cst_63 [0] : vector<128x16xf32> to vector<16xf32>
      %61 = vector.shape_cast %60 : vector<16xf32> to vector<1x16xf32>
      %62 = arith.addf %58, %61 : vector<1x16xf32>
      %c1_64 = arith.constant 1 : index
      %c0_65 = arith.constant 0 : index
      %63 = vector.load %arg6[%c1_64, %c0_65] : memref<2x16xf32, #tpu.memory_space<vmem>>, vector<1x16xf32>
      tpu.vector_store %arg6[%c1_64, %c0_65], %62 {strides = array<i32>} : memref<2x16xf32, #tpu.memory_space<vmem>>, vector<1x16xf32>,
    } else {
    }
    %c0_i32_52 = arith.constant 0 : i32
    %45 = arith.cmpi eq, %arg0, %c0_i32_52 : i32
    %c0_i32_53 = arith.constant 0 : i32
    %46 = arith.cmpi eq, %arg1, %c0_i32_53 : i32
    %47 = arith.andi %45, %46 : i1
    %48 = arith.extui %47 : i1 to i32
    %c0_i32_54 = arith.constant 0 : i32
    %49 = arith.cmpi ne, %48, %c0_i32_54 : i32
    scf.if %49 {
      %c0_56 = arith.constant 0 : index
      %c0_57 = arith.constant 0 : index
      %53 = vector.load %arg6[%c0_56, %c0_57] : memref<2x16xf32, #tpu.memory_space<vmem>>, vector<1x16xf32>
      %cst_58 = arith.constant 7.812500e-03 : f32
      %54 = vector.broadcast %cst_58 : f32 to vector<1x16xf32>
      %55 = arith.mulf %53, %54 : vector<1x16xf32>
      %c1_59 = arith.constant 1 : index
      %c0_60 = arith.constant 0 : index
      %56 = vector.load %arg6[%c1_59, %c0_60] : memref<2x16xf32, #tpu.memory_space<vmem>>, vector<1x16xf32>
      %cst_61 = arith.constant 7.812500e-03 : f32
      %57 = vector.broadcast %cst_61 : f32 to vector<1x16xf32>
      %58 = arith.mulf %56, %57 : vector<1x16xf32>
      %59 = arith.mulf %55, %55 : vector<1x16xf32>
      %60 = arith.subf %58, %59 : vector<1x16xf32>
      %cst_62 = arith.constant 0.000000e+00 : f32
      %61 = vector.broadcast %cst_62 : f32 to vector<1x16xf32>
      %62 = arith.maximumf %60, %61 : vector<1x16xf32>
      %c0_63 = arith.constant 0 : index
      %c0_64 = arith.constant 0 : index
      %63 = vector.load %arg4[%c0_63, %c0_64] : memref<2x16xf32, #tpu.memory_space<vmem>>, vector<1x16xf32>
      %cst_65 = arith.constant 9.99999974E-6 : f32
      %64 = vector.broadcast %cst_65 : f32 to vector<1x16xf32>
      %65 = arith.addf %62, %64 : vector<1x16xf32>
      %66 = math.rsqrt %65 : vector<1x16xf32>
      %67 = arith.mulf %63, %66 : vector<1x16xf32>
      %c0_66 = arith.constant 0 : index
      %c0_67 = arith.constant 0 : index
      %68 = vector.load %arg7[%c0_66, %c0_67] : memref<2x16xf32, #tpu.memory_space<vmem>>, vector<1x16xf32>
      tpu.vector_store %arg7[%c0_66, %c0_67], %67 {strides = array<i32>} : memref<2x16xf32, #tpu.memory_space<vmem>>, vector<1x16xf32>,
      %c1_68 = arith.constant 1 : index
      %c0_69 = arith.constant 0 : index
      %69 = vector.load %arg4[%c1_68, %c0_69] : memref<2x16xf32, #tpu.memory_space<vmem>>, vector<1x16xf32>
      %70 = arith.mulf %55, %67 : vector<1x16xf32>
      %71 = arith.subf %69, %70 : vector<1x16xf32>
      %c1_70 = arith.constant 1 : index
      %c0_71 = arith.constant 0 : index
      %72 = vector.load %arg7[%c1_70, %c0_71] : memref<2x16xf32, #tpu.memory_space<vmem>>, vector<1x16xf32>
      tpu.vector_store %arg7[%c1_70, %c0_71], %71 {strides = array<i32>} : memref<2x16xf32, #tpu.memory_space<vmem>>, vector<1x16xf32>,
    } else {
    }
    %c1_i32 = arith.constant 1 : i32
    %50 = arith.cmpi eq, %arg0, %c1_i32 : i32
    %51 = arith.extui %50 : i1 to i32
    %c0_i32_55 = arith.constant 0 : i32
    %52 = arith.cmpi ne, %51, %c0_i32_55 : i32
    scf.if %52 {
      %c0_56 = arith.constant 0 : index
      %c0_57 = arith.constant 0 : index
      %53 = vector.load %arg7[%c0_56, %c0_57] : memref<2x16xf32, #tpu.memory_space<vmem>>, vector<1x16xf32>
      %54 = vector.broadcast %53 : vector<1x16xf32> to vector<128x16xf32>
      %55 = arith.mulf %36, %54 : vector<128x16xf32>
      %c1_58 = arith.constant 1 : index
      %c0_59 = arith.constant 0 : index
      %56 = vector.load %arg7[%c1_58, %c0_59] : memref<2x16xf32, #tpu.memory_space<vmem>>, vector<1x16xf32>
      %57 = vector.broadcast %56 : vector<1x16xf32> to vector<128x16xf32>
      %58 = arith.addf %55, %57 : vector<128x16xf32>
      %cst_60 = arith.constant 0.000000e+00 : f32
      %59 = vector.broadcast %cst_60 : f32 to vector<128x16xf32>
      %60 = arith.cmpf oge, %58, %59 : vector<128x16xf32>
      %cst_61 = arith.constant 0.00999999977 : f32
      %61 = vector.broadcast %cst_61 : f32 to vector<128x16xf32>
      %62 = arith.mulf %61, %58 : vector<128x16xf32>
      %63 = arith.select %60, %58, %62 : vector<128x16xi1>, vector<128x16xf32>
      %64 = arith.truncf %63 : vector<128x16xf32> to vector<128x16xbf16>
      %c0_62 = arith.constant 0 : index
      %c0_63 = arith.constant 0 : index
      %65 = vector.load %arg5[%c0_62, %c0_63] : memref<128x16xbf16, #tpu.memory_space<vmem>>, vector<128x16xbf16>
      tpu.vector_store %arg5[%c0_62, %c0_63], %64 {strides = array<i32>} : memref<128x16xbf16, #tpu.memory_space<vmem>>, vector<128x16xbf16>,
    } else {
    }
    return
  }
  func.func @transform_0(%arg0: i32, %arg1: i32) -> (i32, i32, i32, i32, i32) {
    %c0_i32 = arith.constant 0 : i32
    %c0_i32_0 = arith.constant 0 : i32
    %c0_i32_1 = arith.constant 0 : i32
    %c0_i32_2 = arith.constant 0 : i32
    %c0_i32_3 = arith.constant 0 : i32
    return %arg1, %c0_i32, %c0_i32_0, %c0_i32_1, %c0_i32_2 : i32, i32, i32, i32, i32
  }
  func.func @transform_1(%arg0: i32, %arg1: i32) -> (i32, i32, i32) {
    %c0_i32 = arith.constant 0 : i32
    %c0_i32_0 = arith.constant 0 : i32
    %c0_i32_1 = arith.constant 0 : i32
    %c0_i32_2 = arith.constant 0 : i32
    return %c0_i32, %c0_i32_0, %c0_i32_1 : i32, i32, i32
  }
  func.func @transform_2(%arg0: i32, %arg1: i32) -> (i32, i32) {
    %c0_i32 = arith.constant 0 : i32
    %c0_i32_0 = arith.constant 0 : i32
    %c0_i32_1 = arith.constant 0 : i32
    return %c0_i32, %c0_i32_0 : i32, i32
  }
  func.func @transform_3(%arg0: i32, %arg1: i32) -> (i32, i32) {
    %0 = arith.muli %arg0, %arg1 : i32
    %c0_i32 = arith.constant 0 : i32
    %c0_i32_0 = arith.constant 0 : i32
    return %0, %c0_i32 : i32, i32
  }
}

module attributes {stable_mosaic.version = 11 : i64} {
  func.func @kernel(%arg0: i32, %arg1: i32, %arg2: memref<2x5x2x5x32xbf16, #tpu.memory_space<vmem>>, %arg3: memref<6x32x32xbf16, #tpu.memory_space<vmem>>, %arg4: memref<2x32xf32, #tpu.memory_space<vmem>>, %arg5: memref<32x32xbf16, #tpu.memory_space<vmem>>, %arg6: memref<2x32xf32, #tpu.memory_space<vmem>>, %arg7: memref<2x32xf32, #tpu.memory_space<vmem>>) attributes {dimension_semantics = [#tpu.dimension_semantics<arbitrary>, #tpu.dimension_semantics<arbitrary>], iteration_bounds = array<i64: 2, 1>, scalar_prefetch = 0 : i64, scratch_operands = 2 : i64, tpu.core_type = #tpu.core_type<tc>, window_params = [{transform_indices = @transform_0, window_bounds = array<i64: 2, 5, 2, 5, 32>}, {pipeline_mode = #tpu.pipeline_mode<synchronous>, transform_indices = @transform_1, window_bounds = array<i64: 6, 32, 32>}, {pipeline_mode = #tpu.pipeline_mode<synchronous>, transform_indices = @transform_2, window_bounds = array<i64: 2, 32>}, {transform_indices = @transform_3, window_bounds = array<i64: 32, 32>}]} {
    %cst = arith.constant 0.000000e+00 : f32
    %0 = vector.broadcast %cst : f32 to vector<32x32xf32>
    %c0 = arith.constant 0 : index
    %c0_0 = arith.constant 0 : index
    %c0_1 = arith.constant 0 : index
    %c0_2 = arith.constant 0 : index
    %c0_3 = arith.constant 0 : index
    %1 = vector.load %arg2[%c0, %c0_0, %c0_1, %c0_2, %c0_3] : memref<2x5x2x5x32xbf16, #tpu.memory_space<vmem>>, vector<2x4x1x4x32xbf16>
    %2 = vector.shape_cast %1 : vector<2x4x1x4x32xbf16> to vector<32x32xbf16>
    %c0_4 = arith.constant 0 : index
    %c0_5 = arith.constant 0 : index
    %c0_6 = arith.constant 0 : index
    %3 = vector.load %arg3[%c0_4, %c0_5, %c0_6] : memref<6x32x32xbf16, #tpu.memory_space<vmem>>, vector<1x32x32xbf16>
    %4 = vector.shape_cast %3 : vector<1x32x32xbf16> to vector<32x32xbf16>
    %cst_7 = arith.constant dense<0.000000e+00> : vector<32x32xf32>
    %5 = tpu.matmul %2, %4, %cst_7 {dimension_numbers = #tpu.dot_dimension_numbers<[1], [0], [0], [1], [0, 0, 1, 1], [], []>} : vector<32x32xbf16>, vector<32x32xbf16>, vector<32x32xf32> -> vector<32x32xf32>
    %6 = arith.addf %0, %5 : vector<32x32xf32>
    %c0_8 = arith.constant 0 : index
    %c0_9 = arith.constant 0 : index
    %c0_10 = arith.constant 0 : index
    %c1 = arith.constant 1 : index
    %c0_11 = arith.constant 0 : index
    %7 = vector.load %arg2[%c0_8, %c0_9, %c0_10, %c1, %c0_11] : memref<2x5x2x5x32xbf16, #tpu.memory_space<vmem>>, vector<2x4x1x4x32xbf16>
    %8 = vector.shape_cast %7 : vector<2x4x1x4x32xbf16> to vector<32x32xbf16>
    %c1_12 = arith.constant 1 : index
    %c0_13 = arith.constant 0 : index
    %c0_14 = arith.constant 0 : index
    %9 = vector.load %arg3[%c1_12, %c0_13, %c0_14] : memref<6x32x32xbf16, #tpu.memory_space<vmem>>, vector<1x32x32xbf16>
    %10 = vector.shape_cast %9 : vector<1x32x32xbf16> to vector<32x32xbf16>
    %cst_15 = arith.constant dense<0.000000e+00> : vector<32x32xf32>
    %11 = tpu.matmul %8, %10, %cst_15 {dimension_numbers = #tpu.dot_dimension_numbers<[1], [0], [0], [1], [0, 0, 1, 1], [], []>} : vector<32x32xbf16>, vector<32x32xbf16>, vector<32x32xf32> -> vector<32x32xf32>
    %12 = arith.addf %6, %11 : vector<32x32xf32>
    %c0_16 = arith.constant 0 : index
    %c0_17 = arith.constant 0 : index
    %c1_18 = arith.constant 1 : index
    %c0_19 = arith.constant 0 : index
    %c0_20 = arith.constant 0 : index
    %13 = vector.load %arg2[%c0_16, %c0_17, %c1_18, %c0_19, %c0_20] : memref<2x5x2x5x32xbf16, #tpu.memory_space<vmem>>, vector<2x4x1x4x32xbf16>
    %14 = vector.shape_cast %13 : vector<2x4x1x4x32xbf16> to vector<32x32xbf16>
    %c2 = arith.constant 2 : index
    %c0_21 = arith.constant 0 : index
    %c0_22 = arith.constant 0 : index
    %15 = vector.load %arg3[%c2, %c0_21, %c0_22] : memref<6x32x32xbf16, #tpu.memory_space<vmem>>, vector<1x32x32xbf16>
    %16 = vector.shape_cast %15 : vector<1x32x32xbf16> to vector<32x32xbf16>
    %cst_23 = arith.constant dense<0.000000e+00> : vector<32x32xf32>
    %17 = tpu.matmul %14, %16, %cst_23 {dimension_numbers = #tpu.dot_dimension_numbers<[1], [0], [0], [1], [0, 0, 1, 1], [], []>} : vector<32x32xbf16>, vector<32x32xbf16>, vector<32x32xf32> -> vector<32x32xf32>
    %18 = arith.addf %12, %17 : vector<32x32xf32>
    %c0_24 = arith.constant 0 : index
    %c0_25 = arith.constant 0 : index
    %c1_26 = arith.constant 1 : index
    %c1_27 = arith.constant 1 : index
    %c0_28 = arith.constant 0 : index
    %19 = vector.load %arg2[%c0_24, %c0_25, %c1_26, %c1_27, %c0_28] : memref<2x5x2x5x32xbf16, #tpu.memory_space<vmem>>, vector<2x4x1x4x32xbf16>
    %20 = vector.shape_cast %19 : vector<2x4x1x4x32xbf16> to vector<32x32xbf16>
    %c3 = arith.constant 3 : index
    %c0_29 = arith.constant 0 : index
    %c0_30 = arith.constant 0 : index
    %21 = vector.load %arg3[%c3, %c0_29, %c0_30] : memref<6x32x32xbf16, #tpu.memory_space<vmem>>, vector<1x32x32xbf16>
    %22 = vector.shape_cast %21 : vector<1x32x32xbf16> to vector<32x32xbf16>
    %cst_31 = arith.constant dense<0.000000e+00> : vector<32x32xf32>
    %23 = tpu.matmul %20, %22, %cst_31 {dimension_numbers = #tpu.dot_dimension_numbers<[1], [0], [0], [1], [0, 0, 1, 1], [], []>} : vector<32x32xbf16>, vector<32x32xbf16>, vector<32x32xf32> -> vector<32x32xf32>
    %24 = arith.addf %18, %23 : vector<32x32xf32>
    %c0_32 = arith.constant 0 : index
    %c1_33 = arith.constant 1 : index
    %c0_34 = arith.constant 0 : index
    %c0_35 = arith.constant 0 : index
    %c0_36 = arith.constant 0 : index
    %25 = vector.load %arg2[%c0_32, %c1_33, %c0_34, %c0_35, %c0_36] : memref<2x5x2x5x32xbf16, #tpu.memory_space<vmem>>, vector<2x4x1x4x32xbf16>
    %26 = vector.shape_cast %25 : vector<2x4x1x4x32xbf16> to vector<32x32xbf16>
    %c4 = arith.constant 4 : index
    %c0_37 = arith.constant 0 : index
    %c0_38 = arith.constant 0 : index
    %27 = vector.load %arg3[%c4, %c0_37, %c0_38] : memref<6x32x32xbf16, #tpu.memory_space<vmem>>, vector<1x32x32xbf16>
    %28 = vector.shape_cast %27 : vector<1x32x32xbf16> to vector<32x32xbf16>
    %cst_39 = arith.constant dense<0.000000e+00> : vector<32x32xf32>
    %29 = tpu.matmul %26, %28, %cst_39 {dimension_numbers = #tpu.dot_dimension_numbers<[1], [0], [0], [1], [0, 0, 1, 1], [], []>} : vector<32x32xbf16>, vector<32x32xbf16>, vector<32x32xf32> -> vector<32x32xf32>
    %30 = arith.addf %24, %29 : vector<32x32xf32>
    %c0_40 = arith.constant 0 : index
    %c1_41 = arith.constant 1 : index
    %c0_42 = arith.constant 0 : index
    %c1_43 = arith.constant 1 : index
    %c0_44 = arith.constant 0 : index
    %31 = vector.load %arg2[%c0_40, %c1_41, %c0_42, %c1_43, %c0_44] : memref<2x5x2x5x32xbf16, #tpu.memory_space<vmem>>, vector<2x4x1x4x32xbf16>
    %32 = vector.shape_cast %31 : vector<2x4x1x4x32xbf16> to vector<32x32xbf16>
    %c5 = arith.constant 5 : index
    %c0_45 = arith.constant 0 : index
    %c0_46 = arith.constant 0 : index
    %33 = vector.load %arg3[%c5, %c0_45, %c0_46] : memref<6x32x32xbf16, #tpu.memory_space<vmem>>, vector<1x32x32xbf16>
    %34 = vector.shape_cast %33 : vector<1x32x32xbf16> to vector<32x32xbf16>
    %cst_47 = arith.constant dense<0.000000e+00> : vector<32x32xf32>
    %35 = tpu.matmul %32, %34, %cst_47 {dimension_numbers = #tpu.dot_dimension_numbers<[1], [0], [0], [1], [0, 0, 1, 1], [], []>} : vector<32x32xbf16>, vector<32x32xbf16>, vector<32x32xf32> -> vector<32x32xf32>
    %36 = arith.addf %30, %35 : vector<32x32xf32>
    %c0_i32 = arith.constant 0 : i32
    %37 = arith.cmpi eq, %arg0, %c0_i32 : i32
    %c0_i32_48 = arith.constant 0 : i32
    %38 = arith.cmpi eq, %arg1, %c0_i32_48 : i32
    %39 = arith.andi %37, %38 : i1
    %40 = arith.extui %39 : i1 to i32
    %c0_i32_49 = arith.constant 0 : i32
    %41 = arith.cmpi ne, %40, %c0_i32_49 : i32
    scf.if %41 {
      %cst_56 = arith.constant 0.000000e+00 : f32
      %53 = vector.broadcast %cst_56 : f32 to vector<2x32xf32>
      %c0_57 = arith.constant 0 : index
      %c0_58 = arith.constant 0 : index
      %54 = vector.load %arg6[%c0_57, %c0_58] : memref<2x32xf32, #tpu.memory_space<vmem>>, vector<2x32xf32>
      tpu.vector_store %arg6[%c0_57, %c0_58], %53 {strides = array<i32>} : memref<2x32xf32, #tpu.memory_space<vmem>>, vector<2x32xf32>,
    } else {
    }
    %c0_i32_50 = arith.constant 0 : i32
    %42 = arith.cmpi eq, %arg0, %c0_i32_50 : i32
    %43 = arith.extui %42 : i1 to i32
    %c0_i32_51 = arith.constant 0 : i32
    %44 = arith.cmpi ne, %43, %c0_i32_51 : i32
    scf.if %44 {
      %c0_56 = arith.constant 0 : index
      %c0_57 = arith.constant 0 : index
      %53 = vector.load %arg6[%c0_56, %c0_57] : memref<2x32xf32, #tpu.memory_space<vmem>>, vector<1x32xf32>
      %cst_58 = arith.constant dense<0.000000e+00> : vector<32xf32>
      %54 = vector.multi_reduction <add>, %36, %cst_58 [0] : vector<32x32xf32> to vector<32xf32>
      %55 = vector.shape_cast %54 : vector<32xf32> to vector<1x32xf32>
      %56 = arith.addf %53, %55 : vector<1x32xf32>
      %c0_59 = arith.constant 0 : index
      %c0_60 = arith.constant 0 : index
      %57 = vector.load %arg6[%c0_59, %c0_60] : memref<2x32xf32, #tpu.memory_space<vmem>>, vector<1x32xf32>
      tpu.vector_store %arg6[%c0_59, %c0_60], %56 {strides = array<i32>} : memref<2x32xf32, #tpu.memory_space<vmem>>, vector<1x32xf32>,
      %c1_61 = arith.constant 1 : index
      %c0_62 = arith.constant 0 : index
      %58 = vector.load %arg6[%c1_61, %c0_62] : memref<2x32xf32, #tpu.memory_space<vmem>>, vector<1x32xf32>
      %59 = arith.mulf %36, %36 : vector<32x32xf32>
      %cst_63 = arith.constant dense<0.000000e+00> : vector<32xf32>
      %60 = vector.multi_reduction <add>, %59, %cst_63 [0] : vector<32x32xf32> to vector<32xf32>
      %61 = vector.shape_cast %60 : vector<32xf32> to vector<1x32xf32>
      %62 = arith.addf %58, %61 : vector<1x32xf32>
      %c1_64 = arith.constant 1 : index
      %c0_65 = arith.constant 0 : index
      %63 = vector.load %arg6[%c1_64, %c0_65] : memref<2x32xf32, #tpu.memory_space<vmem>>, vector<1x32xf32>
      tpu.vector_store %arg6[%c1_64, %c0_65], %62 {strides = array<i32>} : memref<2x32xf32, #tpu.memory_space<vmem>>, vector<1x32xf32>,
    } else {
    }
    %c0_i32_52 = arith.constant 0 : i32
    %45 = arith.cmpi eq, %arg0, %c0_i32_52 : i32
    %c0_i32_53 = arith.constant 0 : i32
    %46 = arith.cmpi eq, %arg1, %c0_i32_53 : i32
    %47 = arith.andi %45, %46 : i1
    %48 = arith.extui %47 : i1 to i32
    %c0_i32_54 = arith.constant 0 : i32
    %49 = arith.cmpi ne, %48, %c0_i32_54 : i32
    scf.if %49 {
      %c0_56 = arith.constant 0 : index
      %c0_57 = arith.constant 0 : index
      %53 = vector.load %arg6[%c0_56, %c0_57] : memref<2x32xf32, #tpu.memory_space<vmem>>, vector<1x32xf32>
      %cst_58 = arith.constant 3.125000e-02 : f32
      %54 = vector.broadcast %cst_58 : f32 to vector<1x32xf32>
      %55 = arith.mulf %53, %54 : vector<1x32xf32>
      %c1_59 = arith.constant 1 : index
      %c0_60 = arith.constant 0 : index
      %56 = vector.load %arg6[%c1_59, %c0_60] : memref<2x32xf32, #tpu.memory_space<vmem>>, vector<1x32xf32>
      %cst_61 = arith.constant 3.125000e-02 : f32
      %57 = vector.broadcast %cst_61 : f32 to vector<1x32xf32>
      %58 = arith.mulf %56, %57 : vector<1x32xf32>
      %59 = arith.mulf %55, %55 : vector<1x32xf32>
      %60 = arith.subf %58, %59 : vector<1x32xf32>
      %cst_62 = arith.constant 0.000000e+00 : f32
      %61 = vector.broadcast %cst_62 : f32 to vector<1x32xf32>
      %62 = arith.maximumf %60, %61 : vector<1x32xf32>
      %c0_63 = arith.constant 0 : index
      %c0_64 = arith.constant 0 : index
      %63 = vector.load %arg4[%c0_63, %c0_64] : memref<2x32xf32, #tpu.memory_space<vmem>>, vector<1x32xf32>
      %cst_65 = arith.constant 9.99999974E-6 : f32
      %64 = vector.broadcast %cst_65 : f32 to vector<1x32xf32>
      %65 = arith.addf %62, %64 : vector<1x32xf32>
      %66 = math.rsqrt %65 : vector<1x32xf32>
      %67 = arith.mulf %63, %66 : vector<1x32xf32>
      %c0_66 = arith.constant 0 : index
      %c0_67 = arith.constant 0 : index
      %68 = vector.load %arg7[%c0_66, %c0_67] : memref<2x32xf32, #tpu.memory_space<vmem>>, vector<1x32xf32>
      tpu.vector_store %arg7[%c0_66, %c0_67], %67 {strides = array<i32>} : memref<2x32xf32, #tpu.memory_space<vmem>>, vector<1x32xf32>,
      %c1_68 = arith.constant 1 : index
      %c0_69 = arith.constant 0 : index
      %69 = vector.load %arg4[%c1_68, %c0_69] : memref<2x32xf32, #tpu.memory_space<vmem>>, vector<1x32xf32>
      %70 = arith.mulf %55, %67 : vector<1x32xf32>
      %71 = arith.subf %69, %70 : vector<1x32xf32>
      %c1_70 = arith.constant 1 : index
      %c0_71 = arith.constant 0 : index
      %72 = vector.load %arg7[%c1_70, %c0_71] : memref<2x32xf32, #tpu.memory_space<vmem>>, vector<1x32xf32>
      tpu.vector_store %arg7[%c1_70, %c0_71], %71 {strides = array<i32>} : memref<2x32xf32, #tpu.memory_space<vmem>>, vector<1x32xf32>,
    } else {
    }
    %c1_i32 = arith.constant 1 : i32
    %50 = arith.cmpi eq, %arg0, %c1_i32 : i32
    %51 = arith.extui %50 : i1 to i32
    %c0_i32_55 = arith.constant 0 : i32
    %52 = arith.cmpi ne, %51, %c0_i32_55 : i32
    scf.if %52 {
      %c0_56 = arith.constant 0 : index
      %c0_57 = arith.constant 0 : index
      %53 = vector.load %arg7[%c0_56, %c0_57] : memref<2x32xf32, #tpu.memory_space<vmem>>, vector<1x32xf32>
      %54 = vector.broadcast %53 : vector<1x32xf32> to vector<32x32xf32>
      %55 = arith.mulf %36, %54 : vector<32x32xf32>
      %c1_58 = arith.constant 1 : index
      %c0_59 = arith.constant 0 : index
      %56 = vector.load %arg7[%c1_58, %c0_59] : memref<2x32xf32, #tpu.memory_space<vmem>>, vector<1x32xf32>
      %57 = vector.broadcast %56 : vector<1x32xf32> to vector<32x32xf32>
      %58 = arith.addf %55, %57 : vector<32x32xf32>
      %cst_60 = arith.constant 0.000000e+00 : f32
      %59 = vector.broadcast %cst_60 : f32 to vector<32x32xf32>
      %60 = arith.cmpf oge, %58, %59 : vector<32x32xf32>
      %cst_61 = arith.constant 0.00999999977 : f32
      %61 = vector.broadcast %cst_61 : f32 to vector<32x32xf32>
      %62 = arith.mulf %61, %58 : vector<32x32xf32>
      %63 = arith.select %60, %58, %62 : vector<32x32xi1>, vector<32x32xf32>
      %64 = arith.truncf %63 : vector<32x32xf32> to vector<32x32xbf16>
      %c0_62 = arith.constant 0 : index
      %c0_63 = arith.constant 0 : index
      %65 = vector.load %arg5[%c0_62, %c0_63] : memref<32x32xbf16, #tpu.memory_space<vmem>>, vector<32x32xbf16>
      tpu.vector_store %arg5[%c0_62, %c0_63], %64 {strides = array<i32>} : memref<32x32xbf16, #tpu.memory_space<vmem>>, vector<32x32xbf16>,
    } else {
    }
    return
  }
  func.func @transform_0(%arg0: i32, %arg1: i32) -> (i32, i32, i32, i32, i32) {
    %c0_i32 = arith.constant 0 : i32
    %c0_i32_0 = arith.constant 0 : i32
    %c0_i32_1 = arith.constant 0 : i32
    %c0_i32_2 = arith.constant 0 : i32
    %c0_i32_3 = arith.constant 0 : i32
    return %arg1, %c0_i32, %c0_i32_0, %c0_i32_1, %c0_i32_2 : i32, i32, i32, i32, i32
  }
  func.func @transform_1(%arg0: i32, %arg1: i32) -> (i32, i32, i32) {
    %c0_i32 = arith.constant 0 : i32
    %c0_i32_0 = arith.constant 0 : i32
    %c0_i32_1 = arith.constant 0 : i32
    %c0_i32_2 = arith.constant 0 : i32
    return %c0_i32, %c0_i32_0, %c0_i32_1 : i32, i32, i32
  }
  func.func @transform_2(%arg0: i32, %arg1: i32) -> (i32, i32) {
    %c0_i32 = arith.constant 0 : i32
    %c0_i32_0 = arith.constant 0 : i32
    %c0_i32_1 = arith.constant 0 : i32
    return %c0_i32, %c0_i32_0 : i32, i32
  }
  func.func @transform_3(%arg0: i32, %arg1: i32) -> (i32, i32) {
    %0 = arith.muli %arg0, %arg1 : i32
    %c0_i32 = arith.constant 0 : i32
    %c0_i32_0 = arith.constant 0 : i32
    return %0, %c0_i32 : i32, i32
  }
}

module attributes {stable_mosaic.version = 11 : i64} {
  func.func @kernel(%arg0: i32, %arg1: i32, %arg2: memref<2x3x2x3x64xbf16, #tpu.memory_space<vmem>>, %arg3: memref<6x64x64xbf16, #tpu.memory_space<vmem>>, %arg4: memref<2x64xf32, #tpu.memory_space<vmem>>, %arg5: memref<8x64xbf16, #tpu.memory_space<vmem>>, %arg6: memref<2x64xf32, #tpu.memory_space<vmem>>, %arg7: memref<2x64xf32, #tpu.memory_space<vmem>>) attributes {dimension_semantics = [#tpu.dimension_semantics<arbitrary>, #tpu.dimension_semantics<arbitrary>], iteration_bounds = array<i64: 2, 1>, scalar_prefetch = 0 : i64, scratch_operands = 2 : i64, tpu.core_type = #tpu.core_type<tc>, window_params = [{transform_indices = @transform_0, window_bounds = array<i64: 2, 3, 2, 3, 64>}, {pipeline_mode = #tpu.pipeline_mode<synchronous>, transform_indices = @transform_1, window_bounds = array<i64: 6, 64, 64>}, {pipeline_mode = #tpu.pipeline_mode<synchronous>, transform_indices = @transform_2, window_bounds = array<i64: 2, 64>}, {transform_indices = @transform_3, window_bounds = array<i64: 8, 64>}]} {
    %cst = arith.constant 0.000000e+00 : f32
    %0 = vector.broadcast %cst : f32 to vector<8x64xf32>
    %c0 = arith.constant 0 : index
    %c0_0 = arith.constant 0 : index
    %c0_1 = arith.constant 0 : index
    %c0_2 = arith.constant 0 : index
    %c0_3 = arith.constant 0 : index
    %1 = vector.load %arg2[%c0, %c0_0, %c0_1, %c0_2, %c0_3] : memref<2x3x2x3x64xbf16, #tpu.memory_space<vmem>>, vector<2x2x1x2x64xbf16>
    %2 = vector.shape_cast %1 : vector<2x2x1x2x64xbf16> to vector<8x64xbf16>
    %c0_4 = arith.constant 0 : index
    %c0_5 = arith.constant 0 : index
    %c0_6 = arith.constant 0 : index
    %3 = vector.load %arg3[%c0_4, %c0_5, %c0_6] : memref<6x64x64xbf16, #tpu.memory_space<vmem>>, vector<1x64x64xbf16>
    %4 = vector.shape_cast %3 : vector<1x64x64xbf16> to vector<64x64xbf16>
    %cst_7 = arith.constant dense<0.000000e+00> : vector<8x64xf32>
    %5 = tpu.matmul %2, %4, %cst_7 {dimension_numbers = #tpu.dot_dimension_numbers<[1], [0], [0], [1], [0, 0, 1, 1], [], []>} : vector<8x64xbf16>, vector<64x64xbf16>, vector<8x64xf32> -> vector<8x64xf32>
    %6 = arith.addf %0, %5 : vector<8x64xf32>
    %c0_8 = arith.constant 0 : index
    %c0_9 = arith.constant 0 : index
    %c0_10 = arith.constant 0 : index
    %c1 = arith.constant 1 : index
    %c0_11 = arith.constant 0 : index
    %7 = vector.load %arg2[%c0_8, %c0_9, %c0_10, %c1, %c0_11] : memref<2x3x2x3x64xbf16, #tpu.memory_space<vmem>>, vector<2x2x1x2x64xbf16>
    %8 = vector.shape_cast %7 : vector<2x2x1x2x64xbf16> to vector<8x64xbf16>
    %c1_12 = arith.constant 1 : index
    %c0_13 = arith.constant 0 : index
    %c0_14 = arith.constant 0 : index
    %9 = vector.load %arg3[%c1_12, %c0_13, %c0_14] : memref<6x64x64xbf16, #tpu.memory_space<vmem>>, vector<1x64x64xbf16>
    %10 = vector.shape_cast %9 : vector<1x64x64xbf16> to vector<64x64xbf16>
    %cst_15 = arith.constant dense<0.000000e+00> : vector<8x64xf32>
    %11 = tpu.matmul %8, %10, %cst_15 {dimension_numbers = #tpu.dot_dimension_numbers<[1], [0], [0], [1], [0, 0, 1, 1], [], []>} : vector<8x64xbf16>, vector<64x64xbf16>, vector<8x64xf32> -> vector<8x64xf32>
    %12 = arith.addf %6, %11 : vector<8x64xf32>
    %c0_16 = arith.constant 0 : index
    %c0_17 = arith.constant 0 : index
    %c1_18 = arith.constant 1 : index
    %c0_19 = arith.constant 0 : index
    %c0_20 = arith.constant 0 : index
    %13 = vector.load %arg2[%c0_16, %c0_17, %c1_18, %c0_19, %c0_20] : memref<2x3x2x3x64xbf16, #tpu.memory_space<vmem>>, vector<2x2x1x2x64xbf16>
    %14 = vector.shape_cast %13 : vector<2x2x1x2x64xbf16> to vector<8x64xbf16>
    %c2 = arith.constant 2 : index
    %c0_21 = arith.constant 0 : index
    %c0_22 = arith.constant 0 : index
    %15 = vector.load %arg3[%c2, %c0_21, %c0_22] : memref<6x64x64xbf16, #tpu.memory_space<vmem>>, vector<1x64x64xbf16>
    %16 = vector.shape_cast %15 : vector<1x64x64xbf16> to vector<64x64xbf16>
    %cst_23 = arith.constant dense<0.000000e+00> : vector<8x64xf32>
    %17 = tpu.matmul %14, %16, %cst_23 {dimension_numbers = #tpu.dot_dimension_numbers<[1], [0], [0], [1], [0, 0, 1, 1], [], []>} : vector<8x64xbf16>, vector<64x64xbf16>, vector<8x64xf32> -> vector<8x64xf32>
    %18 = arith.addf %12, %17 : vector<8x64xf32>
    %c0_24 = arith.constant 0 : index
    %c0_25 = arith.constant 0 : index
    %c1_26 = arith.constant 1 : index
    %c1_27 = arith.constant 1 : index
    %c0_28 = arith.constant 0 : index
    %19 = vector.load %arg2[%c0_24, %c0_25, %c1_26, %c1_27, %c0_28] : memref<2x3x2x3x64xbf16, #tpu.memory_space<vmem>>, vector<2x2x1x2x64xbf16>
    %20 = vector.shape_cast %19 : vector<2x2x1x2x64xbf16> to vector<8x64xbf16>
    %c3 = arith.constant 3 : index
    %c0_29 = arith.constant 0 : index
    %c0_30 = arith.constant 0 : index
    %21 = vector.load %arg3[%c3, %c0_29, %c0_30] : memref<6x64x64xbf16, #tpu.memory_space<vmem>>, vector<1x64x64xbf16>
    %22 = vector.shape_cast %21 : vector<1x64x64xbf16> to vector<64x64xbf16>
    %cst_31 = arith.constant dense<0.000000e+00> : vector<8x64xf32>
    %23 = tpu.matmul %20, %22, %cst_31 {dimension_numbers = #tpu.dot_dimension_numbers<[1], [0], [0], [1], [0, 0, 1, 1], [], []>} : vector<8x64xbf16>, vector<64x64xbf16>, vector<8x64xf32> -> vector<8x64xf32>
    %24 = arith.addf %18, %23 : vector<8x64xf32>
    %c0_32 = arith.constant 0 : index
    %c1_33 = arith.constant 1 : index
    %c0_34 = arith.constant 0 : index
    %c0_35 = arith.constant 0 : index
    %c0_36 = arith.constant 0 : index
    %25 = vector.load %arg2[%c0_32, %c1_33, %c0_34, %c0_35, %c0_36] : memref<2x3x2x3x64xbf16, #tpu.memory_space<vmem>>, vector<2x2x1x2x64xbf16>
    %26 = vector.shape_cast %25 : vector<2x2x1x2x64xbf16> to vector<8x64xbf16>
    %c4 = arith.constant 4 : index
    %c0_37 = arith.constant 0 : index
    %c0_38 = arith.constant 0 : index
    %27 = vector.load %arg3[%c4, %c0_37, %c0_38] : memref<6x64x64xbf16, #tpu.memory_space<vmem>>, vector<1x64x64xbf16>
    %28 = vector.shape_cast %27 : vector<1x64x64xbf16> to vector<64x64xbf16>
    %cst_39 = arith.constant dense<0.000000e+00> : vector<8x64xf32>
    %29 = tpu.matmul %26, %28, %cst_39 {dimension_numbers = #tpu.dot_dimension_numbers<[1], [0], [0], [1], [0, 0, 1, 1], [], []>} : vector<8x64xbf16>, vector<64x64xbf16>, vector<8x64xf32> -> vector<8x64xf32>
    %30 = arith.addf %24, %29 : vector<8x64xf32>
    %c0_40 = arith.constant 0 : index
    %c1_41 = arith.constant 1 : index
    %c0_42 = arith.constant 0 : index
    %c1_43 = arith.constant 1 : index
    %c0_44 = arith.constant 0 : index
    %31 = vector.load %arg2[%c0_40, %c1_41, %c0_42, %c1_43, %c0_44] : memref<2x3x2x3x64xbf16, #tpu.memory_space<vmem>>, vector<2x2x1x2x64xbf16>
    %32 = vector.shape_cast %31 : vector<2x2x1x2x64xbf16> to vector<8x64xbf16>
    %c5 = arith.constant 5 : index
    %c0_45 = arith.constant 0 : index
    %c0_46 = arith.constant 0 : index
    %33 = vector.load %arg3[%c5, %c0_45, %c0_46] : memref<6x64x64xbf16, #tpu.memory_space<vmem>>, vector<1x64x64xbf16>
    %34 = vector.shape_cast %33 : vector<1x64x64xbf16> to vector<64x64xbf16>
    %cst_47 = arith.constant dense<0.000000e+00> : vector<8x64xf32>
    %35 = tpu.matmul %32, %34, %cst_47 {dimension_numbers = #tpu.dot_dimension_numbers<[1], [0], [0], [1], [0, 0, 1, 1], [], []>} : vector<8x64xbf16>, vector<64x64xbf16>, vector<8x64xf32> -> vector<8x64xf32>
    %36 = arith.addf %30, %35 : vector<8x64xf32>
    %c0_i32 = arith.constant 0 : i32
    %37 = arith.cmpi eq, %arg0, %c0_i32 : i32
    %c0_i32_48 = arith.constant 0 : i32
    %38 = arith.cmpi eq, %arg1, %c0_i32_48 : i32
    %39 = arith.andi %37, %38 : i1
    %40 = arith.extui %39 : i1 to i32
    %c0_i32_49 = arith.constant 0 : i32
    %41 = arith.cmpi ne, %40, %c0_i32_49 : i32
    scf.if %41 {
      %cst_56 = arith.constant 0.000000e+00 : f32
      %53 = vector.broadcast %cst_56 : f32 to vector<2x64xf32>
      %c0_57 = arith.constant 0 : index
      %c0_58 = arith.constant 0 : index
      %54 = vector.load %arg6[%c0_57, %c0_58] : memref<2x64xf32, #tpu.memory_space<vmem>>, vector<2x64xf32>
      tpu.vector_store %arg6[%c0_57, %c0_58], %53 {strides = array<i32>} : memref<2x64xf32, #tpu.memory_space<vmem>>, vector<2x64xf32>,
    } else {
    }
    %c0_i32_50 = arith.constant 0 : i32
    %42 = arith.cmpi eq, %arg0, %c0_i32_50 : i32
    %43 = arith.extui %42 : i1 to i32
    %c0_i32_51 = arith.constant 0 : i32
    %44 = arith.cmpi ne, %43, %c0_i32_51 : i32
    scf.if %44 {
      %c0_56 = arith.constant 0 : index
      %c0_57 = arith.constant 0 : index
      %53 = vector.load %arg6[%c0_56, %c0_57] : memref<2x64xf32, #tpu.memory_space<vmem>>, vector<1x64xf32>
      %cst_58 = arith.constant dense<0.000000e+00> : vector<64xf32>
      %54 = vector.multi_reduction <add>, %36, %cst_58 [0] : vector<8x64xf32> to vector<64xf32>
      %55 = vector.shape_cast %54 : vector<64xf32> to vector<1x64xf32>
      %56 = arith.addf %53, %55 : vector<1x64xf32>
      %c0_59 = arith.constant 0 : index
      %c0_60 = arith.constant 0 : index
      %57 = vector.load %arg6[%c0_59, %c0_60] : memref<2x64xf32, #tpu.memory_space<vmem>>, vector<1x64xf32>
      tpu.vector_store %arg6[%c0_59, %c0_60], %56 {strides = array<i32>} : memref<2x64xf32, #tpu.memory_space<vmem>>, vector<1x64xf32>,
      %c1_61 = arith.constant 1 : index
      %c0_62 = arith.constant 0 : index
      %58 = vector.load %arg6[%c1_61, %c0_62] : memref<2x64xf32, #tpu.memory_space<vmem>>, vector<1x64xf32>
      %59 = arith.mulf %36, %36 : vector<8x64xf32>
      %cst_63 = arith.constant dense<0.000000e+00> : vector<64xf32>
      %60 = vector.multi_reduction <add>, %59, %cst_63 [0] : vector<8x64xf32> to vector<64xf32>
      %61 = vector.shape_cast %60 : vector<64xf32> to vector<1x64xf32>
      %62 = arith.addf %58, %61 : vector<1x64xf32>
      %c1_64 = arith.constant 1 : index
      %c0_65 = arith.constant 0 : index
      %63 = vector.load %arg6[%c1_64, %c0_65] : memref<2x64xf32, #tpu.memory_space<vmem>>, vector<1x64xf32>
      tpu.vector_store %arg6[%c1_64, %c0_65], %62 {strides = array<i32>} : memref<2x64xf32, #tpu.memory_space<vmem>>, vector<1x64xf32>,
    } else {
    }
    %c0_i32_52 = arith.constant 0 : i32
    %45 = arith.cmpi eq, %arg0, %c0_i32_52 : i32
    %c0_i32_53 = arith.constant 0 : i32
    %46 = arith.cmpi eq, %arg1, %c0_i32_53 : i32
    %47 = arith.andi %45, %46 : i1
    %48 = arith.extui %47 : i1 to i32
    %c0_i32_54 = arith.constant 0 : i32
    %49 = arith.cmpi ne, %48, %c0_i32_54 : i32
    scf.if %49 {
      %c0_56 = arith.constant 0 : index
      %c0_57 = arith.constant 0 : index
      %53 = vector.load %arg6[%c0_56, %c0_57] : memref<2x64xf32, #tpu.memory_space<vmem>>, vector<1x64xf32>
      %cst_58 = arith.constant 1.250000e-01 : f32
      %54 = vector.broadcast %cst_58 : f32 to vector<1x64xf32>
      %55 = arith.mulf %53, %54 : vector<1x64xf32>
      %c1_59 = arith.constant 1 : index
      %c0_60 = arith.constant 0 : index
      %56 = vector.load %arg6[%c1_59, %c0_60] : memref<2x64xf32, #tpu.memory_space<vmem>>, vector<1x64xf32>
      %cst_61 = arith.constant 1.250000e-01 : f32
      %57 = vector.broadcast %cst_61 : f32 to vector<1x64xf32>
      %58 = arith.mulf %56, %57 : vector<1x64xf32>
      %59 = arith.mulf %55, %55 : vector<1x64xf32>
      %60 = arith.subf %58, %59 : vector<1x64xf32>
      %cst_62 = arith.constant 0.000000e+00 : f32
      %61 = vector.broadcast %cst_62 : f32 to vector<1x64xf32>
      %62 = arith.maximumf %60, %61 : vector<1x64xf32>
      %c0_63 = arith.constant 0 : index
      %c0_64 = arith.constant 0 : index
      %63 = vector.load %arg4[%c0_63, %c0_64] : memref<2x64xf32, #tpu.memory_space<vmem>>, vector<1x64xf32>
      %cst_65 = arith.constant 9.99999974E-6 : f32
      %64 = vector.broadcast %cst_65 : f32 to vector<1x64xf32>
      %65 = arith.addf %62, %64 : vector<1x64xf32>
      %66 = math.rsqrt %65 : vector<1x64xf32>
      %67 = arith.mulf %63, %66 : vector<1x64xf32>
      %c0_66 = arith.constant 0 : index
      %c0_67 = arith.constant 0 : index
      %68 = vector.load %arg7[%c0_66, %c0_67] : memref<2x64xf32, #tpu.memory_space<vmem>>, vector<1x64xf32>
      tpu.vector_store %arg7[%c0_66, %c0_67], %67 {strides = array<i32>} : memref<2x64xf32, #tpu.memory_space<vmem>>, vector<1x64xf32>,
      %c1_68 = arith.constant 1 : index
      %c0_69 = arith.constant 0 : index
      %69 = vector.load %arg4[%c1_68, %c0_69] : memref<2x64xf32, #tpu.memory_space<vmem>>, vector<1x64xf32>
      %70 = arith.mulf %55, %67 : vector<1x64xf32>
      %71 = arith.subf %69, %70 : vector<1x64xf32>
      %c1_70 = arith.constant 1 : index
      %c0_71 = arith.constant 0 : index
      %72 = vector.load %arg7[%c1_70, %c0_71] : memref<2x64xf32, #tpu.memory_space<vmem>>, vector<1x64xf32>
      tpu.vector_store %arg7[%c1_70, %c0_71], %71 {strides = array<i32>} : memref<2x64xf32, #tpu.memory_space<vmem>>, vector<1x64xf32>,
    } else {
    }
    %c1_i32 = arith.constant 1 : i32
    %50 = arith.cmpi eq, %arg0, %c1_i32 : i32
    %51 = arith.extui %50 : i1 to i32
    %c0_i32_55 = arith.constant 0 : i32
    %52 = arith.cmpi ne, %51, %c0_i32_55 : i32
    scf.if %52 {
      %c0_56 = arith.constant 0 : index
      %c0_57 = arith.constant 0 : index
      %53 = vector.load %arg7[%c0_56, %c0_57] : memref<2x64xf32, #tpu.memory_space<vmem>>, vector<1x64xf32>
      %54 = vector.broadcast %53 : vector<1x64xf32> to vector<8x64xf32>
      %55 = arith.mulf %36, %54 : vector<8x64xf32>
      %c1_58 = arith.constant 1 : index
      %c0_59 = arith.constant 0 : index
      %56 = vector.load %arg7[%c1_58, %c0_59] : memref<2x64xf32, #tpu.memory_space<vmem>>, vector<1x64xf32>
      %57 = vector.broadcast %56 : vector<1x64xf32> to vector<8x64xf32>
      %58 = arith.addf %55, %57 : vector<8x64xf32>
      %cst_60 = arith.constant 0.000000e+00 : f32
      %59 = vector.broadcast %cst_60 : f32 to vector<8x64xf32>
      %60 = arith.cmpf oge, %58, %59 : vector<8x64xf32>
      %cst_61 = arith.constant 0.00999999977 : f32
      %61 = vector.broadcast %cst_61 : f32 to vector<8x64xf32>
      %62 = arith.mulf %61, %58 : vector<8x64xf32>
      %63 = arith.select %60, %58, %62 : vector<8x64xi1>, vector<8x64xf32>
      %64 = arith.truncf %63 : vector<8x64xf32> to vector<8x64xbf16>
      %c0_62 = arith.constant 0 : index
      %c0_63 = arith.constant 0 : index
      %65 = vector.load %arg5[%c0_62, %c0_63] : memref<8x64xbf16, #tpu.memory_space<vmem>>, vector<8x64xbf16>
      tpu.vector_store %arg5[%c0_62, %c0_63], %64 {strides = array<i32>} : memref<8x64xbf16, #tpu.memory_space<vmem>>, vector<8x64xbf16>,
    } else {
    }
    return
  }
  func.func @transform_0(%arg0: i32, %arg1: i32) -> (i32, i32, i32, i32, i32) {
    %c0_i32 = arith.constant 0 : i32
    %c0_i32_0 = arith.constant 0 : i32
    %c0_i32_1 = arith.constant 0 : i32
    %c0_i32_2 = arith.constant 0 : i32
    %c0_i32_3 = arith.constant 0 : i32
    return %arg1, %c0_i32, %c0_i32_0, %c0_i32_1, %c0_i32_2 : i32, i32, i32, i32, i32
  }
  func.func @transform_1(%arg0: i32, %arg1: i32) -> (i32, i32, i32) {
    %c0_i32 = arith.constant 0 : i32
    %c0_i32_0 = arith.constant 0 : i32
    %c0_i32_1 = arith.constant 0 : i32
    %c0_i32_2 = arith.constant 0 : i32
    return %c0_i32, %c0_i32_0, %c0_i32_1 : i32, i32, i32
  }
  func.func @transform_2(%arg0: i32, %arg1: i32) -> (i32, i32) {
    %c0_i32 = arith.constant 0 : i32
    %c0_i32_0 = arith.constant 0 : i32
    %c0_i32_1 = arith.constant 0 : i32
    return %c0_i32, %c0_i32_0 : i32, i32
  }
  func.func @transform_3(%arg0: i32, %arg1: i32) -> (i32, i32) {
    %0 = arith.muli %arg0, %arg1 : i32
    %c0_i32 = arith.constant 0 : i32
    %c0_i32_0 = arith.constant 0 : i32
    return %0, %c0_i32 : i32, i32
  }
}

module attributes {stable_mosaic.version = 11 : i64} {
  func.func @_fc_heads_kernel(%arg0: i32, %arg1: memref<2x256xbf16, #tpu.memory_space<vmem>>, %arg2: memref<256x16xbf16, #tpu.memory_space<vmem>>, %arg3: memref<1x16xf32, #tpu.memory_space<vmem>>, %arg4: memref<2x16xf32, #tpu.memory_space<vmem>>) attributes {dimension_semantics = [#tpu.dimension_semantics<parallel>], iteration_bounds = array<i64: 1>, scalar_prefetch = 0 : i64, scratch_operands = 0 : i64, tpu.core_type = #tpu.core_type<tc>, window_params = [{transform_indices = @transform_0, window_bounds = array<i64: 2, 256>}, {pipeline_mode = #tpu.pipeline_mode<synchronous>, transform_indices = @transform_1, window_bounds = array<i64: 256, 16>}, {pipeline_mode = #tpu.pipeline_mode<synchronous>, transform_indices = @transform_2, window_bounds = array<i64: 1, 16>}, {transform_indices = @transform_3, window_bounds = array<i64: 2, 16>}]} {
    %c0 = arith.constant 0 : index
    %c0_0 = arith.constant 0 : index
    %0 = vector.load %arg1[%c0, %c0_0] : memref<2x256xbf16, #tpu.memory_space<vmem>>, vector<2x256xbf16>
    %c0_1 = arith.constant 0 : index
    %c0_2 = arith.constant 0 : index
    %1 = vector.load %arg2[%c0_1, %c0_2] : memref<256x16xbf16, #tpu.memory_space<vmem>>, vector<256x16xbf16>
    %cst = arith.constant dense<0.000000e+00> : vector<2x16xf32>
    %2 = tpu.matmul %0, %1, %cst {dimension_numbers = #tpu.dot_dimension_numbers<[1], [0], [0], [1], [0, 0, 1, 1], [], []>} : vector<2x256xbf16>, vector<256x16xbf16>, vector<2x16xf32> -> vector<2x16xf32>
    %c0_3 = arith.constant 0 : index
    %c0_4 = arith.constant 0 : index
    %3 = vector.load %arg3[%c0_3, %c0_4] : memref<1x16xf32, #tpu.memory_space<vmem>>, vector<1x16xf32>
    %4 = vector.broadcast %3 : vector<1x16xf32> to vector<2x16xf32>
    %5 = arith.addf %2, %4 : vector<2x16xf32>
    %c0_5 = arith.constant 0 : index
    %c0_6 = arith.constant 0 : index
    %6 = vector.load %arg4[%c0_5, %c0_6] : memref<2x16xf32, #tpu.memory_space<vmem>>, vector<2x16xf32>
    tpu.vector_store %arg4[%c0_5, %c0_6], %5 {strides = array<i32>} : memref<2x16xf32, #tpu.memory_space<vmem>>, vector<2x16xf32>,
    return
  }
  func.func @transform_0(%arg0: i32) -> (i32, i32) {
    %c0_i32 = arith.constant 0 : i32
    %c0_i32_0 = arith.constant 0 : i32
    return %arg0, %c0_i32 : i32, i32
  }
  func.func @transform_1(%arg0: i32) -> (i32, i32) {
    %c0_i32 = arith.constant 0 : i32
    %c0_i32_0 = arith.constant 0 : i32
    %c0_i32_1 = arith.constant 0 : i32
    return %c0_i32, %c0_i32_0 : i32, i32
  }
  func.func @transform_2(%arg0: i32) -> (i32, i32) {
    %c0_i32 = arith.constant 0 : i32
    %c0_i32_0 = arith.constant 0 : i32
    %c0_i32_1 = arith.constant 0 : i32
    return %c0_i32, %c0_i32_0 : i32, i32
  }
  func.func @transform_3(%arg0: i32) -> (i32, i32) {
    %c0_i32 = arith.constant 0 : i32
    %c0_i32_0 = arith.constant 0 : i32
    return %arg0, %c0_i32 : i32, i32
  }
}

</mosaic_0001>

<bundles_post_ra>
// kernel: encoder_forward.7
= control target key start
LH: loop header
LB: loop body
LE: loop exit
PB: predicated region body
PF: predicated region fallthrough
CT: control target
= control target key end

     0   :  { %vm179_vm0 = vcmask 123904   ;;  %s343_s1 = inlined_call_operand.vmem [shape: bf16[256,16], index: 1, kind: input, shape index: {}]   ;;  %s344_s0 = inlined_call_operand.vmem [shape: bf16[2,256], index: 0, kind: input, shape index: {}]   ;;  %s345_s2 = inlined_call_operand.vmem [shape: f32[1,16], index: 2, kind: input, shape index: {}]   ;;  %s346_s3 = inlined_call_operand.vmem [shape: f32[2,16], index: 3, kind: output, shape index: {}]  }
   0x1   :  { %v256_v0 = vld [vmem:[%s343_s1 + $0x38] sm:$0xff]  ;;  %v255_v2 = vld [vmem:[%s343_s1 + $0x30] sm:$0xff]  ;;  %v14_v4 = vld [vmem:[%s344_s0] sm:$0x3] }
   0x2   :  { %v264_v1 = vld [vmem:[%s343_s1 + $0x78] sm:$0xff]  ;;  %153 = vmatpush.bf16.msra.mxu0 %v256_v0  ;;  %v263_v3 = vld [vmem:[%s343_s1 + $0x70] sm:$0xff]  ;;  %v254_v5 = vld [vmem:[%s343_s1 + $0x28] sm:$0xff]  ;;  %52 = vst [vmem:[#allocation1] ss:$9 sm:$0xff] %v14_v4 }
   0x3   :  { %166 = vmatpush.bf16.msra.mxu1 %v264_v1  ;;  %v262_v6 = vld [vmem:[%s343_s1 + $0x68] sm:$0xff]  ;;  %v253_v7 = vld [vmem:[%s343_s1 + $0x20] sm:$0xff]  ;;  %v252_v9 = vld [vmem:[%s343_s1 + $0x18] sm:$0xff] }
   0x4   :  { %v261_v8 = vld [vmem:[%s343_s1 + $0x60] sm:$0xff]  ;;  %v260_v10 = vld [vmem:[%s343_s1 + $0x58] sm:$0xff]  ;;  %v251_v11 = vld [vmem:[%s343_s1 + $0x10] sm:$0xff] }
   0x5   :  { %v259_v12 = vld [vmem:[%s343_s1 + $0x50] sm:$0xff]  ;;  %v250_v13 = vld [vmem:[%s343_s1 + $0x8] sm:$0xff]  ;;  %v249_v15 = vld [vmem:[%s343_s1] sm:$0xff] }
   0x6   :  { %154 = vmatpush.bf16.msra.mxu0 %v255_v2  ;;  %v258_v14 = vld [vmem:[%s343_s1 + $0x48] sm:$0xff]  ;;  %v257_v16 = vld [vmem:[%s343_s1 + $0x40] sm:$0xff] }
   0x7   :  { %167 = vmatpush.bf16.msra.mxu1 %v263_v3  ;;  %v265_v19 = vld [vmem:[%s345_s2] ss:$0 sm:$0xff] }
   0x9   :  { %v53_v17 = vld [vmem:[#allocation1] sm:$0xff]  ;;  %v54_v18 = vld [vmem:[#allocation1 + $0x9] sm:$0xff] }
   0xa   :  { %155 = vmatpush.bf16.msra.mxu0 %v254_v5 }
   0xb   :  { %168 = vmatpush.bf16.msra.mxu1 %v262_v6 }
   0xe   :  { %156 = vmatpush.bf16.msra.mxu0 %v253_v7 }
   0xf   :  { %169 = vmatpush.bf16.msra.mxu1 %v261_v8 }
  0x12   :  { %157 = vmatpush.bf16.msra.mxu0 %v252_v9 }
  0x13   :  { %170 = vmatpush.bf16.msra.mxu1 %v260_v10 }
  0x16   :  { %158 = vmatpush.bf16.msra.mxu0 %v251_v11 }
  0x17   :  { %171 = vmatpush.bf16.msra.mxu1 %v259_v12 }
  0x1a   :  { %159 = vmatpush.bf16.msra.mxu0 %v250_v13 }
  0x1b   :  { %172 = vmatpush.bf16.msra.mxu1 %v258_v14 }
  0x1e   :  { %160 = vmatpush.bf16.msra.mxu0 %v249_v15 }
  0x1f   :  { %173 = vmatpush.bf16.msra.mxu1 %v257_v16 }
  0x21   :  { %161 = vmatmul.bf16.vlgmr.msra.gmra.mxu0 %v53_v17 }
  0x22   :  { %174 = vmatmul.bf16.vlgmr.msra.gmra.mxu1 %v54_v18 }
  0x9e   :  { %v162_v20 = vpop.f32.mrf.mxu0 }
  0x9f   :  { %v175_v21 = vpop.f32.mrf.mxu1  ;;  %v163_v22 = vadd.f32 %v265_v19, %v162_v20 }
  0xa1   :  { %v176_v23 = vadd.f32 %v175_v21, %v163_v22 }
  0xa3   :  { %180 = vst.msk [vmem:[%s346_s3] sm:$0x3] %vm179_vm0, %v176_v23 }
  0xa6   :  { %v164_v24 = vpop.f32.mrf.mxu0 }
  0xa7   :  { %v177_v25 = vpop.f32.mrf.mxu1 }

// kernel: encoder_forward.6
= control target key start
LH: loop header
LB: loop body
LE: loop exit
PB: predicated region body
PF: predicated region fallthrough
CT: control target
= control target key end

     0   :  { %s1317_s12 = smov 0   ;;  %s1319_s13 = smov 0   ;;  %s1629_s0 = inlined_call_operand.vmem [shape: bf16[2,3,2,3,64], index: 0, kind: input, shape index: {}]   ;;  %s1630_s1 = inlined_call_operand.vmem [shape: bf16[6,64,64], index: 1, kind: input, shape index: {}]   ;;  %s1631_s2 = inlined_call_operand.vmem [shape: f32[2,64], index: 2, kind: input, shape index: {}]   ;;  %s1632_s3 = inlined_call_operand.vmem [shape: bf16[8,64], index: 3, kind: output, shape index: {}]  }
   0x1   :  { %s1321_s14 = smov 0  }
   0x2 LB: > { %s25_s15 = sadd.s32 1, %s1290_s13  ;;  %p1040_p0 = scmp.ge.s32.totalorder %s1294_s14, 1  ;;  %s1294_s14 = sphi %s1321_s14, %s13_s14   ;;  %s1290_s13 = sphi %s1319_s13, %s1647_s13   ;;  %s1286_s12 = sphi %s1317_s12, %s1646_s12  }
   0x3   : > { %p27_p1 = scmp.ge.s32.totalorder %s25_s15, 2  ;;  %p153_p2 = scmp.lt.s32.totalorder %s1294_s14, 3 }
   0x5   : > { %s1649_s15 = smov (%p27_p1, %s25_s15), 0  ;;  %p154_p3 = pnand %p1040_p0, %p153_p2 }
   0x6   : > { %p891_p4 = scmp.eq.s32.totalorder (!%p154_p3), %s1286_s12, 0 }
   0x7   : > { %157 = sbr.rel (%p154_p3) target bundleno = 315 (0x13b), region = 32 }
   0xc   : > { %v1225_v0 = vld [vmem:[%s1630_s1 + $0x38] sm:$0xff]  ;;  %v1224_v2 = vld [vmem:[%s1630_s1 + $0x30] sm:$0xff]  ;;  %vm224_vm0 = vcmask 1040384   ;;  %vm228_vm1 = vcmask 1042434   ;;  %vm1633_vm2 = vcmask 1041408   ;;  %vm234_vm3 = vcmask 1041409  }
   0xd   : > { %v1221_v1 = vld [vmem:[%s1630_s1 + $0x18] sm:$0xff]  ;;  %377 = vmatpush.bf16.msra.mxu0 %v1225_v0  ;;  %v1220_v4 = vld [vmem:[%s1630_s1 + $0x10] sm:$0xff]  ;;  %vm236_vm4 = vcmask 1043459   ;;  %vm278_vm5 = vsmask.f32 256  ;;  %vm238_vm7 = vcmask 1042433  }
   0xe   : > { %v1229_v3 = vld [vmem:[%s1630_s1 + $0x58] sm:$0xff]  ;;  %428 = vmatpush.bf16.msra.mxu1 %v1221_v1  ;;  %v1228_v6 = vld [vmem:[%s1630_s1 + $0x50] sm:$0xff]  ;;  %vm279_vm6 = vsmask.f32 1284  ;;  %v204_v8 = vld [vmem:[%s1629_s0] sm:$0x3] }
   0xf   : > { %v1233_v5 = vld [vmem:[%s1630_s1 + $0x78] sm:$0xff]  ;;  %493 = vmatpush.bf16.msra.mxu2 %v1229_v3  ;;  %v1232_v7 = vld [vmem:[%s1630_s1 + $0x70] sm:$0xff]  ;;  %v205_v9 = vld [vmem:[%s1629_s0 + $0x4] sm:$0x3]  ;;  %v212_v12 = vrot.slane %v204_v8, 1  ;;  %v213_v13 = vrot.slane %v204_v8, 2 }
  0x10   : > { %654 = vmatpush.bf16.msra.mxu3 %v1233_v5  ;;  %v206_v10 = vld [vmem:[%s1629_s0 + $0xc] sm:$0x3]  ;;  %v207_v11 = vld [vmem:[%s1629_s0 + $0x10] sm:$0x3]  ;;  %v214_v16 = vrot.slane %v204_v8, 3  ;;  %v215_v17 = vrot.slane %v205_v9, 1  ;;  %vm1399_vm8 = vmor %vm278_vm5, %vm279_vm6 }
  0x11   : > { %378 = vmatpush.bf16.msra.mxu0 %v1224_v2  ;;  %v1223_v14 = vld [vmem:[%s1630_s1 + $0x28] sm:$0xff]  ;;  %v216_v18 = vrot.slane %v205_v9, 2  ;;  %v217_v19 = vrot.slane %v205_v9, 3  ;;  %v218_v21 = vrot.slane %v206_v10, 1  ;;  %v219_v22 = vrot.slane %v206_v10, 2  ;;  %v1222_v33 = vld [vmem:[%s1630_s1 + $0x20] sm:$0xff] }
  0x12   : > { %429 = vmatpush.bf16.msra.mxu1 %v1220_v4  ;;  %v1219_v15 = vld [vmem:[%s1630_s1 + $0x8] sm:$0xff]  ;;  %v220_v23 = vrot.slane %v206_v10, 3  ;;  %v221_v24 = vrot.slane %v207_v11, 1  ;;  %v222_v25 = vrot.slane %v207_v11, 2  ;;  %v223_v26 = vrot.slane %v207_v11, 3  ;;  %v1218_v34 = vld [vmem:[%s1630_s1] sm:$0xff] }
  0x13   : > { %494 = vmatpush.bf16.msra.mxu2 %v1228_v6  ;;  %v1227_v20 = vld [vmem:[%s1630_s1 + $0x48] sm:$0xff]  ;;  %v227_v27 = vsel %vm224_vm0, %v204_v8, %v212_v12  ;;  %v231_v28 = vsel %vm228_vm1, %v213_v13, %v214_v16  ;;  %v235_v30 = vsel %vm234_vm3, %v204_v8, %v212_v12  ;;  %v237_v31 = vsel %vm236_vm4, %v213_v13, %v214_v16  ;;  %v1226_v47 = vld [vmem:[%s1630_s1 + $0x40] sm:$0xff]  ;;  %v1237_v49 = vld [vmem:[%s1630_s1 + $0x98] sm:$0xff] }
  0x14   : > { %655 = vmatpush.bf16.msra.mxu3 %v1232_v7  ;;  %v233_v29 = vsel %vm1633_vm2, %v227_v27, %v231_v28  ;;  %v244_v32 = vsel %vm224_vm0, %v205_v9, %v215_v17  ;;  %v239_v35 = vsel %vm238_vm7, %v235_v30, %v237_v31  ;;  %v247_v36 = vsel %vm228_vm1, %v216_v18, %v217_v19  ;;  %v1231_v48 = vld [vmem:[%s1630_s1 + $0x68] sm:$0xff]  ;;  %v192_v12 = vld [vmem:[%s1629_s0] sm:$0x1]  ;;  %v193_v13 = vld [vmem:[%s1629_s0 + $0x4] sm:$0x1] }
  0x15   : > { %379 = vmatpush.bf16.msra.mxu0 %v1223_v14  ;;  %v249_v37 = vsel %vm234_vm3, %v205_v9, %v215_v17  ;;  %vm281_vm9 = vsmask.f32 2312  ;;  %v241_v39 = vrot.slane %v239_v35, 1  ;;  %v248_v40 = vsel %vm1633_vm2, %v244_v32, %v247_v36  ;;  %v194_v14 = vld [vmem:[%s1629_s0 + $0xc] sm:$0x1]  ;;  %v1234_v30 = vld [vmem:[%s1630_s1 + $0x80] sm:$0xff] }
  0x16   : > { %430 = vmatpush.bf16.msra.mxu1 %v1219_v15  ;;  %v250_v41 = vsel %vm236_vm4, %v216_v18, %v217_v19  ;;  %v256_v42 = vsel %vm224_vm0, %v206_v10, %v218_v21  ;;  %v259_v44 = vsel %vm228_vm1, %v219_v22, %v220_v23  ;;  %v261_v45 = vsel %vm234_vm3, %v206_v10, %v218_v21  ;;  %vm282_vm10 = vmor %vm1399_vm8, %vm281_vm9  ;;  %v1230_v10 = vld [vmem:[%s1630_s1 + $0x60] sm:$0xff]  ;;  %v195_v18 = vld [vmem:[%s1629_s0 + $0x10] sm:$0x1] }
  0x17   : > { %495 = vmatpush.bf16.msra.mxu2 %v1227_v20  ;;  %v251_v43 = vsel %vm238_vm7, %v249_v37, %v250_v41  ;;  %v262_v46 = vsel %vm236_vm4, %v219_v22, %v220_v23  ;;  %v260_v51 = vsel %vm1633_vm2, %v256_v42, %v259_v44  ;;  %v268_v53 = vsel %vm224_vm0, %v207_v11, %v221_v24  ;;  %v1116_v15 = vld [vmem:[%s1629_s0 + $0x2] sm:$0x3]  ;;  %v1117_v16 = vld [vmem:[%s1629_s0 + $0x6] sm:$0x3]  ;;  %v1118_v19 = vld [vmem:[%s1629_s0 + $0xe] sm:$0x3] }
  0x18   : > { %v253_v50 = vrot.slane %v251_v43, 1  ;;  %v263_v52 = vsel %vm238_vm7, %v261_v45, %v262_v46  ;;  %v271_v55 = vsel %vm228_vm1, %v222_v25, %v223_v26  ;;  %v273_v56 = vsel %vm234_vm3, %v207_v11, %v221_v24  ;;  %656 = vmatpush.bf16.msra.mxu3 %v1231_v48  ;;  %v1236_v11 = vld [vmem:[%s1630_s1 + $0x90] sm:$0xff]  ;;  %v1241_v21 = vld [vmem:[%s1630_s1 + $0xb8] sm:$0xff]  ;;  %v1235_v22 = vld [vmem:[%s1630_s1 + $0x88] sm:$0xff] }
  0x19   : > { %380 = vmatpush.bf16.msra.mxu0 %v1222_v33  ;;  %v265_v54 = vrot.slane %v263_v52, 1  ;;  %v274_v57 = vsel %vm236_vm4, %v222_v25, %v223_v26  ;;  %v272_v58 = vsel %vm1633_vm2, %v268_v53, %v271_v55  ;;  %vm283_vm11 = vsmask.f32 3340  ;;  %v1119_v20 = vld [vmem:[%s1629_s0 + $0x12] sm:$0x3] }
  0x1a   : > { %431 = vmatpush.bf16.msra.mxu1 %v1218_v34  ;;  %v275_v59 = vsel %vm238_vm7, %v273_v56, %v274_v57  ;;  %vm285_vm12 = vsmask.f32 4368  ;;  %vm284_vm13 = vmor %vm282_vm10, %vm283_vm11  ;;  %vm287_vm14 = vsmask.f32 5396  ;;  %vm289_vm15 = vsmask.f32 6424 }
  0x1b   : > { %496 = vmatpush.bf16.msra.mxu2 %v1226_v47  ;;  %v277_v60 = vrot.slane %v275_v59, 1  ;;  %v293_v61 = vshrl.u32 %v233_v29, 16  ;;  %vm286_vm5 = vmor %vm284_vm13, %vm285_vm12  ;;  %vm291_vm6 = vsmask.f32 7452  ;;  %v298_v62 = vshll.u32 %v241_v39, 16  ;;  %v1240_v29 = vld [vmem:[%s1630_s1 + $0xb0] sm:$0xff] }
  0x1c   : > { %v301_v63 = vshrl.u32 %v248_v40, 16  ;;  %v306_v0 = vshll.u32 %v253_v50, 16  ;;  %vm288_vm8 = vmor %vm286_vm5, %vm287_vm14  ;;  %v309_v1 = vshrl.u32 %v260_v51, 16  ;;  %v314_v2 = vshll.u32 %v265_v54, 16  ;;  %657 = vmatpush.bf16.msra.mxu3 %v1230_v10  ;;  %v1087_v43 = vld [vmem:[%s1629_s0 + $0x2] sm:$0x1] }
  0x1d   : > { %720 = vmatpush.bf16.msrb.mxu0 %v1237_v49  ;;  %v317_v3 = vshrl.u32 %v272_v58, 16  ;;  %v322_v4 = vshll.u32 %v277_v60, 16  ;;  %vm290_vm9 = vmor %vm288_vm8, %vm289_vm15  ;;  %vm370_vm10 = vcmask 523264   ;;  %v511_v23 = vrot.slane %v1116_v15, 1  ;;  %v1088_v47 = vld [vmem:[%s1629_s0 + $0x6] sm:$0x1] }
  0x1e   : > { %vm1430_vm2 = vmor %vm290_vm9, %vm291_vm6  ;;  %v512_v24 = vrot.slane %v1116_v15, 2  ;;  %v513_v25 = vrot.slane %v1116_v15, 3  ;;  %v514_v26 = vrot.slane %v1117_v16, 1  ;;  %v515_v27 = vrot.slane %v1117_v16, 2  ;;  %881 = vmatpush.bf16.msrb.mxu1 %v1241_v21  ;;  %v1089_v52 = vld [vmem:[%s1629_s0 + $0xe] sm:$0x1] }
  0x1f   : > { %v300_v6 = vsel %vm1430_vm2, %v293_v61, %v298_v62  ;;  %v308_v7 = vsel %vm1430_vm2, %v301_v63, %v306_v0  ;;  %v316_v8 = vsel %vm1430_vm2, %v309_v1, %v314_v2  ;;  %v324_v9 = vsel %vm1430_vm2, %v317_v3, %v322_v4  ;;  %v1090_v56 = vld [vmem:[%s1629_s0 + $0x12] sm:$0x1] }
  0x20   : > { %335 = vst [vmem:[#allocation1] ss:$9 sm:$0xff] %v300_v6  ;;  %v516_v28 = vrot.slane %v1117_v16, 3  ;;  %v517_v31 = vrot.slane %v1118_v19, 1  ;;  %v518_v32 = vrot.slane %v1118_v19, 2  ;;  %v519_v33 = vrot.slane %v1118_v19, 3 }
  0x21   : > { %338 = vst [vmem:[#allocation1 + $0x1] ss:$9 sm:$0xff] %v308_v7  ;;  %721 = vmatpush.bf16.msrb.mxu0 %v1236_v11  ;;  %v520_v34 = vrot.slane %v1119_v20, 1  ;;  %v521_v35 = vrot.slane %v1119_v20, 2  ;;  %v522_v36 = vrot.slane %v1119_v20, 3  ;;  %v530_v37 = vsel %vm234_vm3, %v1116_v15, %v511_v23  ;;  %v1239_v6 = vld [vmem:[%s1630_s1 + $0xa8] sm:$0xff] }
  0x22   : > { %341 = vst [vmem:[#allocation1 + $0x2] ss:$9 sm:$0xff] %v316_v8  ;;  %v531_v38 = vsel %vm236_vm4, %v512_v24, %v513_v25  ;;  %v542_v39 = vsel %vm234_vm3, %v1117_v16, %v514_v26  ;;  %v543_v40 = vsel %vm236_vm4, %v515_v27, %v516_v28  ;;  %882 = vmatpush.bf16.msrb.mxu1 %v1240_v29  ;;  %vm1638_vm11 = vcmask 1041408  }
  0x23   : > { %344 = vst [vmem:[#allocation1 + $0x3] ss:$9 sm:$0xff] %v324_v9  ;;  %v554_v41 = vsel %vm234_vm3, %v1118_v19, %v517_v31  ;;  %v555_v42 = vsel %vm236_vm4, %v518_v32, %v519_v33  ;;  %v532_v44 = vsel %vm238_vm7, %v530_v37, %v531_v38  ;;  %v566_v45 = vsel %vm234_vm3, %v1119_v20, %v520_v34  ;;  %vm1639_vm12 = vmmov %vm1638_vm11 }
  0x24   : > { %v567_v46 = vsel %vm236_vm4, %v521_v35, %v522_v36  ;;  %v525_v48 = vsel %vm224_vm0, %v1116_v15, %v511_v23  ;;  %v528_v49 = vsel %vm228_vm1, %v512_v24, %v513_v25  ;;  %v544_v50 = vsel %vm238_vm7, %v542_v39, %v543_v40  ;;  %vm1640_vm13 = vmmov %vm1638_vm11  ;;  %v1180_v24 = vld [vmem:[%s1629_s0 + $0x10] sm:$0x3]  ;;  %v1181_v25 = vld [vmem:[%s1629_s0 + $0x14] sm:$0x3] }
  0x25   : > { %722 = vmatpush.bf16.msrb.mxu0 %v1235_v22  ;;  %v537_v53 = vsel %vm224_vm0, %v1117_v16, %v514_v26  ;;  %v540_v54 = vsel %vm228_vm1, %v515_v27, %v516_v28  ;;  %v556_v55 = vsel %vm238_vm7, %v554_v41, %v555_v42  ;;  %v534_v57 = vrot.slane %v532_v44, 1  ;;  %vm1641_vm14 = vmmov %vm1638_vm11  ;;  %v1179_v22 = vld [vmem:[%s1629_s0 + $0x8] sm:$0x3]  ;;  %v1149_v44 = vld [vmem:[%s1629_s0 + $0x4] sm:$0x1] }
  0x26   : > { %v549_v58 = vsel %vm224_vm0, %v1118_v19, %v517_v31  ;;  %v552_v59 = vsel %vm228_vm1, %v518_v32, %v519_v33  ;;  %v568_v60 = vsel %vm238_vm7, %v566_v45, %v567_v46  ;;  %v529_v61 = vsel %vm1638_vm11, %v525_v48, %v528_v49  ;;  %883 = vmatpush.bf16.msrb.mxu1 %v1239_v6  ;;  %v1178_v19 = vld [vmem:[%s1629_s0 + $0x4] sm:$0x3]  ;;  %v1150_v48 = vld [vmem:[%s1629_s0 + $0x8] sm:$0x1] }
  0x27   : > { %v546_v62 = vrot.slane %v544_v50, 1  ;;  %v561_v63 = vsel %vm224_vm0, %v1119_v20, %v520_v34  ;;  %v564_v0 = vsel %vm228_vm1, %v521_v35, %v522_v36  ;;  %v541_v1 = vsel %vm1639_vm12, %v537_v53, %v540_v54  ;;  %v1151_v53 = vld [vmem:[%s1629_s0 + $0x10] sm:$0x1] }
  0x28   : > { %v558_v2 = vrot.slane %v556_v55, 1  ;;  %v553_v3 = vsel %vm1640_vm13, %v549_v58, %v552_v59  ;;  %v570_v4 = vrot.slane %v568_v60, 1  ;;  %v565_v7 = vsel %vm1641_vm14, %v561_v63, %v564_v0 }
  0x29   : > { %723 = vmatpush.bf16.msrb.mxu0 %v1234_v30  ;;  %v571_v8 = vshrl.u32 %v529_v61, 16  ;;  %v576_v9 = vshll.u32 %v534_v57, 16  ;;  %v579_v10 = vshrl.u32 %v541_v1, 16  ;;  %v584_v11 = vshll.u32 %v546_v62, 16  ;;  %v1152_v57 = vld [vmem:[%s1629_s0 + $0x14] sm:$0x1] }
  0x2a   : > { %v345_v17 = vld [vmem:[#allocation1] sm:$0xff]  ;;  %v595_v15 = vshrl.u32 %v565_v7, 16  ;;  %v600_v16 = vshll.u32 %v570_v4, 16  ;;  %v738_v26 = vrot.slane %v1178_v19, 1  ;;  %v739_v27 = vrot.slane %v1178_v19, 2 }
  0x2b   : > { %1069 = vmatmul.msk.bf16.vlgmr.msra.gmra.mxu0 %vm370_vm10, %v345_v17  ;;  %387 = vst [vmem:[#allocation1] ss:$9 sm:$0xff] %v192_v12  ;;  %v1238_v12 = vld [vmem:[%s1630_s1 + $0xa0] sm:$0xff]  ;;  %v578_v17 = vsel %vm1430_vm2, %v571_v8, %v576_v9  ;;  %v740_v28 = vrot.slane %v1178_v19, 3  ;;  %v741_v29 = vrot.slane %v1179_v22, 1  ;;  %v742_v30 = vrot.slane %v1179_v22, 2 }
  0x2c   : > { %390 = vst [vmem:[#allocation1 + $0x1] ss:$9 sm:$0xff] %v193_v13  ;;  %v587_v13 = vshrl.u32 %v553_v3, 16  ;;  %884 = vmatpush.bf16.msrb.mxu1 %v1238_v12  ;;  %v602_v23 = vsel %vm1430_vm2, %v595_v15, %v600_v16  ;;  %v743_v31 = vrot.slane %v1179_v22, 3  ;;  %v744_v32 = vrot.slane %v1180_v24, 1 }
  0x2d   : > { %393 = vst [vmem:[#allocation1 + $0x2] ss:$9 sm:$0xff] %v194_v14  ;;  %v592_v14 = vshll.u32 %v558_v2, 16  ;;  %v745_v33 = vrot.slane %v1180_v24, 2  ;;  %v746_v34 = vrot.slane %v1180_v24, 3  ;;  %v747_v35 = vrot.slane %v1181_v25, 1 }
  0x2e   : > { %396 = vst [vmem:[#allocation1 + $0x3] ss:$9 sm:$0xff] %v195_v18  ;;  %v586_v18 = vsel %vm1430_vm2, %v579_v10, %v584_v11  ;;  %v748_v36 = vrot.slane %v1181_v25, 2  ;;  %v749_v37 = vrot.slane %v1181_v25, 3  ;;  %v757_v38 = vsel %vm234_vm3, %v1178_v19, %v738_v26 }
  0x2f   : > { %v594_v21 = vsel %vm1430_vm2, %v587_v13, %v592_v14  ;;  %v758_v39 = vsel %vm236_vm4, %v739_v27, %v740_v28  ;;  %v769_v40 = vsel %vm234_vm3, %v1179_v22, %v741_v29  ;;  %v770_v41 = vsel %vm236_vm4, %v742_v30, %v743_v31 }
  0x30   : > { %v781_v42 = vsel %vm234_vm3, %v1180_v24, %v744_v32  ;;  %v759_v45 = vsel %vm238_vm7, %v757_v38, %v758_v39  ;;  %v793_v46 = vsel %vm234_vm3, %v1181_v25, %v747_v35  ;;  %v752_v49 = vsel %vm224_vm0, %v1178_v19, %v738_v26  ;;  %vm1642_vm3 = vmmov %vm1638_vm11 }
  0x31   : > { %v755_v50 = vsel %vm228_vm1, %v739_v27, %v740_v28  ;;  %v764_v54 = vsel %vm224_vm0, %v1179_v22, %v741_v29  ;;  %v767_v55 = vsel %vm228_vm1, %v742_v30, %v743_v31  ;;  %v761_v58 = vrot.slane %v759_v45, 1  ;;  %vm1644_vm15 = vmmov %vm1642_vm3 }
  0x32   : > { %v776_v59 = vsel %vm224_vm0, %v1180_v24, %v744_v32  ;;  %v779_v60 = vsel %vm228_vm1, %v745_v33, %v746_v34  ;;  %v756_v62 = vsel %vm1642_vm3, %v752_v49, %v755_v50  ;;  %v788_v0 = vsel %vm224_vm0, %v1181_v25, %v747_v35  ;;  %vm1645_vm5 = vmmov %vm1642_vm3 }
  0x33   : > { %v791_v1 = vsel %vm228_vm1, %v748_v36, %v749_v37  ;;  %v780_v4 = vsel %vm1644_vm15, %v776_v59, %v779_v60  ;;  %v798_v8 = vshrl.u32 %v756_v62, 16  ;;  %v803_v9 = vshll.u32 %v761_v58, 16 }
  0x34   : > { %v792_v7 = vsel %vm1645_vm5, %v788_v0, %v791_v1  ;;  %v814_v12 = vshrl.u32 %v780_v4, 16  ;;  %vm897_vm0 = vcmask (%p891_p4), 517120   ;;  %v1296_v38 = vmov (%p891_p4), 0.0  }
  0x35   : > { %v397_v51 = vld [vmem:[#allocation1] sm:$0xff]  ;;  %v822_v14 = vshrl.u32 %v792_v7, 16  ;;  %v805_v16 = vsel %vm1430_vm2, %v798_v8, %v803_v9  ;;  %898 = vst.msk [vmem:[#allocation2] sm:$0x3] (%p891_p4), %vm897_vm0, %v1296_v38 }
  0x36   : > { %1086 = vmatmul.msk.bf16.vlgmr.msra.gmra.mxu1 %vm370_vm10, %v397_v51  ;;  %452 = vst [vmem:[#allocation1] ss:$9 sm:$0xff] %v1087_v43  ;;  %v782_v43 = vsel %vm236_vm4, %v745_v33, %v746_v34  ;;  %v771_v51 = vsel %vm238_vm7, %v769_v40, %v770_v41 }
  0x37   : > { %455 = vst [vmem:[#allocation1 + $0x1] ss:$9 sm:$0xff] %v1088_v47  ;;  %v794_v47 = vsel %vm236_vm4, %v748_v36, %v749_v37  ;;  %v773_v63 = vrot.slane %v771_v51, 1  ;;  %vm1643_vm4 = vmmov %vm1642_vm3 }
  0x38   : > { %458 = vst [vmem:[#allocation1 + $0x2] ss:$9 sm:$0xff] %v1089_v52  ;;  %v795_v61 = vsel %vm238_vm7, %v793_v46, %v794_v47  ;;  %v768_v2 = vsel %vm1643_vm4, %v764_v54, %v767_v55 }
  0x39   : > { %461 = vst [vmem:[#allocation1 + $0x3] ss:$9 sm:$0xff] %v1090_v56  ;;  %v783_v56 = vsel %vm238_vm7, %v781_v42, %v782_v43  ;;  %v797_v6 = vrot.slane %v795_v61, 1  ;;  %v806_v10 = vshrl.u32 %v768_v2, 16  ;;  %v811_v11 = vshll.u32 %v773_v63, 16 }
  0x3a   : > { %v785_v3 = vrot.slane %v783_v56, 1 }
  0x3b   : > { %v827_v15 = vshll.u32 %v797_v6, 16 }
  0x3c   : > { %v819_v13 = vshll.u32 %v785_v3, 16 }
  0x3e   : > { %v821_v19 = vsel %vm1430_vm2, %v814_v12, %v819_v13 }
  0x40   : > { %v462_v20 = vld [vmem:[#allocation1] sm:$0xff] }
  0x41   : > { %1115 = vmatmul.msk.bf16.vlgmr.msra.gmra.mxu2 %vm370_vm10, %v462_v20  ;;  %613 = vst [vmem:[#allocation1] ss:$9 sm:$0xff] %v578_v17  ;;  %v813_v17 = vsel %vm1430_vm2, %v806_v10, %v811_v11  ;;  %v829_v20 = vsel %vm1430_vm2, %v822_v14, %v827_v15 }
  0x42   : > { %616 = vst [vmem:[#allocation1 + $0x1] ss:$9 sm:$0xff] %v586_v18 }
  0x43   : > { %619 = vst [vmem:[#allocation1 + $0x2] ss:$9 sm:$0xff] %v594_v21 }
  0x44   : > { %622 = vst [vmem:[#allocation1 + $0x3] ss:$9 sm:$0xff] %v602_v23 }
  0x4b   : > { %v623_v52 = vld [vmem:[#allocation1] sm:$0xff] }
  0x4c   : > { %1148 = vmatmul.msk.bf16.vlgmr.msra.gmra.mxu3 %vm370_vm10, %v623_v52  ;;  %679 = vst [vmem:[#allocation1] ss:$9 sm:$0xff] %v1149_v44 }
  0x4d   : > { %682 = vst [vmem:[#allocation1 + $0x1] ss:$9 sm:$0xff] %v1150_v48 }
  0x4e   : > { %685 = vst [vmem:[#allocation1 + $0x2] ss:$9 sm:$0xff] %v1151_v53 }
  0x4f   : > { %688 = vst [vmem:[#allocation1 + $0x3] ss:$9 sm:$0xff] %v1152_v57 }
  0x56   : > { %v689_v18 = vld [vmem:[#allocation1] sm:$0xff] }
  0x57   : > { %1177 = vmatmul.msk.bf16.vlgmr.msrb.gmra.mxu0 %vm370_vm10, %v689_v18  ;;  %840 = vst [vmem:[#allocation1] ss:$9 sm:$0xff] %v805_v16 }
  0x58   : > { %843 = vst [vmem:[#allocation1 + $0x1] ss:$9 sm:$0xff] %v813_v17 }
  0x59   : > { %846 = vst [vmem:[#allocation1 + $0x2] ss:$9 sm:$0xff] %v821_v19 }
  0x5a   : > { %849 = vst [vmem:[#allocation1 + $0x3] ss:$9 sm:$0xff] %v829_v20 }
  0x61   : > { %v850_v21 = vld [vmem:[#allocation1] sm:$0xff] }
  0x62   : > { %1210 = vmatmul.msk.bf16.vlgmr.msrb.gmra.mxu1 %vm370_vm10, %v850_v21 }
  0xa8   : > { %v382_v22 = vpop.f32.mrf.mxu0 }
  0xb0   : > { %v384_v23 = vpop.f32.mrf.mxu0 }
  0xb3   : > { %v433_v24 = vpop.f32.mrf.mxu1 }
  0xb4   : > { %v434_v29 = vadd.f32 %v433_v24, %v382_v22 }
  0xbb   : > { %v435_v25 = vpop.f32.mrf.mxu1 }
  0xc4   : > { %v498_v26 = vpop.f32.mrf.mxu2 }
  0xc5   : > { %v502_v5 = vadd.f32 %v498_v26, %v434_v29 }
  0xcc   : > { %v500_v27 = vpop.f32.mrf.mxu2 }
  0xcf   : > { %v659_v28 = vpop.f32.mrf.mxu3 }
  0xd0   : > { %v663_v32 = vadd.f32 %v659_v28, %v502_v5 }
  0xd4   : > { %v725_v30 = vpop.f32.mrf.mxu0 }
  0xd5   : > { %v729_v34 = vadd.f32 %v725_v30, %v663_v32 }
  0xd7   : > { %v661_v31 = vpop.f32.mrf.mxu3 }
  0xdc   : > { %v727_v33 = vpop.f32.mrf.mxu0 }
  0xdf   : > { %v886_v35 = vpop.f32.mrf.mxu1 }
  0xe0   : > { %v1597_v36 = vadd.f32 %v886_v35, %v729_v34 }
  0xe3   : > { %896 = sbr.rel (!%p891_p4) target bundleno = 232 (0xe8), region = 36 }
  0xe7   : > { %v888_v37 = vpop.f32.mrf.mxu1 }
  0xe8 PF: > { %p1212_p5 = scmp.ne.s32.totalorder %s1286_s12, 0 }
  0xea   : > { %901 = sbr.rel (%p1212_p5) target bundleno = 257 (0x101), region = 40 }
  0xef   : > { %v903_v39 = vsel %vm370_vm10, %v1597_v36, 0.0  ;;  %v914_v40 = vmul.f32 %v1597_v36, %v1597_v36  ;;  %v902_v51 = vld [vmem:[#allocation2] sm:$0x1]  ;;  %vm911_vm1 = vcmask 516096   ;;  %v913_v54 = vld [vmem:[#allocation2 + $0x1] sm:$0x1] }
  0xf0   : > { %v904_v41 = vrot.slane %v903_v39, 4 }
  0xf1   : > { %v915_v42 = vsel %vm370_vm10, %v914_v40, 0.0 }
  0xf2   : > { %v905_v43 = vadd.f32 %v904_v41, %v903_v39  ;;  %v916_v44 = vrot.slane %v915_v42, 4 }
  0xf4   : > { %v906_v45 = vrot.slane %v905_v43, 2  ;;  %v917_v46 = vadd.f32 %v916_v44, %v915_v42 }
  0xf6   : > { %v907_v47 = vadd.f32 %v906_v45, %v905_v43  ;;  %v918_v48 = vrot.slane %v917_v46, 2 }
  0xf8   : > { %v908_v49 = vrot.slane %v907_v47, 1  ;;  %v919_v50 = vadd.f32 %v918_v48, %v917_v46 }
  0xfa   : > { %v909_v52 = vadd.f32 %v908_v49, %v907_v47  ;;  %v920_v53 = vrot.slane %v919_v50, 1 }
  0xfc   : > { %v910_v55 = vadd.f32 %v909_v52, %v902_v51  ;;  %v921_v56 = vadd.f32 %v920_v53, %v919_v50 }
  0xfe   : > { %912 = vst.msk [vmem:[#allocation2] sm:$0x1] %vm911_vm1, %v910_v55  ;;  %v922_v57 = vadd.f32 %v921_v56, %v913_v54 }
 0x100   : > { %923 = vst.msk [vmem:[#allocation2 + $0x1] sm:$0x1] %vm911_vm1, %v922_v57 }
 0x101 PF: > { %925 = sbr.rel (!%p891_p4) target bundleno = 297 (0x129), region = 44  ;;  %v933_v8 = vld [vmem:[%s1631_s2] sm:$0x1] (%p891_p4)  ;;  %vm946_vm8 = vcmask (%p891_p4), 516096   ;;  %v948_v12 = vld [vmem:[%s1631_s2 + $0x1] sm:$0x1] (%p891_p4) }
 0x105   : > { %v926_v58 = vld [vmem:[#allocation2] sm:$0x1] (%p891_p4) }
 0x106   : > { %v927_v60 = vmul.f32 0.125, %v926_v58 }
 0x107   : > { %v928_v59 = vld [vmem:[#allocation2 + $0x1] sm:$0x1] }
 0x108   : > { %v929_v61 = vmul.f32 0.125, %v928_v59  ;;  %v930_v62 = vmul.f32 %v927_v60, %v927_v60 }
 0x10a   : > { %v931_v63 = vsub.f32 %v929_v61, %v930_v62 }
 0x10c   : > { %v932_v0 = vmax.f32 %v931_v63, 0.0 }
 0x10e   : > { %v934_v1 = vadd.f32 1e-05, %v932_v0 }
 0x110   : > { %1268 = vrsqrt.f32 %v934_v1  ;;  %vm941_vm2 = vweird.f32 %v934_v1 }
 0x116   : > { %v1269_v2 = vpop.eup %1268 }
 0x117   : > { %v936_v3 = vmul.f32 %v1269_v2, %v934_v1  ;;  %vm942_vm7 = vweird.f32 %v1269_v2 }
 0x118   : > { %vm943_vm6 = vmor %vm941_vm2, %vm942_vm7 }
 0x119   : > { %v937_v4 = vmul.f32 %v1269_v2, %v936_v3 }
 0x11b   : > { %v938_v6 = vmul.f32 0.5, %v937_v4 }
 0x11d   : > { %v939_v7 = vsub.f32 1.5, %v938_v6 }
 0x11f   : > { %v940_v9 = vmul.f32 %v1269_v2, %v939_v7 }
 0x121   : > { %v944_v10 = vsel %vm943_vm6, %v1269_v2, %v940_v9 }
 0x122   : > { %v945_v11 = vmul.f32 %v944_v10, %v933_v8 }
 0x124   : > { %947 = vst.msk [vmem:[#allocation3] sm:$0x1] %vm946_vm8, %v945_v11  ;;  %v949_v13 = vmul.f32 %v945_v11, %v927_v60 }
 0x126   : > { %v950_v14 = vsub.f32 %v948_v12, %v949_v13 }
 0x128   : > { %951 = vst.msk [vmem:[#allocation3 + $0x1] sm:$0x1] %vm946_vm8, %v950_v14 }
 0x129 PF: > { %p1213_p6 = scmp.ne.s32.totalorder %s1286_s12, 1 }
 0x12b   : > { %955 = sbr.rel (%p1213_p6) target bundleno = 315 (0x13b), region = 48 }
 0x130   : > { %v1270_v15 = vld [vmem:[#allocation3] ss:$0 sm:$0xff]  ;;  %v1271_v16 = vld [vmem:[#allocation3 + $0x1] ss:$0 sm:$0xff]  ;;  %vm966_vm10 = vcmask 519168  }
 0x131   : > { %v958_v17 = vmul.f32 %v1270_v15, %v1597_v36 }
 0x133   : > { %v961_v18 = vadd.f32 %v1271_v16, %v958_v17 }
 0x135   : > { %vm962_vm9 = vcmp.ge.f32.partialorder %v961_v18, 0.0  ;;  %v963_v19 = vmul.f32 0.01, %v961_v18 }
 0x137   : > { %v964_v20 = vsel %vm962_vm9, %v961_v18, %v963_v19 }
 0x138   : > { %v965_v21 = vpack.c.bf16 %v964_v20, %v964_v20 }
 0x13a   : > { %967 = vst.msk [vmem:[%s1632_s3] sm:$0xf] %vm966_vm10, %v965_v21 }
 0x13b PF: > { %s13_s14 = sadd.s32 1, %s1294_s14   ;;  %s1646_s12 = smov %s1290_s13 }
 0x13c   : > { %p10_p7 = scmp.ge.s32.totalorder %s13_s14, 4   ;;  %s1647_s13 = smov %s1649_s15 }
 0x13e   :  { %12 = sbr.rel (!%p10_p7) target bundleno = 2 (0x2), region = 103 }

// kernel: encoder_forward.5
= control target key start
LH: loop header
LB: loop body
LE: loop exit
PB: predicated region body
PF: predicated region fallthrough
CT: control target
= control target key end

     0   :  { %s1563_s12 = smov 0   ;;  %s1565_s13 = smov 0   ;;  %s1994_s0 = inlined_call_operand.vmem [shape: bf16[2,5,2,5,32], index: 0, kind: input, shape index: {}]   ;;  %s1995_s1 = inlined_call_operand.vmem [shape: bf16[6,32,32], index: 1, kind: input, shape index: {}]   ;;  %s1996_s2 = inlined_call_operand.vmem [shape: f32[2,32], index: 2, kind: input, shape index: {}]   ;;  %s1997_s3 = inlined_call_operand.vmem [shape: bf16[32,32], index: 3, kind: output, shape index: {}]  }
   0x1   :  { %s1567_s14 = smov 0  }
   0x2 LB: > { %s25_s15 = sadd.s32 1, %s1536_s13  ;;  %p1352_p0 = scmp.ge.s32.totalorder %s1540_s14, 1  ;;  %s1540_s14 = sphi %s1567_s14, %s13_s14   ;;  %s1536_s13 = sphi %s1565_s13, %s2003_s13   ;;  %s1532_s12 = sphi %s1563_s12, %s2002_s12  }
   0x3   : > { %p27_p1 = scmp.ge.s32.totalorder %s25_s15, 2  ;;  %p153_p2 = scmp.lt.s32.totalorder %s1540_s14, 3 }
   0x5   : > { %s2005_s15 = smov (%p27_p1, %s25_s15), 0  ;;  %p154_p3 = pnand %p1352_p0, %p153_p2 }
   0x6   : > { %p1164_p4 = scmp.eq.s32.totalorder (!%p154_p3), %s1532_s12, 0 }
   0x7   : > { %157 = sbr.rel (%p154_p3) target bundleno = 355 (0x163), region = 32 }
   0xc   : > { %v1475_v0 = vld [vmem:[%s1995_s1 + $0x18] sm:$0xff]  ;;  %v211_v1 = vld [vmem:[%s1994_s0 + $0x28] sm:$0x7]  ;;  %vm231_vm0 = vcmask 1041408   ;;  %vm235_vm1 = vcmask 1043458   ;;  %v1474_v5 = vld [vmem:[%s1995_s1 + $0x10] sm:$0xff] }
   0xd   : > { %v212_v2 = vld [vmem:[%s1994_s0 + $0x30] sm:$0x7]  ;;  %v213_v3 = vld [vmem:[%s1994_s0 + $0x38] sm:$0x7]  ;;  %v214_v4 = vld [vmem:[%s1994_s0 + $0x40] sm:$0x7]  ;;  %1485 = vmatpush.bf16.msra.mxu2 %v1475_v0  ;;  %445 = vmatpush.bf16.msra.mxu0 %v1475_v0 }
   0xe   : > { %v227_v6 = vrot.slane %v211_v1, 2  ;;  %v228_v7 = vrot.slane %v212_v2, 2  ;;  %v229_v8 = vrot.slane %v213_v3, 2  ;;  %v230_v9 = vrot.slane %v214_v4, 2  ;;  %v1473_v10 = vld [vmem:[%s1995_s1 + $0x8] sm:$0xff]  ;;  %v1472_v15 = vld [vmem:[%s1995_s1] sm:$0xff] }
   0xf   : > { %vm281_vm2 = vsmask.f32 1280  ;;  %vm282_vm3 = vsmask.f32 3336  ;;  %1487 = vmatpush.bf16.msra.mxu3 %v1473_v10  ;;  %505 = vmatpush.bf16.msra.mxu1 %v1473_v10  ;;  %vm284_vm5 = vsmask.f32 5392 }
  0x10   : > { %v259_v11 = vsel %vm231_vm0, %v211_v1, %v227_v6  ;;  %v260_v12 = vsel %vm235_vm1, %v211_v1, %v227_v6  ;;  %v265_v13 = vsel %vm231_vm0, %v212_v2, %v228_v7  ;;  %v266_v14 = vsel %vm235_vm1, %v212_v2, %v228_v7  ;;  %vm283_vm4 = vmor %vm281_vm2, %vm282_vm3  ;;  %v1477_v27 = vld [vmem:[%s1995_s1 + $0x28] sm:$0xff]  ;;  %v1476_v36 = vld [vmem:[%s1995_s1 + $0x20] sm:$0xff] }
  0x11   : > { %v262_v16 = vrot.slane %v260_v12, 2  ;;  %v268_v17 = vrot.slane %v266_v14, 2  ;;  %v271_v18 = vsel %vm231_vm0, %v213_v3, %v229_v8  ;;  %v272_v19 = vsel %vm235_vm1, %v213_v3, %v229_v8  ;;  %1486 = vmatpush.bf16.msra.mxu2 %v1474_v5  ;;  %446 = vmatpush.bf16.msra.mxu0 %v1474_v5  ;;  %vm1620_vm6 = vmor %vm283_vm4, %vm284_vm5  ;;  %v207_v41 = vld [vmem:[%s1994_s0] sm:$0x7]  ;;  %v208_v46 = vld [vmem:[%s1994_s0 + $0x8] sm:$0x7] }
  0x12   : > { %v274_v20 = vrot.slane %v272_v19, 2  ;;  %v277_v21 = vsel %vm231_vm0, %v214_v4, %v230_v9  ;;  %v278_v22 = vsel %vm235_vm1, %v214_v4, %v230_v9  ;;  %v340_v24 = vshrl.u32 %v259_v11, 16  ;;  %v209_v52 = vld [vmem:[%s1994_s0 + $0x10] sm:$0x7]  ;;  %v210_v57 = vld [vmem:[%s1994_s0 + $0x18] sm:$0x7] }
  0x13   : > { %v280_v23 = vrot.slane %v278_v22, 2  ;;  %v343_v25 = vshll.u32 %v259_v11, 16  ;;  %v349_v26 = vshll.u32 %v262_v16, 16  ;;  %v353_v28 = vshrl.u32 %v265_v13, 16  ;;  %1488 = vmatpush.bf16.msra.mxu3 %v1472_v15  ;;  %506 = vmatpush.bf16.msra.mxu1 %v1472_v15 }
  0x14   : > { %v356_v29 = vshll.u32 %v265_v13, 16  ;;  %v362_v30 = vshll.u32 %v268_v17, 16  ;;  %v366_v31 = vshrl.u32 %v271_v18, 16  ;;  %vm286_vm7 = vsmask.f32 7448 }
  0x15   : > { %v342_v33 = vrot.slane %v340_v24, 6  ;;  %v345_v34 = vrot.slane %v343_v25, 7  ;;  %v369_v35 = vshll.u32 %v271_v18, 16  ;;  %579 = vmatpush.bf16.msrb.mxu2 %v1477_v27  ;;  %v351_v37 = vrot.slane %v349_v26, 7  ;;  %vm1636_vm8 = vmor %vm1620_vm6, %vm286_vm7 }
  0x16   : > { %v355_v38 = vrot.slane %v353_v28, 6  ;;  %v358_v39 = vrot.slane %v356_v29, 7  ;;  %v368_v40 = vrot.slane %v366_v31, 6  ;;  %v375_v44 = vshll.u32 %v274_v20, 16 }
  0x17   : > { %v346_v42 = vor.u32 %v345_v34, %v342_v33  ;;  %v371_v43 = vrot.slane %v369_v35, 7  ;;  %v379_v45 = vshrl.u32 %v277_v21, 16  ;;  %v364_v49 = vrot.slane %v362_v30, 7  ;;  %v1479_v33 = vld [vmem:[%s1995_s1 + $0x38] sm:$0xff]  ;;  %v199_v34 = vld [vmem:[%s1994_s0 + $0x28] sm:$0x3] }
  0x18   : > { %v359_v48 = vor.u32 %v358_v39, %v355_v38  ;;  %v382_v50 = vshll.u32 %v277_v21, 16  ;;  %v388_v51 = vshll.u32 %v280_v23, 16  ;;  %v377_v55 = vrot.slane %v375_v44, 7  ;;  %v200_v38 = vld [vmem:[%s1994_s0 + $0x30] sm:$0x3]  ;;  %824 = vmatpush.bf16.msrb.mxu3 %v1479_v33 }
  0x19   : > { %v347_v53 = vrot.slane %v346_v42, 2  ;;  %v372_v54 = vor.u32 %v371_v43, %v368_v40  ;;  %v381_v56 = vrot.slane %v379_v45, 6  ;;  %580 = vmatpush.bf16.msrb.mxu2 %v1476_v36  ;;  %v223_v61 = vrot.slane %v207_v41, 2  ;;  %v201_v43 = vld [vmem:[%s1994_s0 + $0x38] sm:$0x3] }
  0x1a   : > { %v360_v58 = vrot.slane %v359_v48, 2  ;;  %v384_v59 = vrot.slane %v382_v50, 7  ;;  %v390_v60 = vrot.slane %v388_v51, 7  ;;  %v224_v0 = vrot.slane %v208_v46, 2 }
  0x1b   : > { %v352_v62 = vsel %vm1636_vm8, %v347_v53, %v351_v37  ;;  %v373_v63 = vrot.slane %v372_v54, 2  ;;  %v225_v1 = vrot.slane %v209_v52, 2  ;;  %v226_v4 = vrot.slane %v210_v57, 2 }
  0x1c   : > { %v365_v2 = vsel %vm1636_vm8, %v360_v58, %v364_v49  ;;  %v385_v3 = vor.u32 %v384_v59, %v381_v56  ;;  %410 = vst [vmem:[#allocation1 + $0x20] ss:$4 sm:$0xff] %v352_v62  ;;  %v234_v5 = vsel %vm231_vm0, %v207_v41, %v223_v61  ;;  %v236_v7 = vsel %vm235_vm1, %v207_v41, %v223_v61  ;;  %v202_v49 = vld [vmem:[%s1994_s0 + $0x40] sm:$0x3]  ;;  %v1399_v56 = vld [vmem:[%s1994_s0 + $0x4] sm:$0x7] }
  0x1d   : > { %v378_v6 = vsel %vm1636_vm8, %v373_v63, %v377_v55  ;;  %413 = vst [vmem:[#allocation1 + $0x21] ss:$4 sm:$0xff] %v365_v2  ;;  %v241_v8 = vsel %vm231_vm0, %v208_v46, %v224_v0  ;;  %v242_v9 = vsel %vm235_vm1, %v208_v46, %v224_v0  ;;  %v238_v11 = vrot.slane %v236_v7, 2  ;;  %v1400_v59 = vld [vmem:[%s1994_s0 + $0xc] sm:$0x7] }
  0x1e   : > { %v386_v10 = vrot.slane %v385_v3, 2  ;;  %416 = vst [vmem:[#allocation1 + $0x22] ss:$4 sm:$0xff] %v378_v6  ;;  %v244_v12 = vrot.slane %v242_v9, 2  ;;  %v247_v13 = vsel %vm231_vm0, %v209_v52, %v225_v1  ;;  %v248_v14 = vsel %vm235_vm1, %v209_v52, %v225_v1  ;;  %v1401_v1 = vld [vmem:[%s1994_s0 + $0x14] sm:$0x7] }
  0x1f   : > { %v253_v15 = vsel %vm231_vm0, %v210_v57, %v226_v4  ;;  %v254_v16 = vsel %vm235_vm1, %v210_v57, %v226_v4  ;;  %v288_v17 = vshrl.u32 %v234_v5, 16  ;;  %v250_v19 = vrot.slane %v248_v14, 2  ;;  %v1402_v4 = vld [vmem:[%s1994_s0 + $0x1c] sm:$0x7]  ;;  %v1481_v6 = vld [vmem:[%s1995_s1 + $0x48] sm:$0xff] }
  0x20   : > { %v391_v18 = vsel %vm1636_vm8, %v386_v10, %v390_v60  ;;  %v256_v20 = vrot.slane %v254_v16, 2  ;;  %v291_v21 = vshll.u32 %v234_v5, 16  ;;  %v297_v23 = vshll.u32 %v238_v11, 16  ;;  %v1478_v5 = vld [vmem:[%s1995_s1 + $0x30] sm:$0xff]  ;;  %902 = vmatpush.bf16.msrb.mxu0 %v1481_v6 }
  0x21   : > { %419 = vst [vmem:[#allocation1 + $0x23] ss:$4 sm:$0xff] %v391_v18  ;;  %v290_v22 = vrot.slane %v288_v17, 6  ;;  %v301_v24 = vshrl.u32 %v241_v8, 16  ;;  %v304_v25 = vshll.u32 %v241_v8, 16  ;;  %v310_v27 = vshll.u32 %v244_v12, 16  ;;  %825 = vmatpush.bf16.msrb.mxu3 %v1478_v5 }
  0x22   : > { %v293_v26 = vrot.slane %v291_v21, 7  ;;  %v314_v28 = vshrl.u32 %v247_v13, 16  ;;  %v317_v29 = vshll.u32 %v247_v13, 16  ;;  %v323_v32 = vshll.u32 %v250_v19, 16 }
  0x23   : > { %v303_v30 = vrot.slane %v301_v24, 6  ;;  %v306_v31 = vrot.slane %v304_v25, 7  ;;  %vm434_vm9 = vcmask 261120   ;;  %v299_v39 = vrot.slane %v297_v23, 7  ;;  %v196_v25 = vld [vmem:[%s1994_s0 + $0x8] sm:$0x3] }
  0x24   : > { %v294_v35 = vor.u32 %v293_v26, %v290_v22  ;;  %v316_v36 = vrot.slane %v314_v28, 6  ;;  %v319_v37 = vrot.slane %v317_v29, 7  ;;  %v327_v41 = vshrl.u32 %v253_v15, 16  ;;  %v195_v22 = vld [vmem:[%s1994_s0] sm:$0x3] }
  0x25   : > { %v307_v40 = vor.u32 %v306_v31, %v303_v30  ;;  %v330_v42 = vshll.u32 %v253_v15, 16  ;;  %v312_v45 = vrot.slane %v310_v27, 7  ;;  %v336_v48 = vshll.u32 %v256_v20, 16  ;;  %v197_v26 = vld [vmem:[%s1994_s0 + $0x10] sm:$0x3] }
  0x26   : > { %v295_v44 = vrot.slane %v294_v35, 2  ;;  %v320_v46 = vor.u32 %v319_v37, %v316_v36  ;;  %v325_v51 = vrot.slane %v323_v32, 7  ;;  %v329_v52 = vrot.slane %v327_v41, 6  ;;  %v198_v29 = vld [vmem:[%s1994_s0 + $0x18] sm:$0x3] }
  0x27   : > { %v308_v50 = vrot.slane %v307_v40, 2  ;;  %v332_v53 = vrot.slane %v330_v42, 7  ;;  %v338_v58 = vrot.slane %v336_v48, 7  ;;  %v612_v63 = vrot.slane %v1399_v56, 2  ;;  %v1483_v42 = vld [vmem:[%s1995_s1 + $0x58] sm:$0xff] }
  0x28   : > { %v421_v54 = vld.sshfl [vmem:[#allocation1 + $0x20] sm:$0xff pattern:$0x73625140]  ;;  %v321_v55 = vrot.slane %v320_v46, 2  ;;  %v300_v60 = vsel %vm1636_vm8, %v295_v44, %v299_v39  ;;  %v613_v2 = vrot.slane %v1400_v59, 2  ;;  %v614_v7 = vrot.slane %v1401_v1, 2  ;;  %1147 = vmatpush.bf16.msrb.mxu1 %v1483_v42 }
  0x29   : > { %1366 = vmatmul.msk.bf16.vlgmr.msra.gmra.mxu2 %vm434_vm9, %v421_v54  ;;  %471 = vst [vmem:[#allocation1 + $0x20] ss:$4 sm:$0xff] %v199_v34  ;;  %v333_v57 = vor.u32 %v332_v53, %v329_v52  ;;  %v313_v61 = vsel %vm1636_vm8, %v308_v50, %v312_v45  ;;  %v622_v8 = vsel %vm231_vm0, %v1399_v56, %v612_v63  ;;  %v615_v10 = vrot.slane %v1402_v4, 2  ;;  %v1381_v44 = vld [vmem:[%s1994_s0 + $0x2c] sm:$0x3] }
  0x2a   : > { %474 = vst [vmem:[#allocation1 + $0x21] ss:$4 sm:$0xff] %v200_v38  ;;  %v326_v0 = vsel %vm1636_vm8, %v321_v55, %v325_v51  ;;  %v623_v9 = vsel %vm235_vm1, %v1399_v56, %v612_v63  ;;  %v628_v11 = vsel %vm231_vm0, %v1400_v59, %v613_v2  ;;  %v629_v12 = vsel %vm235_vm1, %v1400_v59, %v613_v2  ;;  %v1382_v48 = vld [vmem:[%s1994_s0 + $0x34] sm:$0x3]  ;;  %v1443_v50 = vld [vmem:[%s1994_s0 + $0x8] sm:$0x7] }
  0x2b   : > { %477 = vst [vmem:[#allocation1 + $0x22] ss:$4 sm:$0xff] %v201_v43  ;;  %v334_v62 = vrot.slane %v333_v57, 2  ;;  %v635_v13 = vsel %vm235_vm1, %v1401_v1, %v614_v7  ;;  %v625_v14 = vrot.slane %v623_v9, 2  ;;  %v641_v15 = vsel %vm235_vm1, %v1402_v4, %v615_v10  ;;  %v1480_v43 = vld [vmem:[%s1995_s1 + $0x40] sm:$0xff] }
  0x2c   : > { %480 = vst [vmem:[#allocation1 + $0x23] ss:$4 sm:$0xff] %v202_v49  ;;  %v668_v16 = vshrl.u32 %v622_v8, 16  ;;  %v631_v18 = vrot.slane %v629_v12, 2  ;;  %v634_v19 = vsel %vm231_vm0, %v1401_v1, %v614_v7  ;;  %v671_v20 = vshll.u32 %v622_v8, 16  ;;  %903 = vmatpush.bf16.msrb.mxu0 %v1480_v43 }
  0x2d   : > { %v339_v3 = vsel %vm1636_vm8, %v334_v62, %v338_v58  ;;  %398 = vst [vmem:[#allocation1] ss:$4 sm:$0xff] %v300_v60  ;;  %v681_v21 = vshrl.u32 %v628_v11, 16  ;;  %v637_v23 = vrot.slane %v635_v13, 2  ;;  %v684_v24 = vshll.u32 %v628_v11, 16 }
  0x2e   : > { %401 = vst [vmem:[#allocation1 + $0x1] ss:$4 sm:$0xff] %v313_v61  ;;  %v640_v27 = vsel %vm231_vm0, %v1402_v4, %v615_v10  ;;  %v643_v28 = vrot.slane %v641_v15, 2  ;;  %v670_v30 = vrot.slane %v668_v16, 6  ;;  %v1725_v31 = vshll.u32 %v625_v14, 16 }
  0x2f   : > { %404 = vst [vmem:[#allocation1 + $0x2] ss:$4 sm:$0xff] %v326_v0  ;;  %v694_v32 = vshrl.u32 %v634_v19, 16  ;;  %v697_v33 = vshll.u32 %v634_v19, 16  ;;  %v673_v35 = vrot.slane %v671_v20, 7  ;;  %v683_v36 = vrot.slane %v681_v21, 6 }
  0x30   : > { %407 = vst [vmem:[#allocation1 + $0x3] ss:$4 sm:$0xff] %v339_v3  ;;  %v1727_v37 = vshll.u32 %v631_v18, 16  ;;  %v686_v38 = vrot.slane %v684_v24, 7  ;;  %v1730_v39 = vshll.u32 %v637_v23, 16  ;;  %v707_v40 = vshrl.u32 %v640_v27, 16 }
  0x31   : > { %v710_v41 = vshll.u32 %v640_v27, 16  ;;  %v696_v45 = vrot.slane %v694_v32, 6  ;;  %v699_v46 = vrot.slane %v697_v33, 7  ;;  %v1383_v49 = vld [vmem:[%s1994_s0 + $0x3c] sm:$0x3]  ;;  %v674_v56 = vor.u32 %v673_v35, %v670_v30  ;;  %v1482_v35 = vld [vmem:[%s1995_s1 + $0x50] sm:$0xff] }
  0x32   : > { %v709_v51 = vrot.slane %v707_v40, 6  ;;  %v1384_v53 = vld [vmem:[%s1994_s0 + $0x44] sm:$0x3]  ;;  %v1444_v54 = vld [vmem:[%s1994_s0 + $0x10] sm:$0x7]  ;;  %v687_v57 = vor.u32 %v686_v38, %v683_v36  ;;  %v935_v59 = vrot.slane %v1443_v50, 2  ;;  %1148 = vmatpush.bf16.msrb.mxu1 %v1482_v35 }
  0x33   : > { %v482_v17 = vld.sshfl [vmem:[#allocation1 + $0x20] sm:$0xff pattern:$0x73625140]  ;;  %v712_v52 = vrot.slane %v710_v41, 7  ;;  %v1445_v55 = vld [vmem:[%s1994_s0 + $0x18] sm:$0x7]  ;;  %v700_v58 = vor.u32 %v699_v46, %v696_v45 }
  0x34   : > { %1376 = vmatmul.msk.bf16.vlgmr.msra.gmra.mxu3 %vm434_vm9, %v482_v17  ;;  %545 = vst [vmem:[#allocation1 + $0x20] ss:$4 sm:$0xff] %v1381_v44  ;;  %v1377_v60 = vld [vmem:[%s1994_s0 + $0x4] sm:$0x3]  ;;  %v716_v61 = vshll.u32 %v643_v28, 16  ;;  %v936_v1 = vrot.slane %v1444_v54, 2  ;;  %v946_v7 = vsel %vm235_vm1, %v1443_v50, %v935_v59  ;;  %v945_v12 = vsel %vm231_vm0, %v1443_v50, %v935_v59 }
  0x35   : > { %548 = vst [vmem:[#allocation1 + $0x21] ss:$4 sm:$0xff] %v1382_v48  ;;  %v1378_v62 = vld [vmem:[%s1994_s0 + $0xc] sm:$0x3]  ;;  %v713_v63 = vor.u32 %v712_v52, %v709_v51  ;;  %v1446_v0 = vld [vmem:[%s1994_s0 + $0x20] sm:$0x7] }
  0x36   : > { %551 = vst [vmem:[#allocation1 + $0x22] ss:$4 sm:$0xff] %v1383_v49  ;;  %v937_v2 = vrot.slane %v1445_v55, 2  ;;  %v1379_v3 = vld [vmem:[%s1994_s0 + $0x14] sm:$0x3]  ;;  %v679_v4 = vrot.slane %v1725_v31, 7  ;;  %v952_v16 = vsel %vm235_vm1, %v1444_v54, %v936_v1  ;;  %v951_v20 = vsel %vm231_vm0, %v1444_v54, %v936_v1 }
  0x37   : > { %v420_v34 = vld.sshfl [vmem:[#allocation1] sm:$0xff pattern:$0x73625140]  ;;  %554 = vst [vmem:[#allocation1 + $0x23] ss:$4 sm:$0xff] %v1384_v53  ;;  %v692_v5 = vrot.slane %v1727_v37, 7 }
  0x38   : > { %1365 = vmatmul.msk.bf16.vlgmr.msra.gmra.mxu0 %vm434_vm9, %v420_v34  ;;  %459 = vst [vmem:[#allocation1] ss:$4 sm:$0xff] %v195_v22  ;;  %v705_v6 = vrot.slane %v1730_v39, 7  ;;  %v675_v9 = vrot.slane %v674_v56, 2  ;;  %v688_v10 = vrot.slane %v687_v57, 2  ;;  %v701_v11 = vrot.slane %v700_v58, 2 }
  0x39   : > { %462 = vst [vmem:[#allocation1 + $0x1] ss:$4 sm:$0xff] %v196_v25  ;;  %v1380_v13 = vld [vmem:[%s1994_s0 + $0x1c] sm:$0x3]  ;;  %v718_v14 = vrot.slane %v716_v61, 7  ;;  %v938_v15 = vrot.slane %v1446_v0, 2  ;;  %v958_v17 = vsel %vm235_vm1, %v1445_v55, %v937_v2  ;;  %v957_v21 = vsel %vm231_vm0, %v1445_v55, %v937_v2 }
  0x3a   : > { %465 = vst [vmem:[#allocation1 + $0x2] ss:$4 sm:$0xff] %v197_v26  ;;  %v714_v18 = vrot.slane %v713_v63, 2  ;;  %v948_v19 = vrot.slane %v946_v7, 2  ;;  %v991_v23 = vshrl.u32 %v945_v12, 16  ;;  %v994_v24 = vshll.u32 %v945_v12, 16 }
  0x3b   : > { %468 = vst [vmem:[#allocation1 + $0x3] ss:$4 sm:$0xff] %v198_v29  ;;  %v1785_v22 = vsel %vm235_vm1, %v1446_v0, %v938_v15  ;;  %v1403_v25 = vld [vmem:[%s1994_s0 + $0x2c] sm:$0x7]  ;;  %v680_v26 = vsel %vm1636_vm8, %v675_v9, %v679_v4  ;;  %v693_v27 = vsel %vm1636_vm8, %v688_v10, %v692_v5  ;;  %v954_v28 = vrot.slane %v952_v16, 2 }
  0x3c   : > { %v960_v29 = vrot.slane %v958_v17, 2  ;;  %v1404_v30 = vld [vmem:[%s1994_s0 + $0x34] sm:$0x7]  ;;  %v706_v31 = vsel %vm1636_vm8, %v701_v11, %v705_v6  ;;  %v1004_v32 = vshrl.u32 %v951_v20, 16  ;;  %v1007_v33 = vshll.u32 %v951_v20, 16 }
  0x3d   : > { %v1017_v34 = vshrl.u32 %v957_v21, 16  ;;  %v1405_v36 = vld [vmem:[%s1994_s0 + $0x3c] sm:$0x7]  ;;  %v719_v37 = vsel %vm1636_vm8, %v714_v18, %v718_v14  ;;  %v963_v38 = vsel %vm231_vm0, %v1446_v0, %v938_v15  ;;  %v966_v39 = vrot.slane %v1785_v22, 2  ;;  %v1406_v41 = vld [vmem:[%s1994_s0 + $0x44] sm:$0x7] }
  0x3e   : > { %v1020_v40 = vshll.u32 %v957_v21, 16  ;;  %v1812_v42 = vrot.slane %v991_v23, 6  ;;  %v1814_v43 = vrot.slane %v994_v24, 7  ;;  %v616_v44 = vrot.slane %v1403_v25, 2 }
  0x3f   : > { %v617_v45 = vrot.slane %v1404_v30, 2  ;;  %v1816_v46 = vshll.u32 %v948_v19, 16  ;;  %v1818_v48 = vshll.u32 %v954_v28, 16  ;;  %v1820_v49 = vshll.u32 %v960_v29, 16 }
  0x40   : > { %v618_v50 = vrot.slane %v1405_v36, 2  ;;  %v1822_v51 = vrot.slane %v1004_v32, 6  ;;  %v1824_v52 = vrot.slane %v1007_v33, 7  ;;  %v1826_v53 = vrot.slane %v1017_v34, 6 }
  0x41   : > { %v619_v54 = vrot.slane %v1406_v41, 2  ;;  %v1828_v55 = vrot.slane %v1020_v40, 7  ;;  %v646_v56 = vsel %vm231_vm0, %v1403_v25, %v616_v44  ;;  %v647_v57 = vsel %vm235_vm1, %v1403_v25, %v616_v44  ;;  %v556_v25 = vld.sshfl [vmem:[#allocation1 + $0x20] sm:$0xff pattern:$0x73625140] }
  0x42   : > { %v481_v8 = vld.sshfl [vmem:[#allocation1] sm:$0xff pattern:$0x73625140]  ;;  %v653_v58 = vsel %vm235_vm1, %v1404_v30, %v617_v45  ;;  %v649_v61 = vrot.slane %v647_v57, 2  ;;  %v1033_v0 = vshll.u32 %v963_v38, 16  ;;  %v658_v1 = vsel %vm231_vm0, %v1405_v36, %v618_v50 }
  0x43   : > { %1375 = vmatmul.msk.bf16.vlgmr.msra.gmra.mxu1 %vm434_vm9, %v481_v8  ;;  %533 = vst [vmem:[#allocation1] ss:$4 sm:$0xff] %v1377_v60  ;;  %v1030_v60 = vshrl.u32 %v963_v38, 16  ;;  %v655_v63 = vrot.slane %v653_v58, 2  ;;  %v659_v2 = vsel %vm235_vm1, %v1405_v36, %v618_v50  ;;  %v664_v5 = vsel %vm231_vm0, %v1406_v41, %v619_v54  ;;  %v1423_v36 = vld [vmem:[%s1994_s0 + $0x18] sm:$0x3] }
  0x44   : > { %536 = vst [vmem:[#allocation1 + $0x1] ss:$4 sm:$0xff] %v1378_v62  ;;  %v652_v62 = vsel %vm231_vm0, %v1404_v30, %v617_v45  ;;  %v661_v4 = vrot.slane %v659_v2, 2  ;;  %v720_v6 = vshrl.u32 %v646_v56, 16  ;;  %v723_v7 = vshll.u32 %v646_v56, 16 }
  0x45   : > { %539 = vst [vmem:[#allocation1 + $0x2] ss:$4 sm:$0xff] %v1379_v3  ;;  %v665_v3 = vsel %vm235_vm1, %v1406_v41, %v619_v54  ;;  %v729_v9 = vshll.u32 %v649_v61, 16  ;;  %v733_v10 = vshrl.u32 %v652_v62, 16  ;;  %v736_v11 = vshll.u32 %v652_v62, 16 }
  0x46   : > { %542 = vst [vmem:[#allocation1 + $0x3] ss:$4 sm:$0xff] %v1380_v13  ;;  %v667_v8 = vrot.slane %v665_v3, 2  ;;  %v722_v12 = vrot.slane %v720_v6, 6  ;;  %v725_v13 = vrot.slane %v723_v7, 7  ;;  %v742_v14 = vshll.u32 %v655_v63, 16 }
  0x47   : > { %v746_v15 = vshrl.u32 %v658_v1, 16  ;;  %v1839_v16 = vrot.slane %v1030_v60, 6  ;;  %v735_v17 = vrot.slane %v733_v10, 6  ;;  %v738_v18 = vrot.slane %v736_v11, 7  ;;  %v1447_v44 = vld [vmem:[%s1994_s0 + $0x30] sm:$0x7] }
  0x48   : > { %v749_v19 = vshll.u32 %v658_v1, 16  ;;  %v726_v20 = vor.u32 %v725_v13, %v722_v12  ;;  %v731_v21 = vrot.slane %v729_v9, 7  ;;  %v755_v24 = vshll.u32 %v661_v4, 16  ;;  %v1424_v45 = vld [vmem:[%s1994_s0 + $0x20] sm:$0x3] }
  0x49   : > { %v748_v23 = vrot.slane %v746_v15, 6  ;;  %v759_v29 = vshrl.u32 %v664_v5, 16  ;;  %v762_v30 = vshll.u32 %v664_v5, 16  ;;  %v1035_v32 = vrot.slane %v1033_v0, 7  ;;  %v1448_v58 = vld [vmem:[%s1994_s0 + $0x38] sm:$0x7] }
  0x4a   : > { %v751_v28 = vrot.slane %v749_v19, 7  ;;  %v727_v33 = vrot.slane %v726_v20, 2  ;;  %v744_v34 = vrot.slane %v742_v14, 7  ;;  %v768_v35 = vshll.u32 %v667_v8, 16  ;;  %v1450_v0 = vld [vmem:[%s1994_s0 + $0x48] sm:$0x7] }
  0x4b   : > { %v761_v40 = vrot.slane %v759_v29, 6  ;;  %v764_v41 = vrot.slane %v762_v30, 7  ;;  %v997_v50 = vor.u32 %v1814_v43, %v1812_v42  ;;  %v757_v56 = vrot.slane %v755_v24, 7 }
  0x4c   : > { %v752_v38 = vor.u32 %v751_v28, %v748_v23  ;;  %v732_v54 = vsel %vm1636_vm8, %v727_v33, %v731_v21  ;;  %v770_v57 = vrot.slane %v768_v35, 7  ;;  %v1002_v42 = vrot.slane %v1816_v46, 7  ;;  %v1425_v28 = vld [vmem:[%s1994_s0 + $0x30] sm:$0x3] }
  0x4d   : > { %v555_v59 = vld.sshfl [vmem:[#allocation1] sm:$0xff pattern:$0x73625140]  ;;  %v765_v62 = vor.u32 %v764_v41, %v761_v40  ;;  %790 = vst [vmem:[#allocation1 + $0x20] ss:$4 sm:$0xff] %v732_v54  ;;  %v1010_v43 = vor.u32 %v1824_v52, %v1822_v51  ;;  %v1023_v63 = vor.u32 %v1828_v55, %v1826_v53  ;;  %v939_v1 = vrot.slane %v1447_v44, 2 }
  0x4e   : > { %1397 = vmatmul.msk.bf16.vlgmr.msrb.gmra.mxu2 %vm434_vm9, %v555_v59  ;;  %778 = vst [vmem:[#allocation1] ss:$4 sm:$0xff] %v680_v26  ;;  %v1421_v26 = vld [vmem:[%s1994_s0 + $0x8] sm:$0x3]  ;;  %v1449_v59 = vld [vmem:[%s1994_s0 + $0x40] sm:$0x7]  ;;  %v1036_v6 = vor.u32 %v1035_v32, %v1839_v16 }
  0x4f   : > { %781 = vst [vmem:[#allocation1 + $0x1] ss:$4 sm:$0xff] %v693_v27  ;;  %v739_v27 = vor.u32 %v738_v18, %v735_v17  ;;  %v753_v61 = vrot.slane %v752_v38, 2  ;;  %v766_v3 = vrot.slane %v765_v62, 2  ;;  %v940_v4 = vrot.slane %v1448_v58, 2 }
  0x50   : > { %784 = vst [vmem:[#allocation1 + $0x2] ss:$4 sm:$0xff] %v706_v31  ;;  %v1422_v31 = vld [vmem:[%s1994_s0 + $0x10] sm:$0x3]  ;;  %v941_v5 = vrot.slane %v1449_v59, 2  ;;  %v998_v46 = vrot.slane %v997_v50, 2  ;;  %v969_v9 = vsel %vm231_vm0, %v1447_v44, %v939_v1 }
  0x51   : > { %787 = vst [vmem:[#allocation1 + $0x3] ss:$4 sm:$0xff] %v719_v37  ;;  %v740_v37 = vrot.slane %v739_v27, 2  ;;  %v1039_v51 = vshll.u32 %v966_v39, 16  ;;  %v758_v52 = vsel %vm1636_vm8, %v753_v61, %v757_v56  ;;  %v771_v53 = vsel %vm1636_vm8, %v766_v3, %v770_v57  ;;  %v1426_v32 = vld [vmem:[%s1994_s0 + $0x38] sm:$0x3] }
  0x52   : > { %v942_v55 = vrot.slane %v1450_v0, 2  ;;  %v1015_v7 = vrot.slane %v1818_v48, 7  ;;  %v1028_v8 = vrot.slane %v1820_v49, 7  ;;  %v1011_v10 = vrot.slane %v1010_v43, 2  ;;  %796 = vst [vmem:[#allocation1 + $0x22] ss:$4 sm:$0xff] %v758_v52 }
  0x53   : > { %v745_v2 = vsel %vm1636_vm8, %v740_v37, %v744_v34  ;;  %v1024_v22 = vrot.slane %v1023_v63, 2  ;;  %v975_v39 = vsel %vm231_vm0, %v1448_v58, %v940_v4  ;;  %v981_v11 = vsel %vm231_vm0, %v1449_v59, %v941_v5  ;;  %799 = vst [vmem:[#allocation1 + $0x23] ss:$4 sm:$0xff] %v771_v53  ;;  %v1427_v37 = vld [vmem:[%s1994_s0 + $0x40] sm:$0x3] }
  0x54   : > { %793 = vst [vmem:[#allocation1 + $0x21] ss:$4 sm:$0xff] %v745_v2  ;;  %v1003_v12 = vsel %vm1636_vm8, %v998_v46, %v1002_v42  ;;  %v1037_v13 = vrot.slane %v1036_v6, 2  ;;  %v1041_v14 = vrot.slane %v1039_v51, 7  ;;  %v970_v48 = vsel %vm235_vm1, %v1447_v44, %v939_v1 }
  0x55   : > { %v987_v49 = vsel %vm231_vm0, %v1450_v0, %v942_v55  ;;  %v1043_v15 = vshrl.u32 %v969_v9, 16  ;;  %v1046_v16 = vshll.u32 %v969_v9, 16  ;;  %v976_v17 = vsel %vm235_vm1, %v1448_v58, %v940_v4  ;;  %v1428_v58 = vld [vmem:[%s1994_s0 + $0x48] sm:$0x3] }
  0x56   : > { %v1056_v18 = vshrl.u32 %v975_v39, 16  ;;  %v1059_v19 = vshll.u32 %v975_v39, 16  ;;  %v1069_v20 = vshrl.u32 %v981_v11, 16  ;;  %v1016_v21 = vsel %vm1636_vm8, %v1011_v10, %v1015_v7 }
  0x57   : > { %v1029_v23 = vsel %vm1636_vm8, %v1024_v22, %v1028_v8  ;;  %v982_v24 = vsel %vm235_vm1, %v1449_v59, %v941_v5  ;;  %v1042_v27 = vsel %vm1636_vm8, %v1037_v13, %v1041_v14  ;;  %v972_v29 = vrot.slane %v970_v48, 2 }
  0x58   : > { %v800_v60 = vld.sshfl [vmem:[#allocation1] sm:$0xff pattern:$0x73625140]  ;;  %v1082_v30 = vshrl.u32 %v987_v49, 16  ;;  %v978_v33 = vrot.slane %v976_v17, 2  ;;  %v988_v34 = vsel %vm235_vm1, %v1450_v0, %v942_v55  ;;  %v1045_v35 = vrot.slane %v1043_v15, 6 }
  0x59   : > { %1419 = vmatmul.msk.bf16.vlgmr.msrb.gmra.mxu3 %vm434_vm9, %v800_v60  ;;  %856 = vst [vmem:[#allocation1] ss:$4 sm:$0xff] %v1421_v26  ;;  %v984_v38 = vrot.slane %v982_v24, 2  ;;  %v1058_v40 = vrot.slane %v1056_v18, 6  ;;  %v1061_v41 = vrot.slane %v1059_v19, 7  ;;  %v1071_v44 = vrot.slane %v1069_v20, 6 }
  0x5a   : > { %859 = vst [vmem:[#allocation1 + $0x1] ss:$4 sm:$0xff] %v1422_v31  ;;  %v1085_v31 = vshll.u32 %v987_v49, 16  ;;  %v990_v54 = vrot.slane %v988_v34, 2  ;;  %v1084_v56 = vrot.slane %v1082_v30, 6  ;;  %v1052_v60 = vshll.u32 %v972_v29, 16 }
  0x5b   : > { %862 = vst [vmem:[#allocation1 + $0x2] ss:$4 sm:$0xff] %v1423_v36  ;;  %v1048_v36 = vrot.slane %v1046_v16, 7  ;;  %v1062_v61 = vor.u32 %v1061_v41, %v1058_v40  ;;  %v1065_v62 = vshll.u32 %v978_v33, 16  ;;  %v1078_v43 = vshll.u32 %v984_v38, 16 }
  0x5c   : > { %865 = vst [vmem:[#allocation1 + $0x3] ss:$4 sm:$0xff] %v1424_v45  ;;  %v801_v45 = vld.sshfl [vmem:[#allocation1 + $0x20] sm:$0xff pattern:$0x73625140]  ;;  %v1087_v57 = vrot.slane %v1085_v31, 7 }
  0x5d   : > { %868 = vst [vmem:[#allocation1 + $0x20] ss:$4 sm:$0xff] %v1425_v28  ;;  %v1049_v59 = vor.u32 %v1048_v36, %v1045_v35  ;;  %v1091_v0 = vshll.u32 %v990_v54, 16  ;;  %v1054_v2 = vrot.slane %v1052_v60, 7  ;;  %v1063_v3 = vrot.slane %v1062_v61, 2 }
  0x5e   : > { %1398 = vmatmul.msk.bf16.gmra.mxu2 %vm434_vm9, %v556_v25  ;;  %v1072_v25 = vshll.u32 %v981_v11, 16  ;;  %871 = vst [vmem:[#allocation1 + $0x21] ss:$4 sm:$0xff] %v1426_v32  ;;  %v1088_v63 = vor.u32 %v1087_v57, %v1084_v56  ;;  %v1067_v4 = vrot.slane %v1065_v62, 7  ;;  %v1080_v6 = vrot.slane %v1078_v43, 7 }
  0x5f   : > { %874 = vst [vmem:[#allocation1 + $0x22] ss:$4 sm:$0xff] %v1427_v37  ;;  %v1050_v1 = vrot.slane %v1049_v59, 2  ;;  %v1093_v52 = vrot.slane %v1091_v0, 7  ;;  %vm1170_vm10 = vcmask (%p1164_p4), 254976   ;;  %v1542_v62 = vmov (%p1164_p4), 0.0  }
  0x60   : > { %v1074_v50 = vrot.slane %v1072_v25, 7  ;;  %877 = vst [vmem:[#allocation1 + $0x23] ss:$4 sm:$0xff] %v1428_v58  ;;  %v1089_v51 = vrot.slane %v1088_v63, 2  ;;  %v1068_v55 = vsel %vm1636_vm8, %v1063_v3, %v1067_v4 }
  0x61   : > { %v1055_v53 = vsel %vm1636_vm8, %v1050_v1, %v1054_v2  ;;  %1171 = vst.msk [vmem:[#allocation2] sm:$0x3] (%p1164_p4), %vm1170_vm10, %v1542_v62 }
  0x62   : > { %v1075_v42 = vor.u32 %v1074_v50, %v1071_v44  ;;  %v1094_v9 = vsel %vm1636_vm8, %v1089_v51, %v1093_v52 }
  0x63   : > { %v878_v26 = vld.sshfl [vmem:[#allocation1] sm:$0xff pattern:$0x73625140] }
  0x64   : > { %1441 = vmatmul.msk.bf16.vlgmr.msrb.gmra.mxu0 %vm434_vm9, %v878_v26  ;;  %1101 = vst [vmem:[#allocation1] ss:$4 sm:$0xff] %v1003_v12  ;;  %v1076_v46 = vrot.slane %v1075_v42, 2 }
  0x65   : > { %1104 = vst [vmem:[#allocation1 + $0x1] ss:$4 sm:$0xff] %v1016_v21 }
  0x66   : > { %1107 = vst [vmem:[#allocation1 + $0x2] ss:$4 sm:$0xff] %v1029_v23  ;;  %v1081_v8 = vsel %vm1636_vm8, %v1076_v46, %v1080_v6 }
  0x67   : > { %1110 = vst [vmem:[#allocation1 + $0x3] ss:$4 sm:$0xff] %v1042_v27  ;;  %v879_v7 = vld.sshfl [vmem:[#allocation1 + $0x20] sm:$0xff pattern:$0x73625140] }
  0x68   : > { %1113 = vst [vmem:[#allocation1 + $0x20] ss:$4 sm:$0xff] %v1055_v53 }
  0x69   : > { %1420 = vmatmul.msk.bf16.gmra.mxu3 %vm434_vm9, %v801_v45  ;;  %1116 = vst [vmem:[#allocation1 + $0x21] ss:$4 sm:$0xff] %v1068_v55 }
  0x6a   : > { %1119 = vst [vmem:[#allocation1 + $0x22] ss:$4 sm:$0xff] %v1081_v8 }
  0x6b   : > { %1122 = vst [vmem:[#allocation1 + $0x23] ss:$4 sm:$0xff] %v1094_v9 }
  0x6e   : > { %v1123_v5 = vld.sshfl [vmem:[#allocation1] sm:$0xff pattern:$0x73625140] }
  0x6f   : > { %1463 = vmatmul.msk.bf16.vlgmr.msrb.gmra.mxu1 %vm434_vm9, %v1123_v5 }
  0x72   : > { %v1124_v10 = vld.sshfl [vmem:[#allocation1 + $0x20] sm:$0xff pattern:$0x73625140] }
  0x74   : > { %1442 = vmatmul.msk.bf16.gmra.mxu0 %vm434_vm9, %v879_v7 }
  0x7f   : > { %1464 = vmatmul.msk.bf16.gmra.mxu1 %vm434_vm9, %v1124_v10 }
  0xac   : > { %v453_v22 = vpop.f32.mrf.mxu2 }
  0xb4   : > { %v455_v12 = vpop.f32.mrf.mxu2 }
  0xb5   : > { %v448_v11 = vpop.f32.mrf.mxu0 }
  0xb7   : > { %v513_v39 = vpop.f32.mrf.mxu3 }
  0xb8   : > { %v514_v32 = vadd.f32 %v513_v39, %v453_v22 }
  0xbd   : > { %v450_v48 = vpop.f32.mrf.mxu0 }
  0xbf   : > { %v515_v13 = vpop.f32.mrf.mxu3 }
  0xc0   : > { %v508_v14 = vpop.f32.mrf.mxu1  ;;  %v516_v41 = vadd.f32 %v515_v13, %v455_v12 }
  0xc1   : > { %v509_v15 = vadd.f32 %v508_v14, %v448_v11 }
  0xc8   : > { %v510_v17 = vpop.f32.mrf.mxu1 }
  0xc9   : > { %v511_v23 = vadd.f32 %v510_v17, %v450_v48 }
  0xd1   : > { %v582_v49 = vpop.f32.mrf.mxu2 }
  0xd2   : > { %v592_v18 = vadd.f32 %v582_v49, %v509_v15 }
  0xd9   : > { %v584_v19 = vpop.f32.mrf.mxu2 }
  0xda   : > { %v593_v27 = vadd.f32 %v584_v19, %v511_v23 }
  0xdc   : > { %v827_v47 = vpop.f32.mrf.mxu3 }
  0xdd   : > { %v837_v20 = vadd.f32 %v827_v47, %v592_v18 }
  0xe1   : > { %v905_v16 = vpop.f32.mrf.mxu0  ;;  %v587_v30 = vpop.f32.mrf.mxu2 }
  0xe2   : > { %v915_v24 = vadd.f32 %v905_v16, %v837_v20  ;;  %v594_v35 = vadd.f32 %v587_v30, %v514_v32 }
  0xe4   : > { %v829_v21 = vpop.f32.mrf.mxu3 }
  0xe5   : > { %v838_v29 = vadd.f32 %v829_v21, %v593_v27 }
  0xe9   : > { %v907_v25 = vpop.f32.mrf.mxu0  ;;  %v589_v40 = vpop.f32.mrf.mxu2 }
  0xea   : > { %v916_v33 = vadd.f32 %v907_v25, %v838_v29  ;;  %v595_v54 = vadd.f32 %v589_v40, %v516_v41 }
  0xec   : > { %v1150_v26 = vpop.f32.mrf.mxu1  ;;  %v832_v31 = vpop.f32.mrf.mxu3 }
  0xed   : > { %v1929_v28 = vadd.f32 %v1150_v26, %v915_v24  ;;  %v839_v38 = vadd.f32 %v832_v31, %v594_v35 }
  0xf1   : > { %v910_v37 = vpop.f32.mrf.mxu0 }
  0xf2   : > { %v917_v44 = vadd.f32 %v910_v37, %v839_v38 }
  0xf4   : > { %v1152_v34 = vpop.f32.mrf.mxu1  ;;  %v834_v45 = vpop.f32.mrf.mxu3 }
  0xf5   : > { %v1931_v36 = vadd.f32 %v1152_v34, %v916_v33  ;;  %v840_v57 = vadd.f32 %v834_v45, %v595_v54 }
  0xf9   : > { %v912_v58 = vpop.f32.mrf.mxu0 }
  0xfa   : > { %v918_v59 = vadd.f32 %v912_v58, %v840_v57 }
  0xfc   : > { %v1155_v50 = vpop.f32.mrf.mxu1 }
  0xfd   : > { %v1933_v56 = vadd.f32 %v1155_v50, %v917_v44 }
 0x101   : > { %1169 = sbr.rel (!%p1164_p4) target bundleno = 262 (0x106), region = 36 }
 0x104   : > { %v1157_v60 = vpop.f32.mrf.mxu1 }
 0x105   : > { %v1935_v61 = vadd.f32 %v1157_v60, %v918_v59 }
 0x106 PF: > { %p1466_p5 = scmp.ne.s32.totalorder %s1532_s12, 0 }
 0x108   : > { %1174 = sbr.rel (%p1466_p5) target bundleno = 294 (0x126), region = 40 }
 0x10d   : > { %v1176_v42 = vsel %vm434_vm9, %v1929_v28, 0.0  ;;  %v1177_v43 = vsel %vm434_vm9, %v1931_v36, 0.0  ;;  %v1179_v63 = vsel %vm434_vm9, %v1933_v56, 0.0  ;;  %v1193_v1 = vmul.f32 %v1929_v28, %v1929_v28  ;;  %v1175_v49 = vld [vmem:[#allocation2] sm:$0x1] }
 0x10e   : > { %v1178_v0 = vadd.f32 %v1177_v43, %v1176_v42  ;;  %v1194_v2 = vmul.f32 %v1931_v36, %v1931_v36  ;;  %v1181_v3 = vsel %vm434_vm9, %v1935_v61, 0.0  ;;  %v1195_v4 = vmul.f32 %v1933_v56, %v1933_v56  ;;  %v1192_v18 = vld [vmem:[#allocation2 + $0x1] sm:$0x1] }
 0x10f   : > { %v1196_v5 = vmul.f32 %v1935_v61, %v1935_v61  ;;  %v1197_v6 = vsel %vm434_vm9, %v1193_v1, 0.0  ;;  %vm1190_vm11 = vcmask 253952  }
 0x110   : > { %v1180_v46 = vadd.f32 %v1179_v63, %v1178_v0  ;;  %v1198_v51 = vsel %vm434_vm9, %v1194_v2, 0.0  ;;  %v1200_v53 = vsel %vm434_vm9, %v1195_v4, 0.0 }
 0x111   : > { %v1199_v52 = vadd.f32 %v1198_v51, %v1197_v6  ;;  %v1202_v7 = vsel %vm434_vm9, %v1196_v5, 0.0 }
 0x112   : > { %v1182_v55 = vadd.f32 %v1181_v3, %v1180_v46 }
 0x113   : > { %v1201_v8 = vadd.f32 %v1200_v53, %v1199_v52 }
 0x114   : > { %v1183_v9 = vrot.slane %v1182_v55, 4 }
 0x115   : > { %v1203_v10 = vadd.f32 %v1202_v7, %v1201_v8 }
 0x116   : > { %v1184_v22 = vadd.f32 %v1183_v9, %v1182_v55 }
 0x117   : > { %v1204_v39 = vrot.slane %v1203_v10, 4 }
 0x118   : > { %v1185_v11 = vrot.slane %v1184_v22, 2 }
 0x119   : > { %v1205_v12 = vadd.f32 %v1204_v39, %v1203_v10 }
 0x11a   : > { %v1186_v13 = vadd.f32 %v1185_v11, %v1184_v22 }
 0x11b   : > { %v1206_v14 = vrot.slane %v1205_v12, 2 }
 0x11c   : > { %v1187_v48 = vrot.slane %v1186_v13, 1 }
 0x11d   : > { %v1207_v47 = vadd.f32 %v1206_v14, %v1205_v12 }
 0x11e   : > { %v1188_v15 = vadd.f32 %v1187_v48, %v1186_v13 }
 0x11f   : > { %v1208_v16 = vrot.slane %v1207_v47, 1 }
 0x120   : > { %v1189_v17 = vadd.f32 %v1188_v15, %v1175_v49 }
 0x121   : > { %v1209_v19 = vadd.f32 %v1208_v16, %v1207_v47 }
 0x122   : > { %1191 = vst.msk [vmem:[#allocation2] sm:$0x1] %vm1190_vm11, %v1189_v17 }
 0x123   : > { %v1210_v20 = vadd.f32 %v1209_v19, %v1192_v18 }
 0x125   : > { %1211 = vst.msk [vmem:[#allocation2 + $0x1] sm:$0x1] %vm1190_vm11, %v1210_v20 }
 0x126 PF: > { %1213 = sbr.rel (!%p1164_p4) target bundleno = 334 (0x14e), region = 44  ;;  %v1221_v37 = vld [vmem:[%s1996_s2] sm:$0x1] (%p1164_p4)  ;;  %vm1234_vm15 = vcmask (%p1164_p4), 253952   ;;  %v1236_v44 = vld [vmem:[%s1996_s2 + $0x1] sm:$0x1] (%p1164_p4) }
 0x129   : > { %v1214_v21 = vld [vmem:[#allocation2] sm:$0x1] (%p1164_p4) }
 0x12a   : > { %v1215_v24 = vmul.f32 (%p1164_p4), 0.03125, %v1214_v21 }
 0x12c   : > { %v1216_v23 = vld [vmem:[#allocation2 + $0x1] sm:$0x1]  ;;  %v1218_v26 = vmul.f32 %v1215_v24, %v1215_v24 }
 0x12d   : > { %v1217_v25 = vmul.f32 0.03125, %v1216_v23 }
 0x12f   : > { %v1219_v27 = vsub.f32 %v1217_v25, %v1218_v26 }
 0x131   : > { %v1220_v29 = vmax.f32 %v1219_v27, 0.0 }
 0x133   : > { %v1222_v30 = vadd.f32 1e-05, %v1220_v29 }
 0x135   : > { %1514 = vrsqrt.f32 %v1222_v30  ;;  %vm1229_vm12 = vweird.f32 %v1222_v30 }
 0x13b   : > { %v1515_v31 = vpop.eup %1514 }
 0x13c   : > { %v1224_v32 = vmul.f32 %v1515_v31, %v1222_v30  ;;  %vm1230_vm13 = vweird.f32 %v1515_v31 }
 0x13d   : > { %vm1231_vm14 = vmor %vm1229_vm12, %vm1230_vm13 }
 0x13e   : > { %v1225_v33 = vmul.f32 %v1515_v31, %v1224_v32 }
 0x140   : > { %v1226_v34 = vmul.f32 0.5, %v1225_v33 }
 0x142   : > { %v1227_v35 = vsub.f32 1.5, %v1226_v34 }
 0x144   : > { %v1228_v38 = vmul.f32 %v1515_v31, %v1227_v35 }
 0x146   : > { %v1232_v40 = vsel %vm1231_vm14, %v1515_v31, %v1228_v38 }
 0x147   : > { %v1233_v41 = vmul.f32 %v1232_v40, %v1221_v37 }
 0x149   : > { %1235 = vst.msk [vmem:[#allocation3] sm:$0x1] %vm1234_vm15, %v1233_v41  ;;  %v1237_v45 = vmul.f32 %v1233_v41, %v1215_v24 }
 0x14b   : > { %v1238_v50 = vsub.f32 %v1236_v44, %v1237_v45 }
 0x14d   : > { %1239 = vst.msk [vmem:[#allocation3 + $0x1] sm:$0x1] %vm1234_vm15, %v1238_v50 }
 0x14e PF: > { %p1467_p6 = scmp.ne.s32.totalorder %s1532_s12, 1 }
 0x150   : > { %1243 = sbr.rel (%p1467_p6) target bundleno = 355 (0x163), region = 48 }
 0x155   : > { %v1516_v54 = vld [vmem:[#allocation3] ss:$0 sm:$0xff]  ;;  %v1517_v57 = vld [vmem:[#allocation3 + $0x1] ss:$0 sm:$0xff]  ;;  %vm1272_vm4 = vcmask 257024  }
 0x156   : > { %v1246_v58 = vmul.f32 %v1516_v54, %v1929_v28  ;;  %v1247_v59 = vmul.f32 %v1516_v54, %v1931_v36  ;;  %v1248_v60 = vmul.f32 %v1516_v54, %v1933_v56  ;;  %v1249_v62 = vmul.f32 %v1516_v54, %v1935_v61 }
 0x158   : > { %v1252_v42 = vadd.f32 %v1517_v57, %v1246_v58  ;;  %v1253_v43 = vadd.f32 %v1517_v57, %v1247_v59  ;;  %v1254_v63 = vadd.f32 %v1517_v57, %v1248_v60  ;;  %v1255_v0 = vadd.f32 %v1517_v57, %v1249_v62 }
 0x15a   : > { %vm1256_vm0 = vcmp.ge.f32.partialorder %v1252_v42, 0.0  ;;  %v1260_v1 = vmul.f32 0.01, %v1252_v42  ;;  %vm1257_vm1 = vcmp.ge.f32.partialorder %v1253_v43, 0.0  ;;  %v1261_v2 = vmul.f32 0.01, %v1253_v43 }
 0x15b   : > { %vm1258_vm2 = vcmp.ge.f32.partialorder %v1254_v63, 0.0  ;;  %v1262_v3 = vmul.f32 0.01, %v1254_v63  ;;  %vm1259_vm3 = vcmp.ge.f32.partialorder %v1255_v0, 0.0  ;;  %v1263_v4 = vmul.f32 0.01, %v1255_v0 }
 0x15c   : > { %v1264_v5 = vsel %vm1256_vm0, %v1252_v42, %v1260_v1  ;;  %v1265_v28 = vsel %vm1257_vm1, %v1253_v43, %v1261_v2 }
 0x15d   : > { %v1268_v36 = vpack.c.bf16 %v1264_v5, %v1264_v5  ;;  %v1269_v46 = vpack.c.bf16 %v1265_v28, %v1265_v28  ;;  %v1266_v56 = vsel %vm1258_vm2, %v1254_v63, %v1262_v3  ;;  %v1267_v6 = vsel %vm1259_vm3, %v1255_v0, %v1263_v4 }
 0x15e   : > { %v1270_v61 = vpack.c.bf16 %v1266_v56, %v1266_v56  ;;  %v1271_v51 = vpack.c.bf16 %v1267_v6, %v1267_v6 }
 0x15f   : > { %1273 = vst.msk [vmem:[%s1997_s3] sm:$0xf] %vm1272_vm4, %v1268_v36 }
 0x160   : > { %1274 = vst.msk [vmem:[%s1997_s3 + $0x4] sm:$0xf] %vm1272_vm4, %v1269_v46 }
 0x161   : > { %1275 = vst.msk [vmem:[%s1997_s3 + $0x8] sm:$0xf] %vm1272_vm4, %v1270_v61 }
 0x162   : > { %1276 = vst.msk [vmem:[%s1997_s3 + $0xc] sm:$0xf] %vm1272_vm4, %v1271_v51 }
 0x163 PF: > { %s13_s14 = sadd.s32 1, %s1540_s14   ;;  %s2002_s12 = smov %s1536_s13 }
 0x164   : > { %p10_p7 = scmp.ge.s32.totalorder %s13_s14, 4   ;;  %s2003_s13 = smov %s2005_s15 }
 0x166   :  { %12 = sbr.rel (!%p10_p7) target bundleno = 2 (0x2), region = 127 }

// kernel: encoder_forward.4
= control target key start
LH: loop header
LB: loop body
LE: loop exit
PB: predicated region body
PF: predicated region fallthrough
CT: control target
= control target key end

     0   :  { %s2412_s12 = smov 0   ;;  %s2414_s13 = smov 0   ;;  %s3342_s0 = inlined_call_operand.vmem [shape: bf16[2,9,2,9,8], index: 0, kind: input, shape index: {}]   ;;  %s3343_s1 = inlined_call_operand.vmem [shape: bf16[6,8,16], index: 1, kind: input, shape index: {}]   ;;  %s3344_s2 = inlined_call_operand.vmem [shape: f32[2,16], index: 2, kind: input, shape index: {}]   ;;  %s3345_s3 = inlined_call_operand.vmem [shape: bf16[128,16], index: 3, kind: output, shape index: {}]  }
   0x1   :  { %s2416_s14 = smov 0  }
   0x2 LB: > { %s25_s15 = sadd.s32 1, %s2385_s13  ;;  %p2058_p0 = scmp.ge.s32.totalorder %s2389_s14, 1  ;;  %s2389_s14 = sphi %s2416_s14, %s13_s14   ;;  %s2385_s13 = sphi %s2414_s13, %s3349_s13   ;;  %s2381_s12 = sphi %s2412_s12, %s3348_s12  }
   0x3   : > { %p27_p1 = scmp.ge.s32.totalorder %s25_s15, 2  ;;  %p153_p2 = scmp.lt.s32.totalorder %s2389_s14, 3 }
   0x5   : > { %s3351_s15 = smov (%p27_p1, %s25_s15), 0  ;;  %p154_p3 = pnand %p2058_p0, %p153_p2 }
   0x6   : > { %p1725_p4 = scmp.eq.s32.totalorder (!%p154_p3), %s2381_s12, 0 }
   0x7   : > { %157 = sbr.rel (%p154_p3) target bundleno = 487 (0x1e7), region = 32 }
   0xc   : > { %v211_v0 = vld [vmem:[%s3343_s1] sm:$0xf]  ;;  %vm506_vm0 = vcmask 1043456   ;;  %v2086_v1 = vld [vmem:[%s3342_s0 + $0x90] sm:$0xf]  ;;  %vm481_vm1 = vcmask 64512  }
   0xd   : > { %v624_v2 = vsel %vm506_vm0, %v211_v0, 0  ;;  %v2315_v3 = vld [vmem:[%s3342_s0 + $0x9c] sm:$0xf0]  ;;  %v2059_v4 = vld [vmem:[%s3343_s1 + $0x4] sm:$0xf]  ;;  %vm1731_vm5 = vcmask (%p1725_p4), 123904  }
   0xe   : > { %2337 = vmatpush.bf16.msra.mxu3 %v624_v2  ;;  %v2087_v5 = vor.u32 %v2315_v3, %v2086_v1  ;;  %v508_v6 = vsel %vm506_vm0, %v2059_v4, 0  ;;  %633 = vmatpush.bf16.msra.mxu1 %v624_v2  ;;  %v203_v7 = vld [vmem:[%s3342_s0 + $0x90] sm:$0xf]  ;;  %v204_v8 = vld [vmem:[%s3342_s0 + $0xa0] sm:$0xf] }
   0xf   : > { %2336 = vmatpush.bf16.msra.mxu2 %v508_v6  ;;  %517 = vmatpush.bf16.msra.mxu0 %v508_v6  ;;  %v220_v9 = vld [vmem:[%s3342_s0 + $0x94] sm:$0x1]  ;;  %v221_v10 = vld [vmem:[%s3342_s0 + $0xa4] sm:$0x1]  ;;  %vm228_vm2 = vsmask.f32 3328 }
  0x10   : > { %vm229_vm3 = vsmask.f32 7440  ;;  %v344_v11 = vshrl.u32 %v203_v7, 16  ;;  %v347_v12 = vshll.u32 %v203_v7, 16  ;;  %v353_v13 = vshll.u32 %v220_v9, 16 }
  0x11   : > { %2104 = vmatmul.msk.bf16.vlgmr.msra.gmra.mxu3 %vm481_vm1, %v2087_v5  ;;  %v358_v14 = vshrl.u32 %v204_v8, 16  ;;  %v361_v15 = vshll.u32 %v204_v8, 16  ;;  %v367_v16 = vshll.u32 %v221_v10, 16  ;;  %v2124_v17 = vld [vmem:[%s3343_s1 + $0x8] sm:$0xf]  ;;  %vm2477_vm4 = vmor %vm228_vm2, %vm229_vm3 }
  0x12   : > { %v346_v18 = vrot.slane %v344_v11, 4  ;;  %v349_v19 = vrot.slane %v347_v12, 5  ;;  %v355_v20 = vrot.slane %v353_v13, 5  ;;  %v759_v21 = vsel %vm506_vm0, %v2124_v17, 0  ;;  %v195_v22 = vld [vmem:[%s3342_s0] sm:$0xf] }
  0x13   : > { %v360_v23 = vrot.slane %v358_v14, 4  ;;  %v363_v24 = vrot.slane %v361_v15, 5  ;;  %v369_v25 = vrot.slane %v367_v16, 5  ;;  %768 = vmatpush.bf16.msrb.mxu2 %v759_v21  ;;  %v196_v26 = vld [vmem:[%s3342_s0 + $0x10] sm:$0xf]  ;;  %v232_v27 = vshrl.u32 %v195_v22, 16 }
  0x14   : > { %v350_v28 = vor.u32 %v349_v19, %v346_v18  ;;  %v212_v29 = vld [vmem:[%s3342_s0 + $0x4] sm:$0x1]  ;;  %v213_v30 = vld [vmem:[%s3342_s0 + $0x14] sm:$0x1]  ;;  %v235_v31 = vshll.u32 %v195_v22, 16  ;;  %v246_v32 = vshrl.u32 %v196_v26, 16 }
  0x15   : > { %v364_v34 = vor.u32 %v363_v24, %v360_v23  ;;  %v234_v35 = vrot.slane %v232_v27, 4  ;;  %v241_v36 = vshll.u32 %v212_v29, 16  ;;  %v249_v37 = vshll.u32 %v196_v26, 16  ;;  %v2070_v38 = vld [vmem:[%s3342_s0] sm:$0xf] }
  0x16   : > { %v351_v39 = vrot.slane %v350_v28, 4  ;;  %v237_v40 = vrot.slane %v235_v31, 5  ;;  %v248_v41 = vrot.slane %v246_v32, 4  ;;  %v255_v42 = vshll.u32 %v213_v30, 16  ;;  %v2311_v43 = vld [vmem:[%s3342_s0 + $0xc] sm:$0xf0] }
  0x17   : > { %v365_v44 = vrot.slane %v364_v34, 4  ;;  %v243_v45 = vrot.slane %v241_v36, 5  ;;  %v251_v46 = vrot.slane %v249_v37, 5  ;;  %v2071_v47 = vor.u32 %v2311_v43, %v2070_v38  ;;  %v2197_v48 = vld [vmem:[%s3343_s1 + $0xc] sm:$0xf] }
  0x18   : > { %v356_v49 = vsel %vm2477_vm4, %v351_v39, %v355_v20  ;;  %v238_v50 = vor.u32 %v237_v40, %v234_v35  ;;  %v257_v51 = vrot.slane %v255_v42, 5  ;;  %v1133_v52 = vsel %vm506_vm0, %v2197_v48, 0  ;;  %v2090_v53 = vld [vmem:[%s3342_s0 + $0xb0] sm:$0xf]  ;;  %v2316_v54 = vld [vmem:[%s3342_s0 + $0xbc] sm:$0xf0] }
  0x19   : > { %v370_v55 = vsel %vm2477_vm4, %v365_v44, %v369_v25  ;;  %v465_v56 = vunpack.c.l.b16 %v356_v49  ;;  %v252_v57 = vor.u32 %v251_v46, %v248_v41  ;;  %2100 = vmatmul.msk.bf16.vlgmr.msra.gmra.mxu1 %vm481_vm1, %v2071_v47  ;;  %1142 = vmatpush.bf16.msrb.mxu3 %v1133_v52  ;;  %v2222_v58 = vld [vmem:[%s3343_s1 + $0x10] sm:$0xf]  ;;  %v2295_v59 = vld [vmem:[%s3343_s1 + $0x14] sm:$0xf]  ;;  %v206_v1 = vld [vmem:[%s3342_s0 + $0xc0] sm:$0xf]  ;;  %v2091_v3 = vor.u32 %v2316_v54, %v2090_v53 }
  0x1a   : > { %v205_v60 = vld [vmem:[%s3342_s0 + $0xb0] sm:$0xf]  ;;  %v466_v61 = vunpack.c.l.b16 %v370_v55  ;;  %v239_v62 = vrot.slane %v238_v50, 4  ;;  %v1284_v63 = vsel %vm506_vm0, %v2222_v58, 0  ;;  %v1658_v0 = vsel %vm506_vm0, %v2295_v59, 0 }
  0x1b   : > { %v253_v2 = vrot.slane %v252_v57, 4  ;;  %1293 = vmatpush.bf16.msrb.mxu0 %v1284_v63  ;;  %1667 = vmatpush.bf16.msrb.mxu1 %v1658_v0  ;;  %v222_v4 = vld [vmem:[%s3342_s0 + $0xb4] sm:$0x1]  ;;  %v372_v5 = vshrl.u32 %v205_v60, 16  ;;  %v223_v8 = vld [vmem:[%s3342_s0 + $0xc4] sm:$0x1] }
  0x1c   : > { %v477_v6 = vpack.c.b16 %v466_v61, %v465_v56  ;;  %v244_v7 = vsel %vm2477_vm4, %v239_v62, %v243_v45  ;;  %v375_v9 = vshll.u32 %v205_v60, 16  ;;  %v381_v10 = vshll.u32 %v222_v4, 16  ;;  %v197_v11 = vld [vmem:[%s3342_s0 + $0x20] sm:$0xf]  ;;  %v214_v16 = vld [vmem:[%s3342_s0 + $0x24] sm:$0x1] }
  0x1d   : > { %v258_v12 = vsel %vm2477_vm4, %v253_v2, %v257_v51  ;;  %v457_v13 = vunpack.c.l.b16 %v244_v7  ;;  %v374_v14 = vrot.slane %v372_v5, 4  ;;  %v386_v15 = vshrl.u32 %v206_v1, 16  ;;  %v198_v21 = vld [vmem:[%s3342_s0 + $0x30] sm:$0xf]  ;;  %v215_v29 = vld [vmem:[%s3342_s0 + $0x34] sm:$0x1] }
  0x1e   : > { %2064 = vmatmul.msk.bf16.vlgmr.msra.gmra.mxu2 %vm481_vm1, %v477_v6  ;;  %v458_v17 = vunpack.c.l.b16 %v258_v12  ;;  %v377_v18 = vrot.slane %v375_v9, 5  ;;  %v383_v19 = vrot.slane %v381_v10, 5  ;;  %v389_v20 = vshll.u32 %v206_v1, 16  ;;  %v2074_v31 = vld [vmem:[%s3342_s0 + $0x20] sm:$0xf] }
  0x1f   : > { %v388_v22 = vrot.slane %v386_v15, 4  ;;  %v395_v23 = vshll.u32 %v223_v8, 16  ;;  %v260_v24 = vshrl.u32 %v197_v11, 16  ;;  %v263_v25 = vshll.u32 %v197_v11, 16  ;;  %v2312_v36 = vld [vmem:[%s3342_s0 + $0x2c] sm:$0xf0] }
  0x20   : > { %v473_v26 = vpack.c.b16 %v458_v17, %v457_v13  ;;  %v378_v27 = vor.u32 %v377_v18, %v374_v14  ;;  %v391_v28 = vrot.slane %v389_v20, 5  ;;  %v269_v30 = vshll.u32 %v214_v16, 16  ;;  %v207_v41 = vld [vmem:[%s3342_s0 + $0xd0] sm:$0xf]  ;;  %v224_v46 = vld [vmem:[%s3342_s0 + $0xd4] sm:$0x1] }
  0x21   : > { %2105 = vmatmul.msk.bf16.gmra.mxu3 %vm481_vm1, %v2091_v3  ;;  %v262_v32 = vrot.slane %v260_v24, 4  ;;  %v265_v34 = vrot.slane %v263_v25, 5  ;;  %v274_v35 = vshrl.u32 %v198_v21, 16  ;;  %v397_v39 = vrot.slane %v395_v23, 5  ;;  %v208_v51 = vld [vmem:[%s3342_s0 + $0xe0] sm:$0xf] }
  0x22   : > { %2060 = vmatmul.msk.bf16.vlgmr.msra.gmra.mxu0 %vm481_vm1, %v473_v26  ;;  %v379_v37 = vrot.slane %v378_v27, 4  ;;  %v392_v38 = vor.u32 %v391_v28, %v388_v22  ;;  %v277_v40 = vshll.u32 %v198_v21, 16  ;;  %v271_v43 = vrot.slane %v269_v30, 5  ;;  %v225_v58 = vld [vmem:[%s3342_s0 + $0xe4] sm:$0x1] }
  0x23   : > { %v266_v42 = vor.u32 %v265_v34, %v262_v32  ;;  %v276_v44 = vrot.slane %v274_v35, 4  ;;  %v283_v45 = vshll.u32 %v215_v29, 16  ;;  %v2075_v50 = vor.u32 %v2312_v36, %v2074_v31  ;;  %v199_v1 = vld [vmem:[%s3342_s0 + $0x40] sm:$0xf]  ;;  %v216_v5 = vld [vmem:[%s3342_s0 + $0x44] sm:$0x1] }
  0x24   : > { %v384_v47 = vsel %vm2477_vm4, %v379_v37, %v383_v19  ;;  %v393_v48 = vrot.slane %v392_v38, 4  ;;  %v279_v49 = vrot.slane %v277_v40, 5  ;;  %v400_v55 = vshrl.u32 %v207_v41, 16  ;;  %v200_v10 = vld [vmem:[%s3342_s0 + $0x50] sm:$0xf] }
  0x25   : > { %v467_v52 = vunpack.c.l.b16 %v384_v47  ;;  %v267_v53 = vrot.slane %v266_v42, 4  ;;  %v285_v54 = vrot.slane %v283_v45, 5  ;;  %v403_v59 = vshll.u32 %v207_v41, 16  ;;  %v2094_v12 = vld [vmem:[%s3342_s0 + $0xd0] sm:$0xf] }
  0x26   : > { %v398_v56 = vsel %vm2477_vm4, %v393_v48, %v397_v39  ;;  %v280_v57 = vor.u32 %v279_v49, %v276_v44  ;;  %v409_v60 = vshll.u32 %v224_v46, 16  ;;  %v402_v63 = vrot.slane %v400_v55, 4  ;;  %v2317_v13 = vld [vmem:[%s3342_s0 + $0xdc] sm:$0xf0]  ;;  %v217_v20 = vld [vmem:[%s3342_s0 + $0x54] sm:$0x1] }
  0x27   : > { %v468_v61 = vunpack.c.l.b16 %v398_v56  ;;  %v272_v62 = vsel %vm2477_vm4, %v267_v53, %v271_v43  ;;  %v414_v0 = vshrl.u32 %v208_v51, 16  ;;  %v405_v4 = vrot.slane %v403_v59, 5  ;;  %v209_v30 = vld [vmem:[%s3342_s0 + $0xf0] sm:$0xf]  ;;  %v2078_v36 = vld [vmem:[%s3342_s0 + $0x40] sm:$0xf] }
  0x28   : > { %v281_v2 = vrot.slane %v280_v57, 4  ;;  %v459_v3 = vunpack.c.l.b16 %v272_v62  ;;  %v417_v8 = vshll.u32 %v208_v51, 16  ;;  %v423_v9 = vshll.u32 %v225_v58, 16  ;;  %v2313_v40 = vld [vmem:[%s3342_s0 + $0x4c] sm:$0xf0] }
  0x29   : > { %v478_v6 = vpack.c.b16 %v468_v61, %v467_v52  ;;  %2101 = vmatmul.msk.bf16.gmra.mxu1 %vm481_vm1, %v2075_v50  ;;  %v416_v7 = vrot.slane %v414_v0, 4  ;;  %v406_v14 = vor.u32 %v405_v4, %v402_v63  ;;  %v288_v15 = vshrl.u32 %v199_v1, 16  ;;  %v210_v41 = vld [vmem:[%s3342_s0 + $0x100] sm:$0xf]  ;;  %v226_v44 = vld [vmem:[%s3342_s0 + $0xf4] sm:$0x1] }
  0x2a   : > { %v286_v11 = vsel %vm2477_vm4, %v281_v2, %v285_v54  ;;  %v291_v16 = vshll.u32 %v199_v1, 16  ;;  %v411_v18 = vrot.slane %v409_v60, 5  ;;  %v419_v19 = vrot.slane %v417_v8, 5  ;;  %v227_v48 = vld [vmem:[%s3342_s0 + $0x104] sm:$0x1] }
  0x2b   : > { %v460_v17 = vunpack.c.l.b16 %v286_v11  ;;  %v297_v21 = vshll.u32 %v216_v5, 16  ;;  %v407_v22 = vrot.slane %v406_v14, 4  ;;  %v290_v23 = vrot.slane %v288_v15, 4  ;;  %v201_v54 = vld [vmem:[%s3342_s0 + $0x60] sm:$0xf] }
  0x2c   : > { %v293_v24 = vrot.slane %v291_v16, 5  ;;  %v302_v25 = vshrl.u32 %v200_v10, 16  ;;  %v2095_v26 = vor.u32 %v2317_v13, %v2094_v12  ;;  %v420_v27 = vor.u32 %v419_v19, %v416_v7  ;;  %v202_v63 = vld [vmem:[%s3342_s0 + $0x70] sm:$0xf]  ;;  %v2318_v8 = vld [vmem:[%s3342_s0 + $0xfc] sm:$0xf0] }
  0x2d   : > { %v425_v28 = vrot.slane %v423_v9, 5  ;;  %v305_v29 = vshll.u32 %v200_v10, 16  ;;  %v474_v31 = vpack.c.b16 %v460_v17, %v459_v3  ;;  %v311_v35 = vshll.u32 %v217_v20, 16  ;;  %v2098_v7 = vld [vmem:[%s3342_s0 + $0xf0] sm:$0xf] }
  0x2e   : > { %2065 = vmatmul.msk.bf16.gmra.mxu2 %vm481_vm1, %v478_v6  ;;  %v294_v32 = vor.u32 %v293_v24, %v290_v23  ;;  %v304_v34 = vrot.slane %v302_v25, 4  ;;  %v412_v37 = vsel %vm2477_vm4, %v407_v22, %v411_v18  ;;  %v421_v38 = vrot.slane %v420_v27, 4  ;;  %v218_v9 = vld [vmem:[%s3342_s0 + $0x64] sm:$0x1]  ;;  %v219_v16 = vld [vmem:[%s3342_s0 + $0x74] sm:$0x1] }
  0x2f   : > { %v307_v39 = vrot.slane %v305_v29, 5  ;;  %v299_v43 = vrot.slane %v297_v21, 5  ;;  %v428_v45 = vshrl.u32 %v209_v30, 16  ;;  %v431_v49 = vshll.u32 %v209_v30, 16  ;;  %v2165_v18 = vld [vmem:[%s3342_s0 + $0x8] sm:$0xf] }
  0x30   : > { %v295_v42 = vrot.slane %v294_v32, 4  ;;  %v426_v46 = vsel %vm2477_vm4, %v421_v38, %v425_v28  ;;  %v469_v50 = vunpack.c.l.b16 %v412_v37  ;;  %v313_v51 = vrot.slane %v311_v35, 5  ;;  %v2167_v23 = vld [vmem:[%s3342_s0 + $0x18] sm:$0xf]  ;;  %v2166_v28 = vld [vmem:[%s3342_s0 + $0xc] sm:$0x1] }
  0x31   : > { %2106 = vmatmul.msk.bf16.gmra.mxu3 %vm481_vm1, %v2095_v26  ;;  %v308_v47 = vor.u32 %v307_v39, %v304_v34  ;;  %v430_v52 = vrot.slane %v428_v45, 4  ;;  %v442_v53 = vshrl.u32 %v210_v41, 16  ;;  %v2079_v56 = vor.u32 %v2313_v40, %v2078_v36  ;;  %v2168_v35 = vld [vmem:[%s3342_s0 + $0x1c] sm:$0x1]  ;;  %v2155_v33 = vld [vmem:[%s3342_s0 + $0xf8] sm:$0xf] }
  0x32   : > { %2061 = vmatmul.msk.bf16.gmra.mxu0 %vm481_vm1, %v474_v31  ;;  %v433_v57 = vrot.slane %v431_v49, 5  ;;  %v437_v58 = vshll.u32 %v226_v44, 16  ;;  %v470_v59 = vunpack.c.l.b16 %v426_v46  ;;  %v300_v60 = vsel %vm2477_vm4, %v295_v42, %v299_v43  ;;  %v2082_v46 = vld [vmem:[%s3342_s0 + $0x60] sm:$0xf] }
  0x33   : > { %v309_v55 = vrot.slane %v308_v47, 4  ;;  %v444_v61 = vrot.slane %v442_v53, 4  ;;  %v445_v62 = vshll.u32 %v210_v41, 16  ;;  %v451_v1 = vshll.u32 %v227_v48, 16  ;;  %v2263_v41 = vld [vmem:[%s3342_s0 + $0x10] sm:$0xf] }
  0x34   : > { %v434_v0 = vor.u32 %v433_v57, %v430_v52  ;;  %v316_v2 = vshrl.u32 %v201_v54, 16  ;;  %v319_v3 = vshll.u32 %v201_v54, 16  ;;  %v461_v6 = vunpack.c.l.b16 %v300_v60  ;;  %v2314_v47 = vld [vmem:[%s3342_s0 + $0x6c] sm:$0xf0]  ;;  %v2265_v52 = vld [vmem:[%s3342_s0 + $0x20] sm:$0xf] }
  0x35   : > { %v314_v4 = vsel %vm2477_vm4, %v309_v55, %v313_v51  ;;  %v447_v5 = vrot.slane %v445_v62, 5  ;;  %v330_v12 = vshrl.u32 %v202_v63, 16  ;;  %v479_v13 = vpack.c.b16 %v470_v59, %v469_v50 }
  0x36   : > { %v318_v10 = vrot.slane %v316_v2, 4  ;;  %v321_v11 = vrot.slane %v319_v3, 5  ;;  %v439_v14 = vrot.slane %v437_v58, 5  ;;  %v333_v17 = vshll.u32 %v202_v63, 16  ;;  %v2169_v2 = vld [vmem:[%s3342_s0 + $0x28] sm:$0xf] }
  0x37   : > { %v448_v15 = vor.u32 %v447_v5, %v444_v61  ;;  %v462_v19 = vunpack.c.l.b16 %v314_v4  ;;  %v435_v20 = vrot.slane %v434_v0, 4  ;;  %v453_v21 = vrot.slane %v451_v1, 5  ;;  %v2264_v61 = vld [vmem:[%s3342_s0 + $0x14] sm:$0x1] }
  0x38   : > { %v332_v22 = vrot.slane %v330_v12, 4  ;;  %v322_v25 = vor.u32 %v321_v11, %v318_v10  ;;  %v325_v26 = vshll.u32 %v218_v9, 16  ;;  %v335_v27 = vrot.slane %v333_v17, 5 }
  0x39   : > { %2102 = vmatmul.msk.bf16.gmra.mxu1 %vm481_vm1, %v2079_v56  ;;  %v449_v24 = vrot.slane %v448_v15, 4  ;;  %v859_v29 = vshrl.u32 %v2165_v18, 16  ;;  %v862_v30 = vshll.u32 %v2165_v18, 16  ;;  %v2099_v31 = vor.u32 %v2318_v8, %v2098_v7  ;;  %v2171_v8 = vld [vmem:[%s3342_s0 + $0x38] sm:$0xf] }
  0x3a   : > { %v336_v32 = vor.u32 %v335_v27, %v332_v22  ;;  %v339_v34 = vshll.u32 %v219_v16, 16  ;;  %v873_v36 = vshrl.u32 %v2167_v23, 16  ;;  %v440_v37 = vsel %vm2477_vm4, %v435_v20, %v439_v14 }
  0x3b   : > { %v861_v38 = vrot.slane %v859_v29, 4  ;;  %v864_v39 = vrot.slane %v862_v30, 5  ;;  %v868_v40 = vshll.u32 %v2166_v28, 16  ;;  %v475_v42 = vpack.c.b16 %v462_v19, %v461_v6  ;;  %v2266_v6 = vld [vmem:[%s3342_s0 + $0x24] sm:$0x1] }
  0x3c   : > { %v454_v43 = vsel %vm2477_vm4, %v449_v24, %v453_v21  ;;  %v323_v44 = vrot.slane %v322_v25, 4  ;;  %v327_v45 = vrot.slane %v325_v26, 5  ;;  %v875_v49 = vrot.slane %v873_v36, 4  ;;  %v2170_v28 = vld [vmem:[%s3342_s0 + $0x2c] sm:$0x1] }
  0x3d   : > { %v865_v48 = vor.u32 %v864_v39, %v861_v38  ;;  %v876_v50 = vshll.u32 %v2167_v23, 16  ;;  %v882_v51 = vshll.u32 %v2168_v35, 16  ;;  %v2663_v53 = vunpack.c.l.b16 %v440_v37  ;;  %v2172_v29 = vld [vmem:[%s3342_s0 + $0x3c] sm:$0x1]  ;;  %v2267_v35 = vld [vmem:[%s3342_s0 + $0x30] sm:$0xf] }
  0x3e   : > { %2066 = vmatmul.msk.bf16.gmra.mxu2 %vm481_vm1, %v479_v13  ;;  %v337_v54 = vrot.slane %v336_v32, 4  ;;  %v341_v55 = vrot.slane %v339_v34, 5  ;;  %v1384_v56 = vshrl.u32 %v2263_v41, 16  ;;  %v2083_v57 = vor.u32 %v2314_v47, %v2082_v46 }
  0x3f   : > { %v866_v58 = vrot.slane %v865_v48, 4  ;;  %v870_v59 = vrot.slane %v868_v40, 5  ;;  %v878_v60 = vrot.slane %v876_v50, 5  ;;  %v472_v62 = vunpack.c.l.b16 %v454_v43  ;;  %v2269_v40 = vld [vmem:[%s3342_s0 + $0x40] sm:$0xf] }
  0x40   : > { %v1386_v63 = vrot.slane %v1384_v56, 4  ;;  %v1387_v0 = vshll.u32 %v2263_v41, 16  ;;  %v1398_v1 = vshrl.u32 %v2265_v52, 16  ;;  %v328_v3 = vsel %vm2477_vm4, %v323_v44, %v327_v45  ;;  %v2268_v56 = vld [vmem:[%s3342_s0 + $0x34] sm:$0x1] }
  0x41   : > { %2107 = vmatmul.msk.bf16.gmra.mxu3 %vm481_vm1, %v2099_v31  ;;  %v879_v4 = vor.u32 %v878_v60, %v875_v49  ;;  %v884_v5 = vrot.slane %v882_v51, 5  ;;  %v1401_v7 = vshll.u32 %v2265_v52, 16  ;;  %v342_v9 = vsel %vm2477_vm4, %v337_v54, %v341_v55  ;;  %v2173_v60 = vld [vmem:[%s3342_s0 + $0x48] sm:$0xf] }
  0x42   : > { %2062 = vmatmul.msk.bf16.gmra.mxu0 %vm481_vm1, %v475_v42  ;;  %v1389_v10 = vrot.slane %v1387_v0, 5  ;;  %v1393_v11 = vshll.u32 %v2264_v61, 16  ;;  %v1400_v12 = vrot.slane %v1398_v1, 4  ;;  %v871_v13 = vsel %vm2477_vm4, %v866_v58, %v870_v59  ;;  %v2175_v1 = vld [vmem:[%s3342_s0 + $0x58] sm:$0xf] }
  0x43   : > { %v880_v14 = vrot.slane %v879_v4, 4  ;;  %v1403_v15 = vrot.slane %v1401_v7, 5  ;;  %v887_v16 = vshrl.u32 %v2169_v2, 16  ;;  %v1407_v18 = vshll.u32 %v2266_v6, 16 }
  0x44   : > { %v1390_v17 = vor.u32 %v1389_v10, %v1386_v63  ;;  %v890_v19 = vshll.u32 %v2169_v2, 16  ;;  %v901_v20 = vshrl.u32 %v2171_v8, 16  ;;  %v463_v21 = vunpack.c.l.b16 %v328_v3 }
  0x45   : > { %v464_v22 = vunpack.c.l.b16 %v342_v9  ;;  %v885_v23 = vsel %vm2477_vm4, %v880_v14, %v884_v5  ;;  %v1404_v24 = vor.u32 %v1403_v15, %v1400_v12  ;;  %v1084_v25 = vunpack.c.l.b16 %v871_v13  ;;  %v2127_v13 = vld [vmem:[%s3342_s0 + $0x8] sm:$0xf]  ;;  %v2319_v14 = vld [vmem:[%s3342_s0 + $0x14] sm:$0xf0] }
  0x46   : > { %v1085_v26 = vunpack.c.l.b16 %v885_v23  ;;  %v1395_v27 = vrot.slane %v1393_v11, 5  ;;  %v1391_v30 = vrot.slane %v1390_v17, 4  ;;  %v889_v31 = vrot.slane %v887_v16, 4 }
  0x47   : > { %v892_v32 = vrot.slane %v890_v19, 5  ;;  %v904_v34 = vshll.u32 %v2171_v8, 16  ;;  %v480_v36 = vpack.c.b16 %v472_v62, %v2663_v53  ;;  %v1405_v37 = vrot.slane %v1404_v24, 4  ;;  %v2176_v24 = vld [vmem:[%s3342_s0 + $0x5c] sm:$0x1] }
  0x48   : > { %v1409_v38 = vrot.slane %v1407_v18, 5  ;;  %v903_v39 = vrot.slane %v901_v20, 4  ;;  %v476_v41 = vpack.c.b16 %v464_v22, %v463_v21  ;;  %v896_v42 = vshll.u32 %v2170_v28, 16  ;;  %v2174_v21 = vld [vmem:[%s3342_s0 + $0x4c] sm:$0x1] }
  0x49   : > { %2103 = vmatmul.msk.bf16.gmra.mxu1 %vm481_vm1, %v2083_v57  ;;  %v906_v43 = vrot.slane %v904_v34, 5  ;;  %v1100_v44 = vpack.c.b16 %v1085_v26, %v1084_v25  ;;  %v910_v45 = vshll.u32 %v2172_v29, 16  ;;  %v1412_v46 = vshrl.u32 %v2267_v35, 16  ;;  %v2270_v57 = vld [vmem:[%s3342_s0 + $0x44] sm:$0x1] }
  0x4a   : > { %v1415_v47 = vshll.u32 %v2267_v35, 16  ;;  %v1396_v48 = vsel %vm2477_vm4, %v1391_v30, %v1395_v27  ;;  %v893_v49 = vor.u32 %v892_v32, %v889_v31  ;;  %v1426_v50 = vshrl.u32 %v2269_v40, 16  ;;  %v2271_v27 = vld [vmem:[%s3342_s0 + $0x50] sm:$0xf]  ;;  %v2273_v30 = vld [vmem:[%s3342_s0 + $0x60] sm:$0xf] }
  0x4b   : > { %v1429_v51 = vshll.u32 %v2269_v40, 16  ;;  %v1410_v52 = vsel %vm2477_vm4, %v1405_v37, %v1409_v38  ;;  %v907_v53 = vor.u32 %v906_v43, %v903_v39  ;;  %v1414_v54 = vrot.slane %v1412_v46, 4  ;;  %v2225_v35 = vld [vmem:[%s3342_s0 + $0x10] sm:$0xf] }
  0x4c   : > { %v1417_v55 = vrot.slane %v1415_v47, 5  ;;  %v1428_v58 = vrot.slane %v1426_v50, 4  ;;  %v1609_v61 = vunpack.c.l.b16 %v1396_v48  ;;  %v1610_v62 = vunpack.c.l.b16 %v1410_v52 }
  0x4d   : > { %v1431_v59 = vrot.slane %v1429_v51, 5  ;;  %v898_v63 = vrot.slane %v896_v42, 5  ;;  %v912_v0 = vrot.slane %v910_v45, 5  ;;  %v894_v2 = vrot.slane %v893_v49, 4 }
  0x4e   : > { %2067 = vmatmul.msk.bf16.gmra.mxu2 %vm481_vm1, %v480_v36  ;;  %v908_v3 = vrot.slane %v907_v53, 4  ;;  %v1418_v4 = vor.u32 %v1417_v55, %v1414_v54  ;;  %v1421_v5 = vshll.u32 %v2268_v56, 16  ;;  %v1435_v7 = vshll.u32 %v2270_v57, 16  ;;  %v2327_v36 = vld [vmem:[%s3342_s0 + $0x1c] sm:$0xf0] }
  0x4f   : > { %v1432_v6 = vor.u32 %v1431_v59, %v1428_v58  ;;  %v915_v8 = vshrl.u32 %v2173_v60, 16  ;;  %v918_v9 = vshll.u32 %v2173_v60, 16  ;;  %v929_v10 = vshrl.u32 %v2175_v1, 16  ;;  %v2272_v54 = vld [vmem:[%s3342_s0 + $0x54] sm:$0x1] }
  0x50   : > { %v932_v11 = vshll.u32 %v2175_v1, 16  ;;  %v1625_v12 = vpack.c.b16 %v1610_v62, %v1609_v61  ;;  %v899_v15 = vsel %vm2477_vm4, %v894_v2, %v898_v63  ;;  %v913_v16 = vsel %vm2477_vm4, %v908_v3, %v912_v0  ;;  %v2274_v58 = vld [vmem:[%s3342_s0 + $0x64] sm:$0x1]  ;;  %v2177_v59 = vld [vmem:[%s3342_s0 + $0x68] sm:$0xf] }
  0x51   : > { %2198 = vmatmul.msk.bf16.vlgmr.msrb.gmra.mxu3 %vm481_vm1, %v1100_v44  ;;  %v1419_v17 = vrot.slane %v1418_v4, 4  ;;  %v1423_v18 = vrot.slane %v1421_v5, 5  ;;  %v1433_v19 = vrot.slane %v1432_v6, 4  ;;  %v1437_v20 = vrot.slane %v1435_v7, 5  ;;  %v2179_v60 = vld [vmem:[%s3342_s0 + $0x78] sm:$0xf] }
  0x52   : > { %2063 = vmatmul.msk.bf16.gmra.mxu0 %vm481_vm1, %v476_v41  ;;  %v917_v22 = vrot.slane %v915_v8, 4  ;;  %v920_v23 = vrot.slane %v918_v9, 5  ;;  %v931_v25 = vrot.slane %v929_v10, 4  ;;  %v934_v26 = vrot.slane %v932_v11, 5  ;;  %v2131_v8 = vld [vmem:[%s3342_s0 + $0x28] sm:$0xf] }
  0x53   : > { %v1086_v28 = vunpack.c.l.b16 %v899_v15  ;;  %v1087_v29 = vunpack.c.l.b16 %v913_v16  ;;  %v2128_v31 = vor.u32 %v2319_v14, %v2127_v13  ;;  %v1424_v32 = vsel %vm2477_vm4, %v1419_v17, %v1423_v18  ;;  %v2320_v9 = vld [vmem:[%s3342_s0 + $0x34] sm:$0xf0]  ;;  %v2328_v17 = vld [vmem:[%s3342_s0 + $0x3c] sm:$0xf0] }
  0x54   : > { %v924_v34 = vshll.u32 %v2174_v21, 16  ;;  %v1438_v37 = vsel %vm2477_vm4, %v1433_v19, %v1437_v20  ;;  %v921_v38 = vor.u32 %v920_v23, %v917_v22  ;;  %v938_v39 = vshll.u32 %v2176_v24, 16  ;;  %v2178_v23 = vld [vmem:[%s3342_s0 + $0x6c] sm:$0x1]  ;;  %v2180_v24 = vld [vmem:[%s3342_s0 + $0x7c] sm:$0x1] }
  0x55   : > { %v1440_v40 = vshrl.u32 %v2271_v27, 16  ;;  %v935_v41 = vor.u32 %v934_v26, %v931_v25  ;;  %v1443_v42 = vshll.u32 %v2271_v27, 16  ;;  %v1454_v43 = vshrl.u32 %v2273_v30, 16  ;;  %v2275_v25 = vld [vmem:[%s3342_s0 + $0x70] sm:$0xf] }
  0x56   : > { %v1457_v44 = vshll.u32 %v2273_v30, 16  ;;  %v1101_v45 = vpack.c.b16 %v1087_v29, %v1086_v28  ;;  %v2226_v46 = vor.u32 %v2327_v36, %v2225_v35  ;;  %v1611_v47 = vunpack.c.l.b16 %v1424_v32  ;;  %v2277_v26 = vld [vmem:[%s3342_s0 + $0x80] sm:$0xf] }
  0x57   : > { %v926_v48 = vrot.slane %v924_v34, 5  ;;  %v1612_v49 = vunpack.c.l.b16 %v1438_v37  ;;  %v922_v50 = vrot.slane %v921_v38, 4  ;;  %v940_v51 = vrot.slane %v938_v39, 5 }
  0x58   : > { %v1442_v52 = vrot.slane %v1440_v40, 4  ;;  %v936_v53 = vrot.slane %v935_v41, 4  ;;  %v1445_v55 = vrot.slane %v1443_v42, 5  ;;  %v1456_v56 = vrot.slane %v1454_v43, 4  ;;  %v2181_v42 = vld [vmem:[%s3342_s0 + $0x98] sm:$0xf] }
  0x59   : > { %2296 = vmatmul.msk.bf16.vlgmr.msrb.gmra.mxu1 %vm481_vm1, %v1625_v12  ;;  %v1459_v57 = vrot.slane %v1457_v44, 5  ;;  %v1626_v61 = vpack.c.b16 %v1612_v49, %v1611_v47  ;;  %v927_v62 = vsel %vm2477_vm4, %v922_v50, %v926_v48  ;;  %v1449_v63 = vshll.u32 %v2272_v54, 16  ;;  %v2229_v12 = vld [vmem:[%s3342_s0 + $0x30] sm:$0xf]  ;;  %v2183_v43 = vld [vmem:[%s3342_s0 + $0xa8] sm:$0xf] }
  0x5a   : > { %v941_v0 = vsel %vm2477_vm4, %v936_v53, %v940_v51  ;;  %v1446_v1 = vor.u32 %v1445_v55, %v1442_v52  ;;  %v1463_v3 = vshll.u32 %v2274_v58, 16  ;;  %v943_v4 = vshrl.u32 %v2177_v59, 16  ;;  %v2276_v48 = vld [vmem:[%s3342_s0 + $0x74] sm:$0x1]  ;;  %v2278_v53 = vld [vmem:[%s3342_s0 + $0x84] sm:$0x1] }
  0x5b   : > { %v1460_v2 = vor.u32 %v1459_v57, %v1456_v56  ;;  %v946_v5 = vshll.u32 %v2177_v59, 16  ;;  %v957_v6 = vshrl.u32 %v2179_v60, 16  ;;  %v960_v7 = vshll.u32 %v2179_v60, 16 }
  0x5c   : > { %v1088_v10 = vunpack.c.l.b16 %v927_v62  ;;  %v1089_v11 = vunpack.c.l.b16 %v941_v0  ;;  %v1447_v13 = vrot.slane %v1446_v1, 4  ;;  %v1451_v14 = vrot.slane %v1449_v63, 5  ;;  %v2321_v62 = vld [vmem:[%s3342_s0 + $0x54] sm:$0xf0] }
  0x5d   : > { %v1461_v15 = vrot.slane %v1460_v2, 4  ;;  %v1465_v16 = vrot.slane %v1463_v3, 5  ;;  %v945_v18 = vrot.slane %v943_v4, 4  ;;  %v948_v19 = vrot.slane %v946_v5, 5 }
  0x5e   : > { %2157 = vmatmul.msk.bf16.vlgmr.msrb.gmra.mxu2 %vm481_vm1, %v2128_v31  ;;  %v959_v20 = vrot.slane %v957_v6, 4  ;;  %v962_v21 = vrot.slane %v960_v7, 5  ;;  %v2132_v22 = vor.u32 %v2320_v9, %v2131_v8  ;;  %v2230_v27 = vor.u32 %v2328_v17, %v2229_v12  ;;  %v2182_v7 = vld [vmem:[%s3342_s0 + $0x9c] sm:$0x1]  ;;  %v2184_v8 = vld [vmem:[%s3342_s0 + $0xac] sm:$0x1] }
  0x5f   : > { %v1102_v28 = vpack.c.b16 %v1089_v11, %v1088_v10  ;;  %v1452_v29 = vsel %vm2477_vm4, %v1447_v13, %v1451_v14  ;;  %v1466_v30 = vsel %vm2477_vm4, %v1461_v15, %v1465_v16  ;;  %v949_v31 = vor.u32 %v948_v19, %v945_v18  ;;  %v2279_v12 = vld [vmem:[%s3342_s0 + $0xa0] sm:$0xf]  ;;  %v2281_v13 = vld [vmem:[%s3342_s0 + $0xb0] sm:$0xf] }
  0x60   : > { %v952_v32 = vshll.u32 %v2178_v23, 16  ;;  %v963_v34 = vor.u32 %v962_v21, %v959_v20  ;;  %v966_v35 = vshll.u32 %v2180_v24, 16  ;;  %v1468_v36 = vshrl.u32 %v2275_v25, 16  ;;  %v2233_v18 = vld [vmem:[%s3342_s0 + $0x50] sm:$0xf] }
  0x61   : > { %2199 = vmatmul.msk.bf16.gmra.mxu3 %vm481_vm1, %v1101_v45  ;;  %v1471_v37 = vshll.u32 %v2275_v25, 16  ;;  %v1482_v38 = vshrl.u32 %v2277_v26, 16  ;;  %v1485_v39 = vshll.u32 %v2277_v26, 16  ;;  %v1613_v40 = vunpack.c.l.b16 %v1452_v29  ;;  %v2329_v19 = vld [vmem:[%s3342_s0 + $0x5c] sm:$0xf0] }
  0x62   : > { %2255 = vmatmul.msk.bf16.vlgmr.msrb.gmra.mxu0 %vm481_vm1, %v2226_v46  ;;  %v1614_v41 = vunpack.c.l.b16 %v1466_v30  ;;  %v950_v44 = vrot.slane %v949_v31, 4  ;;  %v954_v45 = vrot.slane %v952_v32, 5  ;;  %v964_v46 = vrot.slane %v963_v34, 4 }
  0x63   : > { %v968_v47 = vrot.slane %v966_v35, 5  ;;  %v1470_v49 = vrot.slane %v1468_v36, 4  ;;  %v1473_v50 = vrot.slane %v1471_v37, 5  ;;  %v1484_v51 = vrot.slane %v1482_v38, 4 }
  0x64   : > { %v1487_v52 = vrot.slane %v1485_v39, 5  ;;  %v971_v54 = vshrl.u32 %v2181_v42, 16  ;;  %v974_v55 = vshll.u32 %v2181_v42, 16  ;;  %v985_v56 = vshrl.u32 %v2183_v43, 16 }
  0x65   : > { %v988_v57 = vshll.u32 %v2183_v43, 16  ;;  %v1627_v58 = vpack.c.b16 %v1614_v41, %v1613_v40  ;;  %v955_v59 = vsel %vm2477_vm4, %v950_v44, %v954_v45  ;;  %v969_v60 = vsel %vm2477_vm4, %v964_v46, %v968_v47  ;;  %v2280_v43 = vld [vmem:[%s3342_s0 + $0xa4] sm:$0x1]  ;;  %v2282_v44 = vld [vmem:[%s3342_s0 + $0xb4] sm:$0x1] }
  0x66   : > { %v1474_v63 = vor.u32 %v1473_v50, %v1470_v49  ;;  %v1477_v0 = vshll.u32 %v2276_v48, 16  ;;  %v1488_v1 = vor.u32 %v1487_v52, %v1484_v51  ;;  %v1491_v2 = vshll.u32 %v2278_v53, 16  ;;  %v2185_v45 = vld [vmem:[%s3342_s0 + $0xb8] sm:$0xf]  ;;  %v2187_v48 = vld [vmem:[%s3342_s0 + $0xc8] sm:$0xf] }
  0x67   : > { %v973_v3 = vrot.slane %v971_v54, 4  ;;  %v976_v4 = vrot.slane %v974_v55, 5  ;;  %v987_v5 = vrot.slane %v985_v56, 4  ;;  %v990_v6 = vrot.slane %v988_v57, 5 }
  0x68   : > { %v1090_v10 = vunpack.c.l.b16 %v955_v59  ;;  %v1091_v11 = vunpack.c.l.b16 %v969_v60  ;;  %v1475_v14 = vrot.slane %v1474_v63, 4  ;;  %v1479_v15 = vrot.slane %v1477_v0, 5  ;;  %v2322_v59 = vld [vmem:[%s3342_s0 + $0x74] sm:$0xf0] }
  0x69   : > { %2297 = vmatmul.msk.bf16.gmra.mxu1 %vm481_vm1, %v1626_v61  ;;  %v2135_v61 = vld [vmem:[%s3342_s0 + $0x48] sm:$0xf]  ;;  %v1489_v16 = vrot.slane %v1488_v1, 4  ;;  %v1493_v17 = vrot.slane %v1491_v2, 5  ;;  %v977_v20 = vor.u32 %v976_v4, %v973_v3  ;;  %v980_v21 = vshll.u32 %v2182_v7, 16 }
  0x6a   : > { %v2136_v9 = vor.u32 %v2321_v62, %v2135_v61  ;;  %v994_v23 = vshll.u32 %v2184_v8, 16  ;;  %v1496_v24 = vshrl.u32 %v2279_v12, 16  ;;  %v1499_v25 = vshll.u32 %v2279_v12, 16  ;;  %v2237_v2 = vld [vmem:[%s3342_s0 + $0x70] sm:$0xf] }
  0x6b   : > { %v1510_v26 = vshrl.u32 %v2281_v13, 16  ;;  %v2234_v29 = vor.u32 %v2329_v19, %v2233_v18  ;;  %v1480_v30 = vsel %vm2477_vm4, %v1475_v14, %v1479_v15  ;;  %v1494_v31 = vsel %vm2477_vm4, %v1489_v16, %v1493_v17  ;;  %v2330_v3 = vld [vmem:[%s3342_s0 + $0x7c] sm:$0xf0]  ;;  %v2186_v7 = vld [vmem:[%s3342_s0 + $0xbc] sm:$0x1] }
  0x6c   : > { %v978_v32 = vrot.slane %v977_v20, 4  ;;  %v982_v34 = vrot.slane %v980_v21, 5  ;;  %v996_v36 = vrot.slane %v994_v23, 5  ;;  %v1498_v37 = vrot.slane %v1496_v24, 4  ;;  %v2285_v12 = vld [vmem:[%s3342_s0 + $0xd0] sm:$0xf] }
  0x6d   : > { %v1501_v38 = vrot.slane %v1499_v25, 5  ;;  %v1512_v39 = vrot.slane %v1510_v26, 4  ;;  %v1615_v41 = vunpack.c.l.b16 %v1480_v30  ;;  %v1616_v42 = vunpack.c.l.b16 %v1494_v31 }
  0x6e   : > { %2158 = vmatmul.msk.bf16.gmra.mxu2 %vm481_vm1, %v2132_v22  ;;  %v991_v22 = vor.u32 %v990_v6, %v987_v5  ;;  %v983_v46 = vsel %vm2477_vm4, %v978_v32, %v982_v34  ;;  %v1505_v50 = vshll.u32 %v2280_v43, 16  ;;  %v1519_v52 = vshll.u32 %v2282_v44, 16  ;;  %v2191_v32 = vld [vmem:[%s3342_s0 + $0xe8] sm:$0xf] }
  0x6f   : > { %v1502_v49 = vor.u32 %v1501_v38, %v1498_v37  ;;  %v1628_v53 = vpack.c.b16 %v1616_v42, %v1615_v41  ;;  %v999_v54 = vshrl.u32 %v2185_v45, 16  ;;  %v1002_v55 = vshll.u32 %v2185_v45, 16  ;;  %v2284_v38 = vld [vmem:[%s3342_s0 + $0xc4] sm:$0x1] }
  0x70   : > { %v992_v35 = vrot.slane %v991_v22, 4  ;;  %v1013_v56 = vshrl.u32 %v2187_v48, 16  ;;  %v1016_v57 = vshll.u32 %v2187_v48, 16  ;;  %v1092_v60 = vunpack.c.l.b16 %v983_v46 }
  0x71   : > { %2200 = vmatmul.msk.bf16.gmra.mxu3 %vm481_vm1, %v1102_v28  ;;  %v1103_v28 = vpack.c.b16 %v1091_v11, %v1090_v10  ;;  %v1503_v62 = vrot.slane %v1502_v49, 4  ;;  %v1507_v63 = vrot.slane %v1505_v50, 5  ;;  %v1521_v1 = vrot.slane %v1519_v52, 5  ;;  %v2283_v10 = vld [vmem:[%s3342_s0 + $0xc0] sm:$0xf] }
  0x72   : > { %2256 = vmatmul.msk.bf16.gmra.mxu0 %vm481_vm1, %v2230_v27  ;;  %v1513_v27 = vshll.u32 %v2281_v13, 16  ;;  %v997_v47 = vsel %vm2477_vm4, %v992_v35, %v996_v36  ;;  %v1001_v4 = vrot.slane %v999_v54, 4  ;;  %v1004_v5 = vrot.slane %v1002_v55, 5  ;;  %v2188_v11 = vld [vmem:[%s3342_s0 + $0xcc] sm:$0x1] }
  0x73   : > { %v1093_v61 = vunpack.c.l.b16 %v997_v47  ;;  %v1015_v8 = vrot.slane %v1013_v56, 4  ;;  %v2238_v13 = vor.u32 %v2330_v3, %v2237_v2  ;;  %v1508_v15 = vsel %vm2477_vm4, %v1503_v62, %v1507_v63  ;;  %v2143_v49 = vld [vmem:[%s3342_s0 + $0x98] sm:$0xf]  ;;  %v2323_v50 = vld [vmem:[%s3342_s0 + $0xa4] sm:$0xf0] }
  0x74   : > { %v1515_v40 = vrot.slane %v1513_v27, 5  ;;  %v1005_v17 = vor.u32 %v1004_v5, %v1001_v4  ;;  %v1008_v18 = vshll.u32 %v2186_v7, 16  ;;  %v1524_v19 = vshrl.u32 %v2283_v10, 16  ;;  %v2189_v27 = vld [vmem:[%s3342_s0 + $0xd8] sm:$0xf] }
  0x75   : > { %v1104_v14 = vpack.c.b16 %v1093_v61, %v1092_v60  ;;  %v1527_v20 = vshll.u32 %v2283_v10, 16  ;;  %v1022_v22 = vshll.u32 %v2188_v11, 16  ;;  %v1538_v23 = vshrl.u32 %v2285_v12, 16  ;;  %v2190_v55 = vld [vmem:[%s3342_s0 + $0xdc] sm:$0x1] }
  0x76   : > { %v1516_v51 = vor.u32 %v1515_v40, %v1512_v39  ;;  %v1541_v24 = vshll.u32 %v2285_v12, 16  ;;  %v1617_v25 = vunpack.c.l.b16 %v1508_v15  ;;  %v1526_v30 = vrot.slane %v1524_v19, 4  ;;  %v2286_v39 = vld [vmem:[%s3342_s0 + $0xd4] sm:$0x1]  ;;  %v2287_v61 = vld [vmem:[%s3342_s0 + $0xe0] sm:$0xf] }
  0x77   : > { %v1529_v31 = vrot.slane %v1527_v20, 5  ;;  %v1024_v35 = vrot.slane %v1022_v22, 5  ;;  %v1540_v36 = vrot.slane %v1538_v23, 4  ;;  %v1027_v40 = vshrl.u32 %v2189_v27, 16  ;;  %v2289_v2 = vld [vmem:[%s3342_s0 + $0xf0] sm:$0xf] }
  0x78   : > { %v1517_v0 = vrot.slane %v1516_v51, 4  ;;  %v1543_v37 = vrot.slane %v1541_v24, 5  ;;  %v1030_v41 = vshll.u32 %v2189_v27, 16  ;;  %v1041_v43 = vshrl.u32 %v2191_v32, 16  ;;  %v2241_v3 = vld [vmem:[%s3342_s0 + $0xa0] sm:$0xf] }
  0x79   : > { %2298 = vmatmul.msk.bf16.gmra.mxu1 %vm481_vm1, %v1627_v58  ;;  %v2139_v58 = vld [vmem:[%s3342_s0 + $0x68] sm:$0xf]  ;;  %v1044_v44 = vshll.u32 %v2191_v32, 16  ;;  %v1530_v47 = vor.u32 %v1529_v31, %v1526_v30  ;;  %v1533_v52 = vshll.u32 %v2284_v38, 16  ;;  %v1547_v54 = vshll.u32 %v2286_v39, 16 }
  0x7a   : > { %v2140_v6 = vor.u32 %v2322_v59, %v2139_v58  ;;  %v1522_v16 = vsel %vm2477_vm4, %v1517_v0, %v1521_v1  ;;  %v1029_v56 = vrot.slane %v1027_v40, 4  ;;  %v2192_v58 = vld [vmem:[%s3342_s0 + $0xec] sm:$0x1]  ;;  %v1043_v59 = vrot.slane %v1041_v43, 4  ;;  %v2193_v39 = vld [vmem:[%s3342_s0 + $0xf8] sm:$0xf] }
  0x7b   : > { %v1618_v26 = vunpack.c.l.b16 %v1522_v16  ;;  %v1046_v60 = vrot.slane %v1044_v44, 5  ;;  %v2144_v62 = vor.u32 %v2323_v50, %v2143_v49  ;;  %v1531_v1 = vrot.slane %v1530_v47, 4  ;;  %v2195_v43 = vld [vmem:[%s3342_s0 + $0x108] sm:$0xf] }
  0x7c   : > { %v1535_v4 = vrot.slane %v1533_v52, 5  ;;  %v1036_v7 = vshll.u32 %v2190_v55, 16  ;;  %v1050_v10 = vshll.u32 %v2192_v58, 16  ;;  %v1552_v11 = vshrl.u32 %v2287_v61, 16  ;;  %v2147_v55 = vld [vmem:[%s3342_s0 + $0xb8] sm:$0xf] }
  0x7d   : > { %v1629_v45 = vpack.c.b16 %v1618_v26, %v1617_v25  ;;  %v1555_v12 = vshll.u32 %v2287_v61, 16  ;;  %v1566_v15 = vshrl.u32 %v2289_v2, 16  ;;  %v1569_v16 = vshll.u32 %v2289_v2, 16 }
  0x7e   : > { %2159 = vmatmul.msk.bf16.gmra.mxu2 %vm481_vm1, %v2136_v9  ;;  %v1018_v9 = vrot.slane %v1016_v57, 5  ;;  %v1032_v57 = vrot.slane %v1030_v41, 5  ;;  %v1536_v20 = vsel %vm2477_vm4, %v1531_v1, %v1535_v4  ;;  %v1038_v22 = vrot.slane %v1036_v7, 5  ;;  %v2194_v1 = vld [vmem:[%s3342_s0 + $0xfc] sm:$0x1] }
  0x7f   : > { %v1052_v25 = vrot.slane %v1050_v10, 5  ;;  %v1554_v26 = vrot.slane %v1552_v11, 4  ;;  %v1557_v27 = vrot.slane %v1555_v12, 5  ;;  %v1568_v30 = vrot.slane %v1566_v15, 4  ;;  %v2245_v10 = vld [vmem:[%s3342_s0 + $0xc0] sm:$0xf] }
  0x80   : > { %v1019_v21 = vor.u32 %v1018_v9, %v1015_v8  ;;  %v2331_v8 = vld [vmem:[%s3342_s0 + $0xac] sm:$0xf0]  ;;  %v1033_v9 = vor.u32 %v1032_v57, %v1029_v56  ;;  %v1571_v31 = vrot.slane %v1569_v16, 5  ;;  %v1055_v49 = vshrl.u32 %v2193_v39, 16  ;;  %v2324_v56 = vld [vmem:[%s3342_s0 + $0xc4] sm:$0xf0] }
  0x81   : > { %2201 = vmatmul.msk.bf16.gmra.mxu3 %vm481_vm1, %v1103_v28  ;;  %v1006_v28 = vrot.slane %v1005_v17, 4  ;;  %v1558_v41 = vor.u32 %v1557_v27, %v1554_v26  ;;  %v1058_v50 = vshll.u32 %v2193_v39, 16  ;;  %v1069_v52 = vshrl.u32 %v2195_v43, 16  ;;  %v2332_v11 = vld [vmem:[%s3342_s0 + $0xcc] sm:$0xf0] }
  0x82   : > { %2257 = vmatmul.msk.bf16.gmra.mxu0 %vm481_vm1, %v2234_v29  ;;  %v1010_v29 = vrot.slane %v1008_v18, 5  ;;  %v1020_v34 = vrot.slane %v1019_v21, 4  ;;  %v2242_v18 = vor.u32 %v2331_v8, %v2241_v3  ;;  %v1034_v24 = vrot.slane %v1033_v9, 4  ;;  %v2291_v9 = vld [vmem:[%s3342_s0 + $0x100] sm:$0xf] }
  0x83   : > { %v1572_v47 = vor.u32 %v1571_v31, %v1568_v30  ;;  %v1057_v2 = vrot.slane %v1055_v49, 4  ;;  %v1060_v3 = vrot.slane %v1058_v50, 5  ;;  %v1071_v7 = vrot.slane %v1069_v52, 4  ;;  %v2293_v12 = vld [vmem:[%s3342_s0 + $0x110] sm:$0xf] }
  0x84   : > { %v1011_v46 = vsel %vm2477_vm4, %v1006_v28, %v1010_v29  ;;  %v1025_v51 = vsel %vm2477_vm4, %v1020_v34, %v1024_v35  ;;  %v1619_v34 = vunpack.c.l.b16 %v1536_v20  ;;  %v1039_v40 = vsel %vm2477_vm4, %v1034_v24, %v1038_v22  ;;  %v2325_v52 = vld [vmem:[%s3342_s0 + $0xe4] sm:$0xf0] }
  0x85   : > { %v1094_v63 = vunpack.c.l.b16 %v1011_v46  ;;  %v1095_v0 = vunpack.c.l.b16 %v1025_v51  ;;  %v1096_v57 = vunpack.c.l.b16 %v1039_v40  ;;  %v1580_v20 = vshrl.u32 %v2291_v9, 16 }
  0x86   : > { %v2246_v22 = vor.u32 %v2332_v11, %v2245_v10  ;;  %v1597_v26 = vshll.u32 %v2293_v12, 16 }
  0x87   : > { %v1105_v17 = vpack.c.b16 %v1095_v0, %v1094_v63 }
  0x89   : > { %2299 = vmatmul.msk.bf16.gmra.mxu1 %vm481_vm1, %v1628_v53  ;;  %v1544_v53 = vor.u32 %v1543_v37, %v1540_v36  ;;  %v2288_v36 = vld [vmem:[%s3342_s0 + $0xe4] sm:$0x1]  ;;  %v2290_v37 = vld [vmem:[%s3342_s0 + $0xf4] sm:$0x1] }
  0x8a   : > { %v1561_v46 = vshll.u32 %v2288_v36, 16 }
  0x8b   : > { %v1545_v5 = vrot.slane %v1544_v53, 4  ;;  %v1072_v53 = vshll.u32 %v2195_v43, 16 }
  0x8c   : > { %v1563_v61 = vrot.slane %v1561_v46, 5  ;;  %v2292_v46 = vld [vmem:[%s3342_s0 + $0x104] sm:$0x1] }
  0x8d   : > { %v1074_v8 = vrot.slane %v1072_v53, 5 }
  0x8e   : > { %2160 = vmatmul.msk.bf16.gmra.mxu2 %vm481_vm1, %v2140_v6  ;;  %v1549_v6 = vrot.slane %v1547_v54, 5 }
  0x8f   : > { %v1075_v24 = vor.u32 %v1074_v8, %v1071_v7  ;;  %v2333_v7 = vld [vmem:[%s3342_s0 + $0xec] sm:$0xf0] }
  0x90   : > { %v1550_v21 = vsel %vm2477_vm4, %v1545_v5, %v1549_v6  ;;  %v2148_v5 = vor.u32 %v2324_v56, %v2147_v55  ;;  %v2196_v6 = vld [vmem:[%s3342_s0 + $0x10c] sm:$0x1] }
  0x91   : > { %2202 = vmatmul.msk.bf16.gmra.mxu3 %vm481_vm1, %v1104_v14  ;;  %v1047_v14 = vor.u32 %v1046_v60, %v1043_v59  ;;  %v1620_v35 = vunpack.c.l.b16 %v1550_v21  ;;  %v1559_v59 = vrot.slane %v1558_v41, 4  ;;  %v1583_v21 = vshll.u32 %v2291_v9, 16 }
  0x92   : > { %2258 = vmatmul.msk.bf16.gmra.mxu0 %vm481_vm1, %v2238_v13  ;;  %v1076_v41 = vrot.slane %v1075_v24, 4  ;;  %v2326_v24 = vld [vmem:[%s3342_s0 + $0x104] sm:$0xf0] }
  0x93   : > { %v1048_v29 = vrot.slane %v1047_v14, 4  ;;  %v1564_v15 = vsel %vm2477_vm4, %v1559_v59, %v1563_v61  ;;  %v1585_v39 = vrot.slane %v1583_v21, 5 }
  0x94   : > { %v2912_v42 = vpop.f32.mrf.mxu3  ;;  %v1621_v30 = vunpack.c.l.b16 %v1564_v15 }
  0x96   : > { %v635_v48 = vpop.f32.mrf.mxu1 }
  0x99   : > { %2300 = vmatmul.msk.bf16.gmra.mxu1 %vm481_vm1, %v1629_v45  ;;  %v1053_v45 = vsel %vm2477_vm4, %v1048_v29, %v1052_v25  ;;  %v1594_v25 = vshrl.u32 %v2293_v12, 16 }
  0x9a   : > { %v1097_v58 = vunpack.c.l.b16 %v1053_v45  ;;  %v1599_v45 = vrot.slane %v1597_v26, 5 }
  0x9b   : > { %v1596_v43 = vrot.slane %v1594_v25, 4 }
  0x9c   : > { %v657_v13 = vpop.f32.mrf.mxu3  ;;  %v1106_v14 = vpack.c.b16 %v1097_v58, %v1096_v57 }
  0x9d   : > { %v1600_v55 = vor.u32 %v1599_v45, %v1596_v43 }
  0x9e   : > { %2161 = vmatmul.msk.bf16.gmra.mxu2 %vm481_vm1, %v2144_v62  ;;  %v637_v19 = vpop.f32.mrf.mxu1  ;;  %v1573_v62 = vrot.slane %v1572_v47, 4  ;;  %v2294_v47 = vld [vmem:[%s3342_s0 + $0x114] sm:$0x1] }
  0x9f   : > { %v519_v23 = vpop.f32.mrf.mxu0  ;;  %v1603_v56 = vshll.u32 %v2294_v47, 16 }
  0xa0   : > { %v2948_v28 = vadd.f32 %v635_v48, %v519_v23  ;;  %v1630_v48 = vpack.c.b16 %v1620_v35, %v1619_v34 }
  0xa1   : > { %v539_v32 = vpop.f32.mrf.mxu2  ;;  %2203 = vmatmul.msk.bf16.gmra.mxu3 %vm481_vm1, %v1105_v17  ;;  %v1064_v17 = vshll.u32 %v2194_v1, 16 }
  0xa2   : > { %2259 = vmatmul.msk.bf16.gmra.mxu0 %vm481_vm1, %v2242_v18  ;;  %v2959_v38 = vadd.f32 %v2912_v42, %v539_v32  ;;  %v1575_v42 = vshll.u32 %v2290_v37, 16  ;;  %v1061_v18 = vor.u32 %v1060_v3, %v1057_v2  ;;  %v1582_v37 = vrot.slane %v1580_v20, 4 }
  0xa3   : > { %v1066_v32 = vrot.slane %v1064_v17, 5  ;;  %v1601_v3 = vrot.slane %v1600_v55, 4 }
  0xa4   : > { %v660_v44 = vpop.f32.mrf.mxu3  ;;  %v1577_v63 = vrot.slane %v1575_v42, 5  ;;  %v1062_v35 = vrot.slane %v1061_v18, 4  ;;  %v1586_v50 = vor.u32 %v1585_v39, %v1582_v37 }
  0xa6   : > { %v640_v51 = vpop.f32.mrf.mxu1  ;;  %v1578_v16 = vsel %vm2477_vm4, %v1573_v62, %v1577_v63  ;;  %v1067_v49 = vsel %vm2477_vm4, %v1062_v35, %v1066_v32  ;;  %v2334_v32 = vld [vmem:[%s3342_s0 + $0x10c] sm:$0xf0] }
  0xa7   : > { %v521_v54 = vpop.f32.mrf.mxu0  ;;  %v1622_v31 = vunpack.c.l.b16 %v1578_v16  ;;  %v1098_v62 = vunpack.c.l.b16 %v1067_v49 }
  0xa8   : > { %v2977_v60 = vadd.f32 %v637_v19, %v521_v54  ;;  %v1078_v19 = vshll.u32 %v2196_v6, 16  ;;  %v1589_v54 = vshll.u32 %v2292_v46, 16  ;;  %v2249_v6 = vld [vmem:[%s3342_s0 + $0xe0] sm:$0xf] }
  0xa9   : > { %v541_v0 = vpop.f32.mrf.mxu2  ;;  %2301 = vmatmul.msk.bf16.gmra.mxu1 %vm481_vm1, %v1630_v48  ;;  %v1631_v48 = vpack.c.b16 %v1622_v31, %v1621_v30  ;;  %v2250_v10 = vor.u32 %v2333_v7, %v2249_v6  ;;  %v2156_v30 = vor.u32 %v2326_v24, %v2155_v33  ;;  %v2253_v31 = vld [vmem:[%s3342_s0 + $0x100] sm:$0xf] }
  0xaa   : > { %v2983_v4 = vadd.f32 %v657_v13, %v541_v0  ;;  %v1080_v36 = vrot.slane %v1078_v19, 5  ;;  %v1587_v0 = vrot.slane %v1586_v50, 4  ;;  %v1591_v2 = vrot.slane %v1589_v54, 5 }
  0xab   : > { %v2254_v35 = vor.u32 %v2334_v32, %v2253_v31 }
  0xac   : > { %v662_v13 = vpop.f32.mrf.mxu3  ;;  %v1081_v53 = vsel %vm2477_vm4, %v1076_v41, %v1080_v36  ;;  %v1592_v12 = vsel %vm2477_vm4, %v1587_v0, %v1591_v2 }
  0xad   : > { %v1099_v63 = vunpack.c.l.b16 %v1081_v53  ;;  %v1623_v17 = vunpack.c.l.b16 %v1592_v12 }
  0xae   : > { %2162 = vmatmul.msk.bf16.gmra.mxu2 %vm481_vm1, %v2148_v5  ;;  %v642_v23 = vpop.f32.mrf.mxu1  ;;  %v1605_v5 = vrot.slane %v1603_v56, 5 }
  0xaf   : > { %v524_v27 = vpop.f32.mrf.mxu0  ;;  %v1107_v9 = vpack.c.b16 %v1099_v63, %v1098_v62 }
  0xb0   : > { %v3005_v29 = vadd.f32 %v640_v51, %v524_v27 }
  0xb1   : > { %v544_v34 = vpop.f32.mrf.mxu2  ;;  %2204 = vmatmul.msk.bf16.gmra.mxu3 %vm481_vm1, %v1106_v14 }
  0xb2   : > { %2260 = vmatmul.msk.bf16.gmra.mxu0 %vm481_vm1, %v2246_v22  ;;  %v3009_v40 = vadd.f32 %v660_v44, %v544_v34  ;;  %v2151_v44 = vld [vmem:[%s3342_s0 + $0xd8] sm:$0xf] }
  0xb3   : > { %v2152_v61 = vor.u32 %v2325_v52, %v2151_v44 }
  0xb4   : > { %v665_v42 = vpop.f32.mrf.mxu3 }
  0xb6   : > { %v645_v51 = vpop.f32.mrf.mxu1 }
  0xb7   : > { %v526_v57 = vpop.f32.mrf.mxu0 }
  0xb8   : > { %v3027_v58 = vadd.f32 %v642_v23, %v526_v57 }
  0xb9   : > { %v546_v59 = vpop.f32.mrf.mxu2  ;;  %2302 = vmatmul.msk.bf16.gmra.mxu1 %vm481_vm1, %v1631_v48 }
  0xba   : > { %v3030_v1 = vadd.f32 %v662_v13, %v546_v59  ;;  %v1606_v13 = vsel %vm2477_vm4, %v1601_v3, %v1605_v5 }
  0xbb   : > { %v1624_v18 = vunpack.c.l.b16 %v1606_v13 }
  0xbc   : > { %v667_v8 = vpop.f32.mrf.mxu3 }
  0xbd   : > { %v1632_v21 = vpack.c.b16 %v1624_v18, %v1623_v17 }
  0xbe   : > { %2163 = vmatmul.msk.bf16.gmra.mxu2 %vm481_vm1, %v2152_v61  ;;  %v647_v11 = vpop.f32.mrf.mxu1 }
  0xbf   : > { %v529_v14 = vpop.f32.mrf.mxu0 }
  0xc0   : > { %v3043_v15 = vadd.f32 %v645_v51, %v529_v14 }
  0xc1   : > { %v549_v16 = vpop.f32.mrf.mxu2  ;;  %2205 = vmatmul.msk.bf16.gmra.mxu3 %vm481_vm1, %v1107_v9 }
  0xc2   : > { %2261 = vmatmul.msk.bf16.gmra.mxu0 %vm481_vm1, %v2250_v10  ;;  %v3047_v19 = vadd.f32 %v665_v42, %v549_v16 }
  0xc4   : > { %v670_v20 = vpop.f32.mrf.mxu3 }
  0xc6   : > { %v650_v22 = vpop.f32.mrf.mxu1 }
  0xc7   : > { %v531_v23 = vpop.f32.mrf.mxu0 }
  0xc8   : > { %v3055_v25 = vadd.f32 %v647_v11, %v531_v23 }
  0xc9   : > { %v551_v26 = vpop.f32.mrf.mxu2  ;;  %2303 = vmatmul.msk.bf16.gmra.mxu1 %vm481_vm1, %v1632_v21 }
  0xca   : > { %v3058_v27 = vadd.f32 %v667_v8, %v551_v26 }
  0xcc   : > { %v672_v34 = vpop.f32.mrf.mxu3 }
  0xce   : > { %2164 = vmatmul.msk.bf16.gmra.mxu2 %vm481_vm1, %v2156_v30  ;;  %v652_v36 = vpop.f32.mrf.mxu1 }
  0xcf   : > { %v534_v37 = vpop.f32.mrf.mxu0 }
  0xd0   : > { %v3067_v39 = vadd.f32 %v650_v22, %v534_v37 }
  0xd1   : > { %v554_v41 = vpop.f32.mrf.mxu2 }
  0xd2   : > { %2262 = vmatmul.msk.bf16.gmra.mxu0 %vm481_vm1, %v2254_v35  ;;  %v3070_v43 = vadd.f32 %v670_v20, %v554_v41 }
  0xd4   : > { %v1144_v45 = vpop.f32.mrf.mxu3 }
  0xd6   : > { %v1669_v46 = vpop.f32.mrf.mxu1 }
  0xd7   : > { %v536_v47 = vpop.f32.mrf.mxu0 }
  0xd8   : > { %v3072_v42 = vadd.f32 %v652_v36, %v536_v47 }
  0xd9   : > { %v556_v48 = vpop.f32.mrf.mxu2 }
  0xda   : > { %v3074_v49 = vadd.f32 %v672_v34, %v556_v48 }
  0xdc   : > { %v1146_v50 = vpop.f32.mrf.mxu3 }
  0xde   : > { %v1671_v51 = vpop.f32.mrf.mxu1 }
  0xdf   : > { %v1295_v44 = vpop.f32.mrf.mxu0 }
  0xe1   : > { %v770_v52 = vpop.f32.mrf.mxu2 }
  0xe2   : > { %v810_v53 = vadd.f32 %v770_v52, %v2948_v28 }
  0xe4   : > { %v1184_v54 = vadd.f32 %v1144_v45, %v810_v53  ;;  %v1149_v55 = vpop.f32.mrf.mxu3 }
  0xe6   : > { %v1335_v56 = vadd.f32 %v1295_v44, %v1184_v54  ;;  %v1674_v57 = vpop.f32.mrf.mxu1 }
  0xe7   : > { %v1297_v59 = vpop.f32.mrf.mxu0 }
  0xe8   : > { %v3078_v61 = vadd.f32 %v1669_v46, %v1335_v56 }
  0xe9   : > { %v772_v62 = vpop.f32.mrf.mxu2 }
  0xea   : > { %v811_v63 = vadd.f32 %v772_v62, %v2977_v60 }
  0xec   : > { %v1185_v0 = vadd.f32 %v1146_v50, %v811_v63  ;;  %v1151_v2 = vpop.f32.mrf.mxu3 }
  0xee   : > { %v1336_v3 = vadd.f32 %v1297_v59, %v1185_v0  ;;  %v1676_v5 = vpop.f32.mrf.mxu1 }
  0xef   : > { %v1300_v6 = vpop.f32.mrf.mxu0 }
  0xf0   : > { %v3081_v7 = vadd.f32 %v1671_v51, %v1336_v3 }
  0xf1   : > { %v775_v8 = vpop.f32.mrf.mxu2 }
  0xf2   : > { %v812_v28 = vadd.f32 %v775_v8, %v3005_v29 }
  0xf4   : > { %v1186_v9 = vadd.f32 %v1149_v55, %v812_v28  ;;  %v1154_v10 = vpop.f32.mrf.mxu3 }
  0xf6   : > { %v1337_v11 = vadd.f32 %v1300_v6, %v1186_v9  ;;  %v1679_v12 = vpop.f32.mrf.mxu1 }
  0xf7   : > { %v1302_v13 = vpop.f32.mrf.mxu0 }
  0xf8   : > { %v3084_v14 = vadd.f32 %v1674_v57, %v1337_v11 }
  0xf9   : > { %v777_v16 = vpop.f32.mrf.mxu2 }
  0xfa   : > { %v813_v60 = vadd.f32 %v777_v16, %v3027_v58 }
  0xfc   : > { %v1187_v17 = vadd.f32 %v1151_v2, %v813_v60  ;;  %v1156_v18 = vpop.f32.mrf.mxu3 }
  0xfe   : > { %v1338_v20 = vadd.f32 %v1302_v13, %v1187_v17  ;;  %v1681_v21 = vpop.f32.mrf.mxu1 }
  0xff   : > { %v1305_v22 = vpop.f32.mrf.mxu0 }
 0x100   : > { %v3087_v23 = vadd.f32 %v1676_v5, %v1338_v20 }
 0x101   : > { %v780_v33 = vpop.f32.mrf.mxu2 }
 0x102   : > { %v814_v29 = vadd.f32 %v780_v33, %v3043_v15 }
 0x104   : > { %v1188_v24 = vadd.f32 %v1154_v10, %v814_v29  ;;  %v1159_v26 = vpop.f32.mrf.mxu3 }
 0x106   : > { %v1339_v30 = vadd.f32 %v1305_v22, %v1188_v24  ;;  %v1684_v31 = vpop.f32.mrf.mxu1 }
 0x107   : > { %v1307_v32 = vpop.f32.mrf.mxu0 }
 0x108   : > { %v3090_v34 = vadd.f32 %v1679_v12, %v1339_v30 }
 0x109   : > { %v782_v35 = vpop.f32.mrf.mxu2 }
 0x10a   : > { %v815_v58 = vadd.f32 %v782_v35, %v3055_v25 }
 0x10c   : > { %v1189_v36 = vadd.f32 %v1156_v18, %v815_v58  ;;  %v1161_v37 = vpop.f32.mrf.mxu3 }
 0x10e   : > { %v1340_v41 = vadd.f32 %v1307_v32, %v1189_v36  ;;  %v1686_v46 = vpop.f32.mrf.mxu1 }
 0x10f   : > { %v1310_v45 = vpop.f32.mrf.mxu0 }
 0x110   : > { %v3093_v47 = vadd.f32 %v1681_v21, %v1340_v41 }
 0x111   : > { %v785_v48 = vpop.f32.mrf.mxu2 }
 0x112   : > { %v816_v15 = vadd.f32 %v785_v48, %v3067_v39 }
 0x114   : > { %v1190_v50 = vadd.f32 %v1159_v26, %v816_v15  ;;  %v1164_v51 = vpop.f32.mrf.mxu3 }
 0x116   : > { %v1341_v44 = vadd.f32 %v1310_v45, %v1190_v50  ;;  %v1689_v55 = vpop.f32.mrf.mxu1 }
 0x117   : > { %v1312_v52 = vpop.f32.mrf.mxu0 }
 0x118   : > { %v3096_v53 = vadd.f32 %v1684_v31, %v1341_v44 }
 0x119   : > { %v787_v54 = vpop.f32.mrf.mxu2 }
 0x11a   : > { %v817_v25 = vadd.f32 %v787_v54, %v3072_v42 }
 0x11c   : > { %v1191_v56 = vadd.f32 %v1161_v37, %v817_v25  ;;  %v1166_v62 = vpop.f32.mrf.mxu3 }
 0x11e   : > { %v1342_v57 = vadd.f32 %v1312_v52, %v1191_v56  ;;  %v1691_v39 = vpop.f32.mrf.mxu1 }
 0x11f   : > { %v1315_v59 = vpop.f32.mrf.mxu0 }
 0x120   : > { %v3099_v63 = vadd.f32 %v1686_v46, %v1342_v57 }
 0x121   : > { %v790_v0 = vpop.f32.mrf.mxu2 }
 0x122   : > { %v818_v2 = vadd.f32 %v790_v0, %v2959_v38 }
 0x124   : > { %v1192_v3 = vadd.f32 %v1164_v51, %v818_v2  ;;  %v1169_v9 = vpop.f32.mrf.mxu3 }
 0x126   : > { %v1343_v5 = vadd.f32 %v1315_v59, %v1192_v3  ;;  %v1694_v11 = vpop.f32.mrf.mxu1 }
 0x127   : > { %v1317_v6 = vpop.f32.mrf.mxu0 }
 0x128   : > { %v3102_v8 = vadd.f32 %v1689_v55, %v1343_v5 }
 0x129   : > { %v792_v28 = vpop.f32.mrf.mxu2 }
 0x12a   : > { %v819_v10 = vadd.f32 %v792_v28, %v2983_v4 }
 0x12c   : > { %v1193_v42 = vadd.f32 %v1166_v62, %v819_v10  ;;  %v1171_v38 = vpop.f32.mrf.mxu3 }
 0x12e   : > { %v1344_v12 = vadd.f32 %v1317_v6, %v1193_v42  ;;  %v1696_v22 = vpop.f32.mrf.mxu1 }
 0x12f   : > { %v1320_v13 = vpop.f32.mrf.mxu0 }
 0x130   : > { %v3105_v16 = vadd.f32 %v1691_v39, %v1344_v12 }
 0x131   : > { %v795_v60 = vpop.f32.mrf.mxu2 }
 0x132   : > { %v820_v17 = vadd.f32 %v795_v60, %v3009_v40 }
 0x134   : > { %v1194_v18 = vadd.f32 %v1169_v9, %v820_v17  ;;  %v1174_v26 = vpop.f32.mrf.mxu3 }
 0x136   : > { %v1345_v20 = vadd.f32 %v1320_v13, %v1194_v18  ;;  %v1699_v35 = vpop.f32.mrf.mxu1 }
 0x137   : > { %v1322_v21 = vpop.f32.mrf.mxu0 }
 0x138   : > { %v3108_v33 = vadd.f32 %v1694_v11, %v1345_v20 }
 0x139   : > { %v797_v29 = vpop.f32.mrf.mxu2 }
 0x13a   : > { %v821_v24 = vadd.f32 %v797_v29, %v3030_v1 }
 0x13c   : > { %v1195_v4 = vadd.f32 %v1171_v38, %v821_v24  ;;  %v1176_v41 = vpop.f32.mrf.mxu3 }
 0x13e   : > { %v1346_v30 = vadd.f32 %v1322_v21, %v1195_v4  ;;  %v1701_v1 = vpop.f32.mrf.mxu1 }
 0x13f   : > { %v1325_v31 = vpop.f32.mrf.mxu0 }
 0x140   : > { %v3111_v32 = vadd.f32 %v1696_v22, %v1346_v30 }
 0x141   : > { %v800_v58 = vpop.f32.mrf.mxu2 }
 0x142   : > { %v822_v40 = vadd.f32 %v800_v58, %v3047_v19 }
 0x144   : > { %v1196_v36 = vadd.f32 %v1174_v26, %v822_v40  ;;  %v1179_v52 = vpop.f32.mrf.mxu3 }
 0x146   : > { %v1347_v37 = vadd.f32 %v1325_v31, %v1196_v36  ;;  %v1704_v56 = vpop.f32.mrf.mxu1 }
 0x147   : > { %v1327_v46 = vpop.f32.mrf.mxu0 }
 0x148   : > { %v3114_v45 = vadd.f32 %v1699_v35, %v1347_v37 }
 0x149   : > { %v802_v48 = vpop.f32.mrf.mxu2 }
 0x14a   : > { %v823_v15 = vadd.f32 %v802_v48, %v3058_v27 }
 0x14c   : > { %v1197_v50 = vadd.f32 %v1176_v41, %v823_v15  ;;  %v1181_v2 = vpop.f32.mrf.mxu3 }
 0x14e   : > { %v1348_v51 = vadd.f32 %v1327_v46, %v1197_v50  ;;  %v1706_v5 = vpop.f32.mrf.mxu1 }
 0x14f   : > { %v1330_v25 = vpop.f32.mrf.mxu0 }
 0x150   : > { %v3117_v44 = vadd.f32 %v1701_v1, %v1348_v51 }
 0x151   : > { %v805_v54 = vpop.f32.mrf.mxu2 }
 0x152   : > { %v824_v55 = vadd.f32 %v805_v54, %v3070_v43  ;;  %v2391_v43 = vmov (%p1725_p4), 0.0  }
 0x153   : > { %1732 = vst.msk [vmem:[#allocation2] sm:$0x3] (%p1725_p4), %vm1731_vm5, %v2391_v43 }
 0x154   : > { %v1198_v19 = vadd.f32 %v1179_v52, %v824_v55 }
 0x156   : > { %v1349_v57 = vadd.f32 %v1330_v25, %v1198_v19 }
 0x157   : > { %v1332_v39 = vpop.f32.mrf.mxu0 }
 0x158   : > { %v3120_v59 = vadd.f32 %v1704_v56, %v1349_v57 }
 0x159   : > { %v807_v62 = vpop.f32.mrf.mxu2 }
 0x15a   : > { %v825_v0 = vadd.f32 %v807_v62, %v3074_v49 }
 0x15c   : > { %v1199_v27 = vadd.f32 %v1181_v2, %v825_v0  ;;  %1730 = sbr.rel (!%p1725_p4) target bundleno = 353 (0x161), region = 36 }
 0x15e   : > { %v1350_v3 = vadd.f32 %v1332_v39, %v1199_v27 }
 0x160   : > { %v3123_v6 = vadd.f32 %v1706_v5, %v1350_v3 }
 0x161 PF: > { %p2305_p5 = scmp.ne.s32.totalorder %s2381_s12, 0 }
 0x163   : > { %1735 = sbr.rel (%p2305_p5) target bundleno = 409 (0x199), region = 40 }
 0x168   : > { %vm1737_vm6 = vcmask 130048   ;;  %v1779_v13 = vmul.f32 %v3078_v61, %v3078_v61  ;;  %v1780_v60 = vmul.f32 %v3081_v7, %v3081_v7  ;;  %v1781_v17 = vmul.f32 %v3084_v14, %v3084_v14 }
 0x169   : > { %v1738_v49 = vsel %vm1737_vm6, %v3078_v61, 0.0  ;;  %v1739_v28 = vsel %vm1737_vm6, %v3081_v7, 0.0  ;;  %v1741_v9 = vsel %vm1737_vm6, %v3084_v14, 0.0  ;;  %v1743_v42 = vsel %vm1737_vm6, %v3087_v23, 0.0 }
 0x16a   : > { %v1740_v10 = vadd.f32 %v1739_v28, %v1738_v49  ;;  %v1745_v12 = vsel %vm1737_vm6, %v3090_v34, 0.0  ;;  %v1747_v18 = vsel %vm1737_vm6, %v3093_v47, 0.0  ;;  %v1782_v20 = vmul.f32 %v3087_v23, %v3087_v23 }
 0x16b   : > { %v1749_v22 = vsel %vm1737_vm6, %v3096_v53, 0.0  ;;  %v1783_v29 = vmul.f32 %v3090_v34, %v3090_v34  ;;  %v1795_v24 = vsel %vm1737_vm6, %v1779_v13, 0.0  ;;  %v1796_v4 = vsel %vm1737_vm6, %v1780_v60, 0.0 }
 0x16c   : > { %v1742_v11 = vadd.f32 %v1741_v9, %v1740_v10  ;;  %v1798_v26 = vsel %vm1737_vm6, %v1781_v17, 0.0  ;;  %v1797_v31 = vadd.f32 %v1796_v4, %v1795_v24  ;;  %v1751_v35 = vsel %vm1737_vm6, %v3099_v63, 0.0 }
 0x16d   : > { %v1784_v58 = vmul.f32 %v3093_v47, %v3093_v47  ;;  %v1800_v40 = vsel %vm1737_vm6, %v1782_v20, 0.0  ;;  %v1753_v41 = vsel %vm1737_vm6, %v3102_v8, 0.0  ;;  %v1785_v46 = vmul.f32 %v3096_v53, %v3096_v53 }
 0x16e   : > { %v1744_v38 = vadd.f32 %v1743_v42, %v1742_v11  ;;  %v1799_v37 = vadd.f32 %v1798_v26, %v1797_v31  ;;  %v1802_v48 = vsel %vm1737_vm6, %v1783_v29, 0.0  ;;  %v1755_v50 = vsel %vm1737_vm6, %v3105_v16, 0.0 }
 0x16f   : > { %v1786_v51 = vmul.f32 %v3099_v63, %v3099_v63  ;;  %v1804_v52 = vsel %vm1737_vm6, %v1784_v58, 0.0  ;;  %v1757_v25 = vsel %vm1737_vm6, %v3108_v33, 0.0  ;;  %v1787_v19 = vmul.f32 %v3102_v8, %v3102_v8 }
 0x170   : > { %v1746_v21 = vadd.f32 %v1745_v12, %v1744_v38  ;;  %v1801_v1 = vadd.f32 %v1800_v40, %v1799_v37  ;;  %v1806_v56 = vsel %vm1737_vm6, %v1785_v46, 0.0  ;;  %v1759_v0 = vsel %vm1737_vm6, %v3111_v32, 0.0 }
 0x171   : > { %v1788_v2 = vmul.f32 %v3105_v16, %v3105_v16  ;;  %v1808_v27 = vsel %vm1737_vm6, %v1786_v51, 0.0  ;;  %v1761_v5 = vsel %vm1737_vm6, %v3114_v45, 0.0  ;;  %v1789_v43 = vmul.f32 %v3108_v33, %v3108_v33 }
 0x172   : > { %v1748_v30 = vadd.f32 %v1747_v18, %v1746_v21  ;;  %v1803_v55 = vadd.f32 %v1802_v48, %v1801_v1  ;;  %v1810_v49 = vsel %vm1737_vm6, %v1787_v19, 0.0  ;;  %v1763_v10 = vsel %vm1737_vm6, %v3117_v44, 0.0 }
 0x173   : > { %v1790_v42 = vmul.f32 %v3111_v32, %v3111_v32  ;;  %v1812_v11 = vsel %vm1737_vm6, %v1788_v2, 0.0  ;;  %v1765_v60 = vsel %vm1737_vm6, %v3120_v59, 0.0  ;;  %v1791_v17 = vmul.f32 %v3114_v45, %v3114_v45 }
 0x174   : > { %v1750_v36 = vadd.f32 %v1749_v22, %v1748_v30  ;;  %v1805_v62 = vadd.f32 %v1804_v52, %v1803_v55  ;;  %v1814_v38 = vsel %vm1737_vm6, %v1789_v43, 0.0  ;;  %v1767_v21 = vsel %vm1737_vm6, %v3123_v6, 0.0 }
 0x175   : > { %v1792_v22 = vmul.f32 %v3117_v44, %v3117_v44  ;;  %v1816_v29 = vsel %vm1737_vm6, %v1790_v42, 0.0  ;;  %v1793_v26 = vmul.f32 %v3120_v59, %v3120_v59  ;;  %v1818_v30 = vsel %vm1737_vm6, %v1791_v17, 0.0 }
 0x176   : > { %v1752_v15 = vadd.f32 %v1751_v35, %v1750_v36  ;;  %v1807_v3 = vadd.f32 %v1806_v56, %v1805_v62  ;;  %v1794_v58 = vmul.f32 %v3123_v6, %v3123_v6  ;;  %vm1776_vm7 = vcmask 122880  }
 0x177   : > { %v1820_v40 = vsel %vm1737_vm6, %v1792_v22, 0.0 }
 0x178   : > { %v1754_v54 = vadd.f32 %v1753_v41, %v1752_v15  ;;  %v1809_v9 = vadd.f32 %v1808_v27, %v1807_v3  ;;  %v1822_v41 = vsel %vm1737_vm6, %v1793_v26, 0.0  ;;  %v1824_v15 = vsel %vm1737_vm6, %v1794_v58, 0.0  ;;  %v1778_v27 = vld [vmem:[#allocation2 + $0x1] sm:$0x1] }
 0x17a   : > { %v1756_v57 = vadd.f32 %v1755_v50, %v1754_v54  ;;  %v1811_v13 = vadd.f32 %v1810_v49, %v1809_v9 }
 0x17c   : > { %v1758_v39 = vadd.f32 %v1757_v25, %v1756_v57  ;;  %v1813_v20 = vadd.f32 %v1812_v11, %v1811_v13  ;;  %v1736_v25 = vld [vmem:[#allocation2] sm:$0x1] }
 0x17e   : > { %v1760_v28 = vadd.f32 %v1759_v0, %v1758_v39  ;;  %v1815_v4 = vadd.f32 %v1814_v38, %v1813_v20 }
 0x180   : > { %v1762_v12 = vadd.f32 %v1761_v5, %v1760_v28  ;;  %v1817_v35 = vadd.f32 %v1816_v29, %v1815_v4 }
 0x182   : > { %v1764_v18 = vadd.f32 %v1763_v10, %v1762_v12  ;;  %v1819_v37 = vadd.f32 %v1818_v30, %v1817_v35 }
 0x184   : > { %v1766_v24 = vadd.f32 %v1765_v60, %v1764_v18  ;;  %v1821_v48 = vadd.f32 %v1820_v40, %v1819_v37 }
 0x186   : > { %v1768_v31 = vadd.f32 %v1767_v21, %v1766_v24  ;;  %v1823_v50 = vadd.f32 %v1822_v41, %v1821_v48 }
 0x188   : > { %v1769_v36 = vrot.slane %v1768_v31, 4  ;;  %v1825_v52 = vadd.f32 %v1824_v15, %v1823_v50 }
 0x18a   : > { %v1770_v46 = vadd.f32 %v1769_v36, %v1768_v31  ;;  %v1826_v55 = vrot.slane %v1825_v52, 4 }
 0x18c   : > { %v1771_v1 = vrot.slane %v1770_v46, 2  ;;  %v1827_v56 = vadd.f32 %v1826_v55, %v1825_v52 }
 0x18e   : > { %v1772_v51 = vadd.f32 %v1771_v1, %v1770_v46  ;;  %v1828_v62 = vrot.slane %v1827_v56, 2 }
 0x190   : > { %v1773_v54 = vrot.slane %v1772_v51, 1  ;;  %v1829_v0 = vadd.f32 %v1828_v62, %v1827_v56 }
 0x192   : > { %v1774_v19 = vadd.f32 %v1773_v54, %v1772_v51  ;;  %v1830_v2 = vrot.slane %v1829_v0, 1 }
 0x194   : > { %v1775_v57 = vadd.f32 %v1774_v19, %v1736_v25  ;;  %v1831_v39 = vadd.f32 %v1830_v2, %v1829_v0 }
 0x196   : > { %1777 = vst.msk [vmem:[#allocation2] sm:$0x1] %vm1776_vm7, %v1775_v57  ;;  %v1832_v3 = vadd.f32 %v1831_v39, %v1778_v27 }
 0x198   : > { %1833 = vst.msk [vmem:[#allocation2 + $0x1] sm:$0x1] %vm1776_vm7, %v1832_v3 }
 0x199 PF: > { %1835 = sbr.rel (!%p1725_p4) target bundleno = 449 (0x1c1), region = 44  ;;  %v1843_v18 = vld [vmem:[%s3344_s2] sm:$0x1] (%p1725_p4)  ;;  %vm1856_vm11 = vcmask (%p1725_p4), 122880   ;;  %v1858_v29 = vld [vmem:[%s3344_s2 + $0x1] sm:$0x1] (%p1725_p4) }
 0x19d   : > { %v1836_v5 = vld [vmem:[#allocation2] sm:$0x1] (%p1725_p4) }
 0x19e   : > { %v1837_v49 = vmul.f32 0.0078125, %v1836_v5 }
 0x19f   : > { %v1838_v43 = vld [vmem:[#allocation2 + $0x1] sm:$0x1] }
 0x1a0   : > { %v1839_v28 = vmul.f32 0.0078125, %v1838_v43  ;;  %v1840_v9 = vmul.f32 %v1837_v49, %v1837_v49 }
 0x1a2   : > { %v1841_v10 = vsub.f32 %v1839_v28, %v1840_v9 }
 0x1a4   : > { %v1842_v42 = vmax.f32 %v1841_v10, 0.0 }
 0x1a6   : > { %v1844_v11 = vadd.f32 1e-05, %v1842_v42 }
 0x1a8   : > { %2363 = vrsqrt.f32 %v1844_v11  ;;  %vm1851_vm8 = vweird.f32 %v1844_v11 }
 0x1ae   : > { %v2364_v12 = vpop.eup %2363 }
 0x1af   : > { %v1846_v13 = vmul.f32 %v2364_v12, %v1844_v11  ;;  %vm1852_vm9 = vweird.f32 %v2364_v12 }
 0x1b0   : > { %vm1853_vm10 = vmor %vm1851_vm8, %vm1852_vm9 }
 0x1b1   : > { %v1847_v60 = vmul.f32 %v2364_v12, %v1846_v13 }
 0x1b3   : > { %v1848_v17 = vmul.f32 0.5, %v1847_v60 }
 0x1b5   : > { %v1849_v38 = vsub.f32 1.5, %v1848_v17 }
 0x1b7   : > { %v1850_v20 = vmul.f32 %v2364_v12, %v1849_v38 }
 0x1b9   : > { %v1854_v21 = vsel %vm1853_vm10, %v2364_v12, %v1850_v20 }
 0x1ba   : > { %v1855_v22 = vmul.f32 %v1854_v21, %v1843_v18 }
 0x1bc   : > { %1857 = vst.msk [vmem:[#allocation3] sm:$0x1] %vm1856_vm11, %v1855_v22  ;;  %v1859_v24 = vmul.f32 %v1855_v22, %v1837_v49 }
 0x1be   : > { %v1860_v4 = vsub.f32 %v1858_v29, %v1859_v24 }
 0x1c0   : > { %1861 = vst.msk [vmem:[#allocation3 + $0x1] sm:$0x1] %vm1856_vm11, %v1860_v4 }
 0x1c1 PF: > { %p2306_p6 = scmp.ne.s32.totalorder %s2381_s12, 1 }
 0x1c3   : > { %1865 = sbr.rel (%p2306_p6) target bundleno = 487 (0x1e7), region = 48 }
 0x1c8   : > { %v3217_v26 = vld [vmem:[#allocation3] ss:$0 sm:$0xff]  ;;  %v3219_v30 = vld [vmem:[#allocation3 + $0x1] ss:$0 sm:$0xff]  ;;  %vm1966_vm12 = vcmask 125952  }
 0x1c9   : > { %v1868_v31 = vmul.f32 %v3217_v26, %v3078_v61  ;;  %v1869_v35 = vmul.f32 %v3217_v26, %v3081_v7  ;;  %v1870_v58 = vmul.f32 %v3217_v26, %v3084_v14  ;;  %v1871_v40 = vmul.f32 %v3217_v26, %v3087_v23 }
 0x1ca   : > { %v1872_v36 = vmul.f32 %v3217_v26, %v3090_v34  ;;  %v1873_v37 = vmul.f32 %v3217_v26, %v3093_v47  ;;  %v1874_v41 = vmul.f32 %v3217_v26, %v3096_v53  ;;  %v1875_v61 = vmul.f32 %v3217_v26, %v3099_v63 }
 0x1cb   : > { %v1886_v7 = vadd.f32 %v3219_v30, %v1868_v31  ;;  %v1887_v46 = vadd.f32 %v3219_v30, %v1869_v35  ;;  %v1888_v14 = vadd.f32 %v3219_v30, %v1870_v58  ;;  %v1889_v23 = vadd.f32 %v3219_v30, %v1871_v40 }
 0x1cc   : > { %v1890_v48 = vadd.f32 %v3219_v30, %v1872_v36  ;;  %v1891_v34 = vadd.f32 %v3219_v30, %v1873_v37  ;;  %v1892_v47 = vadd.f32 %v3219_v30, %v1874_v41  ;;  %v1893_v15 = vadd.f32 %v3219_v30, %v1875_v61 }
 0x1cd   : > { %vm1902_vm13 = vcmp.ge.f32.partialorder %v1886_v7, 0.0  ;;  %v1918_v53 = vmul.f32 0.01, %v1886_v7  ;;  %vm1903_vm14 = vcmp.ge.f32.partialorder %v1887_v46, 0.0  ;;  %v1919_v63 = vmul.f32 0.01, %v1887_v46 }
 0x1ce   : > { %vm1904_vm15 = vcmp.ge.f32.partialorder %v1888_v14, 0.0  ;;  %v1920_v1 = vmul.f32 0.01, %v1888_v14  ;;  %vm1905_vm0 = vcmp.ge.f32.partialorder %v1889_v23, 0.0  ;;  %v1921_v50 = vmul.f32 0.01, %v1889_v23 }
 0x1cf   : > { %v1934_v51 = vsel %vm1902_vm13, %v1886_v7, %v1918_v53  ;;  %v1935_v52 = vsel %vm1903_vm14, %v1887_v46, %v1919_v63  ;;  %vm1906_vm1 = vcmp.ge.f32.partialorder %v1890_v48, 0.0  ;;  %v1922_v54 = vmul.f32 0.01, %v1890_v48 }
 0x1d0   : > { %v1950_v55 = vpack.c.bf16 %v1934_v51, %v1934_v51  ;;  %v1951_v25 = vpack.c.bf16 %v1935_v52, %v1935_v52  ;;  %v1936_v19 = vsel %vm1904_vm15, %v1888_v14, %v1920_v1  ;;  %v1937_v56 = vsel %vm1905_vm0, %v1889_v23, %v1921_v50 }
 0x1d1   : > { %v1952_v57 = vpack.c.bf16 %v1936_v19, %v1936_v19  ;;  %v1953_v62 = vpack.c.bf16 %v1937_v56, %v1937_v56  ;;  %v1938_v0 = vsel %vm1906_vm1, %v1890_v48, %v1922_v54  ;;  %vm1907_vm2 = vcmp.ge.f32.partialorder %v1891_v34, 0.0 }
 0x1d2   : > { %1967 = vst.msk [vmem:[%s3345_s3] sm:$0xf] %vm1966_vm12, %v1950_v55  ;;  %v1954_v2 = vpack.c.bf16 %v1938_v0, %v1938_v0  ;;  %v1923_v27 = vmul.f32 0.01, %v1891_v34  ;;  %vm1908_vm3 = vcmp.ge.f32.partialorder %v1892_v47, 0.0  ;;  %vm1909_vm4 = vcmp.ge.f32.partialorder %v1893_v15, 0.0 }
 0x1d3   : > { %1968 = vst.msk [vmem:[%s3345_s3 + $0x4] sm:$0xf] %vm1966_vm12, %v1951_v25  ;;  %v1924_v39 = vmul.f32 0.01, %v1892_v47  ;;  %v1925_v3 = vmul.f32 0.01, %v1893_v15  ;;  %v1876_v5 = vmul.f32 %v3217_v26, %v3102_v8  ;;  %v1877_v43 = vmul.f32 %v3217_v26, %v3105_v16 }
 0x1d4   : > { %1969 = vst.msk [vmem:[%s3345_s3 + $0x8] sm:$0xf] %vm1966_vm12, %v1952_v57  ;;  %v1939_v49 = vsel %vm1907_vm2, %v1891_v34, %v1923_v27  ;;  %v1878_v28 = vmul.f32 %v3217_v26, %v3108_v33  ;;  %v1879_v9 = vmul.f32 %v3217_v26, %v3111_v32  ;;  %v1880_v10 = vmul.f32 %v3217_v26, %v3114_v45 }
 0x1d5   : > { %1970 = vst.msk [vmem:[%s3345_s3 + $0xc] sm:$0xf] %vm1966_vm12, %v1953_v62  ;;  %v1955_v8 = vpack.c.bf16 %v1939_v49, %v1939_v49  ;;  %v1940_v16 = vsel %vm1908_vm3, %v1892_v47, %v1924_v39  ;;  %v1941_v42 = vsel %vm1909_vm4, %v1893_v15, %v1925_v3  ;;  %v1894_v11 = vadd.f32 %v3219_v30, %v1876_v5 }
 0x1d6   : > { %1971 = vst.msk [vmem:[%s3345_s3 + $0x10] sm:$0xf] %vm1966_vm12, %v1954_v2  ;;  %v1956_v33 = vpack.c.bf16 %v1940_v16, %v1940_v16  ;;  %v1957_v32 = vpack.c.bf16 %v1941_v42, %v1941_v42  ;;  %v1895_v12 = vadd.f32 %v3219_v30, %v1877_v43  ;;  %v1896_v45 = vadd.f32 %v3219_v30, %v1878_v28 }
 0x1d7   : > { %1972 = vst.msk [vmem:[%s3345_s3 + $0x14] sm:$0xf] %vm1966_vm12, %v1955_v8  ;;  %vm1910_vm5 = vcmp.ge.f32.partialorder %v1894_v11, 0.0  ;;  %v1926_v13 = vmul.f32 0.01, %v1894_v11  ;;  %v1897_v60 = vadd.f32 %v3219_v30, %v1879_v9  ;;  %v1898_v17 = vadd.f32 %v3219_v30, %v1880_v10 }
 0x1d8   : > { %1973 = vst.msk [vmem:[%s3345_s3 + $0x18] sm:$0xf] %vm1966_vm12, %v1956_v33  ;;  %vm1911_vm6 = vcmp.ge.f32.partialorder %v1895_v12, 0.0  ;;  %v1927_v38 = vmul.f32 0.01, %v1895_v12  ;;  %vm1912_vm7 = vcmp.ge.f32.partialorder %v1896_v45, 0.0  ;;  %v1881_v18 = vmul.f32 %v3217_v26, %v3117_v44 }
 0x1d9   : > { %1974 = vst.msk [vmem:[%s3345_s3 + $0x1c] sm:$0xf] %vm1966_vm12, %v1957_v32  ;;  %v1942_v20 = vsel %vm1910_vm5, %v1894_v11, %v1926_v13  ;;  %v1928_v21 = vmul.f32 0.01, %v1896_v45  ;;  %vm1913_vm8 = vcmp.ge.f32.partialorder %v1897_v60, 0.0  ;;  %vm1914_vm9 = vcmp.ge.f32.partialorder %v1898_v17, 0.0 }
 0x1da   : > { %v1958_v22 = vpack.c.bf16 %v1942_v20, %v1942_v20  ;;  %v1943_v29 = vsel %vm1911_vm6, %v1895_v12, %v1927_v38  ;;  %v1929_v24 = vmul.f32 0.01, %v1897_v60  ;;  %v1930_v4 = vmul.f32 0.01, %v1898_v17 }
 0x1db   : > { %v1959_v31 = vpack.c.bf16 %v1943_v29, %v1943_v29  ;;  %v1944_v35 = vsel %vm1912_vm7, %v1896_v45, %v1928_v21  ;;  %v1899_v58 = vadd.f32 %v3219_v30, %v1881_v18  ;;  %v1882_v44 = vmul.f32 %v3217_v26, %v3120_v59 }
 0x1dc   : > { %1975 = vst.msk [vmem:[%s3345_s3 + $0x20] sm:$0xf] %vm1966_vm12, %v1958_v22  ;;  %v1960_v40 = vpack.c.bf16 %v1944_v35, %v1944_v35  ;;  %v1945_v36 = vsel %vm1913_vm8, %v1897_v60, %v1929_v24  ;;  %v1946_v37 = vsel %vm1914_vm9, %v1898_v17, %v1930_v4  ;;  %v1883_v41 = vmul.f32 %v3217_v26, %v3123_v6 }
 0x1dd   : > { %1976 = vst.msk [vmem:[%s3345_s3 + $0x24] sm:$0xf] %vm1966_vm12, %v1959_v31  ;;  %v1961_v61 = vpack.c.bf16 %v1945_v36, %v1945_v36  ;;  %v1962_v7 = vpack.c.bf16 %v1946_v37, %v1946_v37  ;;  %vm1915_vm10 = vcmp.ge.f32.partialorder %v1899_v58, 0.0  ;;  %v1931_v59 = vmul.f32 0.01, %v1899_v58 }
 0x1de   : > { %1977 = vst.msk [vmem:[%s3345_s3 + $0x28] sm:$0xf] %vm1966_vm12, %v1960_v40  ;;  %v1900_v46 = vadd.f32 %v3219_v30, %v1882_v44  ;;  %v1901_v14 = vadd.f32 %v3219_v30, %v1883_v41 }
 0x1df   : > { %1978 = vst.msk [vmem:[%s3345_s3 + $0x2c] sm:$0xf] %vm1966_vm12, %v1961_v61  ;;  %v1947_v6 = vsel %vm1915_vm10, %v1899_v58, %v1931_v59 }
 0x1e0   : > { %1979 = vst.msk [vmem:[%s3345_s3 + $0x30] sm:$0xf] %vm1966_vm12, %v1962_v7  ;;  %v1963_v26 = vpack.c.bf16 %v1947_v6, %v1947_v6  ;;  %vm1916_vm11 = vcmp.ge.f32.partialorder %v1900_v46, 0.0  ;;  %v1932_v23 = vmul.f32 0.01, %v1900_v46  ;;  %vm1917_vm13 = vcmp.ge.f32.partialorder %v1901_v14, 0.0 }
 0x1e1   : > { %v1933_v48 = vmul.f32 0.01, %v1901_v14 }
 0x1e2   : > { %1980 = vst.msk [vmem:[%s3345_s3 + $0x34] sm:$0xf] %vm1966_vm12, %v1963_v26  ;;  %v1948_v30 = vsel %vm1916_vm11, %v1900_v46, %v1932_v23 }
 0x1e3   : > { %v1964_v34 = vpack.c.bf16 %v1948_v30, %v1948_v30  ;;  %v1949_v47 = vsel %vm1917_vm13, %v1901_v14, %v1933_v48 }
 0x1e4   : > { %v1965_v15 = vpack.c.bf16 %v1949_v47, %v1949_v47 }
 0x1e5   : > { %1981 = vst.msk [vmem:[%s3345_s3 + $0x38] sm:$0xf] %vm1966_vm12, %v1964_v34 }
 0x1e6   : > { %1982 = vst.msk [vmem:[%s3345_s3 + $0x3c] sm:$0xf] %vm1966_vm12, %v1965_v15 }
 0x1e7 PF: > { %s13_s14 = sadd.s32 1, %s2389_s14   ;;  %s3348_s12 = smov %s2385_s13 }
 0x1e8   : > { %p10_p7 = scmp.ge.s32.totalorder %s13_s14, 4   ;;  %s3349_s13 = smov %s3351_s15 }
 0x1ea   :  { %12 = sbr.rel (!%p10_p7) target bundleno = 2 (0x2), region = 85 }

</bundles_post_ra>
